<compile_context>
chip_gen: v7x
topology: tpu7x:2x2x1
jax: 0.10.0
libtpu: 0.0.40
codegen_flags: <defaults>
</compile_context>

<pallas_src>
import functools

import jax
import jax.numpy as jnp
from jax import lax
from jax.experimental import pallas as pl
from jax.experimental.pallas import tpu as pltpu

# Architecture constants (fixed by the PyTorch module).
KH = 10            # kernel height of all three convs
STRIDE = 4         # stride of all three convs
KW1 = 39           # conv1 kernel width (== input width -> output width 1)
C1, C2, C3 = 3, 15, 65
LANES = 128        # lane padding of all channel dims

OH1 = 46           # conv1 output rows consumed downstream
OH2 = 10           # conv2 output rows consumed by conv3
NQ = 48            # 192 padded input rows, grouped 4-at-a-time into lanes
NP = NQ // STRIDE  # 12 conv1 rows per residue class after regrouping
K1 = 512           # conv1 im2col K (390 real, lane padded to 512)


# ----------------------------------------------------------------------------
# Fused kernel: one grid step == TB batch elements
# ----------------------------------------------------------------------------
def _cnn_kernel(x_ref, w1_ref, b1_ref, w2_ref, b2_ref, w3_ref, b3_ref, p_ref,
                o_ref, ic2_ref, *, tb, num_classes):
    f32 = jnp.float32
    xv = x_ref[...].astype(f32)                              # (tb, 48, 156)

    # ---- conv1: im2col built in-VMEM as three q-shifted lane segments -------
    ic1 = jnp.concatenate([
        xv[:, 0:OH1, :],                                     # kh 0..3
        xv[:, 1:OH1 + 1, :],                                 # kh 4..7
        xv[:, 2:OH1 + 2, 0:2 * KW1],                         # kh 8..9
        jnp.zeros((tb, OH1, K1 - KH * KW1), f32),            # lane pad 390->512
    ], axis=2)                                               # (tb, 46, 512)
    ic1 = jnp.concatenate(
        [ic1, jnp.zeros((tb, NQ - OH1, K1), f32)], axis=1)   # (tb, 48, 512)
    lhs1 = ic1.reshape(tb * NQ, K1)                          # free (48 % 8 == 0)

    y1 = jnp.maximum(
        jnp.dot(lhs1, w1_ref[...], preferred_element_type=f32) + b1_ref[...],
        0.0)                                                 # (tb*48, 128)
    y1 = y1.reshape(tb, NQ, LANES)

    # ---- regroup rows by (row % 4) via a one-hot permutation matmul ---------
    pmat = jnp.broadcast_to(p_ref[...], (tb, NQ, NQ))
    y1g = jnp.einsum("bot,btc->boc", pmat, y1)               # row r*12+p == y1 row 4p+r

    # ---- conv2: deep-K im2col in scratch -> single matmul -------------------
    ic2_ref[...] = jnp.zeros((tb, 16, LANES), f32)           # zero every step (parallel-safe)
    for kh in range(KH):
        q0, r0 = divmod(kh, STRIDE)
        o0 = r0 * NP + q0
        ic2_ref[:, 0:OH2, kh * 8:(kh + 1) * 8] = y1g[:, o0:o0 + OH2, 0:8]
    lhs2 = ic2_ref[...].reshape(tb * 16, LANES)              # free (16 % 8 == 0)
    y2 = jnp.maximum(
        jnp.dot(lhs2, w2_ref[...], preferred_element_type=f32) + b2_ref[...],
        0.0)
    y2 = y2.reshape(tb, 16, LANES)                           # rows >= 10 unused

    # ---- conv3 + fc folded (no ReLU between them in the reference) ----------
    acc3 = jnp.zeros((tb, LANES), f32)
    for kh in range(KH):
        acc3 = acc3 + jnp.dot(y2[:, kh, 0:16], w3_ref[kh],
                              preferred_element_type=f32)
    logits = acc3 + b3_ref[...]                              # (tb, 128)

    # ---- softmax over the first num_classes lanes ----------------------------
    lane = lax.broadcasted_iota(jnp.int32, (tb, LANES), 1)
    logits = jnp.where(lane < num_classes, logits, -1e30)
    m = jnp.max(logits, axis=-1, keepdims=True)
    e = jnp.exp(logits - m)
    s = jnp.sum(e, axis=-1, keepdims=True)
    inv = pl.reciprocal(s, approx=True)                      # EUP slot
    inv = inv * (2.0 - s * inv)                              # one Newton step
    o_ref[...] = e * inv                                     # lane-dense (tb,128) store


# ----------------------------------------------------------------------------
# Parameters (mirrors nn.Conv2d/Linear shapes + kaiming fan_out init)
# ----------------------------------------------------------------------------
def init_params(key, num_classes=3):
    ks = jax.random.split(key, 8)

    def conv_w(k, c_out, c_in, kh, kw):
        fan_out = c_out * kh * kw
        return ((2.0 / fan_out) ** 0.5) * jax.random.normal(
            k, (c_out, c_in, kh, kw), jnp.float32)

    def conv_b(k, c_out, c_in, kh, kw):
        bound = 1.0 / ((c_in * kh * kw) ** 0.5)
        return jax.random.uniform(k, (c_out,), jnp.float32, -bound, bound)

    params = {
        "w1": conv_w(ks[0], C1, 1, KH, KW1), "b1": conv_b(ks[1], C1, 1, KH, KW1),
        "w2": conv_w(ks[2], C2, C1, KH, 1), "b2": conv_b(ks[3], C2, C1, KH, 1),
        "w3": conv_w(ks[4], C3, C2, KH, 1), "b3": conv_b(ks[5], C3, C2, KH, 1),
    }
    bound_fc = 1.0 / (C3 ** 0.5)
    params["wfc"] = jax.random.uniform(ks[6], (num_classes, C3), jnp.float32,
                                       -bound_fc, bound_fc)
    params["bfc"] = jax.random.uniform(ks[7], (num_classes,), jnp.float32,
                                       -bound_fc, bound_fc)
    return params


def prepare_params(params, num_classes=3):
    """One-time repack into lane-dense matmul operands (hoisted out of forward)."""
    f32 = jnp.float32
    # conv1 im2col weights: column = 39*kh + kw  ->  (512, 128)
    w1m = params["w1"].reshape(C1, KH * KW1).T.astype(f32)
    w1p = jnp.zeros((K1, LANES), f32).at[:KH * KW1, :C1].set(w1m)
    b1p = jnp.zeros((1, LANES), f32).at[0, :C1].set(params["b1"])

    # conv2 deep-K weights: row = kh*8 + c_in  ->  (128, 128)
    w2k = jnp.transpose(params["w2"][:, :, :, 0], (2, 1, 0)).astype(f32)  # (10,3,15)
    w2k = jnp.pad(w2k, ((0, 0), (0, 8 - C1), (0, 0))).reshape(KH * 8, C2)
    w2p = jnp.zeros((LANES, LANES), f32).at[:KH * 8, :C2].set(w2k)
    b2p = jnp.zeros((1, LANES), f32).at[0, :C2].set(params["b2"])

    # conv3 folded with fc (exact, no ReLU in between): (10, 16, 128)
    w3s = params["w3"][:, :, :, 0].astype(f32)               # (65, 15, 10)
    wfc = params["wfc"].astype(f32)                          # (nc, 65)
    w3fc = jnp.einsum("ack,na->kcn", w3s, wfc)               # (10, 15, nc)
    w3p = jnp.zeros((KH, 16, LANES), f32).at[:, :C2, :num_classes].set(w3fc)
    b3fc = wfc @ params["b3"].astype(f32) + params["bfc"].astype(f32)
    b3p = jnp.zeros((1, LANES), f32).at[0, :num_classes].set(b3fc)

    # sublane permutation: output row o = r*12 + p selects y1 row 4p + r
    o = jnp.arange(NQ)
    perm = jax.nn.one_hot(4 * (o % NP) + o // NP, NQ, dtype=f32)
    return dict(w1=w1p, b1=b1p, w2=w2p, b2=b2p, w3=w3p, b3=b3p, perm=perm)


# ----------------------------------------------------------------------------
# Forward pass (matches torch CNN.forward semantics)
# ----------------------------------------------------------------------------
@functools.partial(jax.jit, static_argnames=("num_classes", "tb"))
def cnn_forward(x, prepped, num_classes=3, tb=8):
    """x: (B, 1, H, 39) NCHW, like the PyTorch module."""
    B, c_in, H, W = x.shape
    assert c_in == 1 and W == KW1
    oh1 = (H - KH) // STRIDE + 1
    oh2 = (oh1 - KH) // STRIDE + 1
    oh3 = (oh2 - KH) // STRIDE + 1
    assert oh1 >= OH1 and oh2 >= OH2 and oh3 == 1     # fc expects exactly 65 features

    b_pad = -(-B // tb) * tb
    xs = x[:, 0, :STRIDE * NQ - 2, :]                  # rows 0..189: all that's consumed
    xs = jnp.pad(xs, ((0, b_pad - B), (0, 2), (0, 0)))           # rows 190 -> 192
    xq = xs.reshape(b_pad, NQ, STRIDE * KW1).astype(jnp.bfloat16)  # (B',48,156)

    pr = prepped
    kernel = functools.partial(_cnn_kernel, tb=tb, num_classes=num_classes)
    out = pl.pallas_call(
        kernel,
        out_shape=jax.ShapeDtypeStruct((b_pad, LANES), jnp.float32),
        grid=(b_pad // tb,),
        in_specs=[
            pl.BlockSpec((tb, NQ, STRIDE * KW1), lambda g: (g, 0, 0)),
            pl.BlockSpec((K1, LANES), lambda g: (0, 0)),
            pl.BlockSpec((1, LANES), lambda g: (0, 0)),
            pl.BlockSpec((LANES, LANES), lambda g: (0, 0)),
            pl.BlockSpec((1, LANES), lambda g: (0, 0)),
            pl.BlockSpec((KH, 16, LANES), lambda g: (0, 0, 0)),
            pl.BlockSpec((1, LANES), lambda g: (0, 0)),
            pl.BlockSpec((NQ, NQ), lambda g: (0, 0)),
        ],
        out_specs=pl.BlockSpec((tb, LANES), lambda g: (g, 0)),
        scratch_shapes=[pltpu.VMEM((tb, 16, LANES), jnp.float32)],   # conv2 im2col
        compiler_params=pltpu.CompilerParams(
            dimension_semantics=("parallel",)),        # v7x: split batch over 2 TCs
    )(xq, pr["w1"], pr["b1"], pr["w2"], pr["b2"], pr["w3"], pr["b3"], pr["perm"])
    return out[:B, :num_classes]


# ----------------------------------------------------------------------------
# Pure-JAX reference (correctness check only)
# ----------------------------------------------------------------------------
def cnn_reference(x, params):
    dn = ("NCHW", "OIHW", "NCHW")
    y = lax.conv_general_dilated(x, params["w1"], (STRIDE, STRIDE), "VALID",
                                 dimension_numbers=dn)
    y = jnp.maximum(y + params["b1"][None, :, None, None], 0.0)
    y = lax.conv_general_dilated(y, params["w2"], (STRIDE, STRIDE), "VALID",
                                 dimension_numbers=dn)
    y = jnp.maximum(y + params["b2"][None, :, None, None], 0.0)
    y = lax.conv_general_dilated(y, params["w3"], (STRIDE, STRIDE), "VALID",
                                 dimension_numbers=dn)
    y = y + params["b3"][None, :, None, None]
    y = y.reshape(y.shape[0], -1)
    logits = y @ params["wfc"].T + params["bfc"]
    return jax.nn.softmax(logits, axis=-1)


# ----------------------------------------------------------------------------
if __name__ == "__main__":
    key = jax.random.PRNGKey(0)
    kx, kp = jax.random.split(key)

    # Smallest spatial size compatible with the architecture:
    # (190, 39) -> conv1 (46, 1) -> conv2 (10, 1) -> conv3 (1, 1) -> 65 feats.
    # B=12 with TB=8 exercises batch padding AND a 2-step ("parallel") grid.
    B = 12
    x = jax.random.normal(kx, (B, 1, 190, 39), jnp.float32)
    params = init_params(kp, num_classes=3)
    prepped = prepare_params(params, num_classes=3)

    out = jax.block_until_ready(cnn_forward(x, prepped, num_classes=3, tb=8))
    ref = jax.block_until_ready(cnn_reference(x, params))

    assert out.shape == (B, 3)
    assert bool(jnp.all(jnp.isfinite(out)))
    assert bool(jnp.allclose(jnp.sum(out, axis=-1), 1.0, atol=1e-4))
    # loose tolerance: bf16 input + MXU matmuls vs XLA f32 convolutions
    assert float(jnp.max(jnp.abs(out - ref))) < 2e-2
    print("KERNEL_OK")
</pallas_src>

<mosaic_0001>
module attributes {stable_mosaic.version = 11 : i64} {
  func.func @_cnn_kernel(%arg0: i32, %arg1: memref<8x48x156xbf16, #tpu.memory_space<vmem>>, %arg2: memref<512x128xf32, #tpu.memory_space<vmem>>, %arg3: memref<1x128xf32, #tpu.memory_space<vmem>>, %arg4: memref<128x128xf32, #tpu.memory_space<vmem>>, %arg5: memref<1x128xf32, #tpu.memory_space<vmem>>, %arg6: memref<10x16x128xf32, #tpu.memory_space<vmem>>, %arg7: memref<1x128xf32, #tpu.memory_space<vmem>>, %arg8: memref<48x48xf32, #tpu.memory_space<vmem>>, %arg9: memref<8x128xf32, #tpu.memory_space<vmem>>, %arg10: memref<8x16x128xf32, #tpu.memory_space<vmem>>) attributes {dimension_semantics = [#tpu.dimension_semantics<parallel>], iteration_bounds = array<i64: 2>, scalar_prefetch = 0 : i64, scratch_operands = 1 : i64, tpu.core_type = #tpu.core_type<tc>, window_params = [{transform_indices = @transform_0, window_bounds = array<i64: 8, 48, 156>}, {pipeline_mode = #tpu.pipeline_mode<synchronous>, transform_indices = @transform_1, window_bounds = array<i64: 512, 128>}, {pipeline_mode = #tpu.pipeline_mode<synchronous>, transform_indices = @transform_2, window_bounds = array<i64: 1, 128>}, {pipeline_mode = #tpu.pipeline_mode<synchronous>, transform_indices = @transform_3, window_bounds = array<i64: 128, 128>}, {pipeline_mode = #tpu.pipeline_mode<synchronous>, transform_indices = @transform_4, window_bounds = array<i64: 1, 128>}, {pipeline_mode = #tpu.pipeline_mode<synchronous>, transform_indices = @transform_5, window_bounds = array<i64: 10, 16, 128>}, {pipeline_mode = #tpu.pipeline_mode<synchronous>, transform_indices = @transform_6, window_bounds = array<i64: 1, 128>}, {pipeline_mode = #tpu.pipeline_mode<synchronous>, transform_indices = @transform_7, window_bounds = array<i64: 48, 48>}, {transform_indices = @transform_8, window_bounds = array<i64: 8, 128>}]} {
    %c0 = arith.constant 0 : index
    %c0_0 = arith.constant 0 : index
    %c0_1 = arith.constant 0 : index
    %0 = vector.load %arg1[%c0, %c0_0, %c0_1] : memref<8x48x156xbf16, #tpu.memory_space<vmem>>, vector<8x48x156xbf16>
    %1 = arith.extf %0 : vector<8x48x156xbf16> to vector<8x48x156xf32>
    %2 = vector.extract_strided_slice %1 {offsets = [0, 0, 0], sizes = [8, 46, 156], strides = [1, 1, 1]} : vector<8x48x156xf32> to vector<8x46x156xf32>
    %3 = vector.extract_strided_slice %1 {offsets = [0, 1, 0], sizes = [8, 46, 156], strides = [1, 1, 1]} : vector<8x48x156xf32> to vector<8x46x156xf32>
    %4 = vector.extract_strided_slice %1 {offsets = [0, 2, 0], sizes = [8, 46, 78], strides = [1, 1, 1]} : vector<8x48x156xf32> to vector<8x46x78xf32>
    %cst = arith.constant 0.000000e+00 : f32
    %5 = vector.broadcast %cst : f32 to vector<8x46x122xf32>
    %6 = tpu.concatenate %2, %3, %4, %5 in 2 : vector<8x46x156xf32>, vector<8x46x156xf32>, vector<8x46x78xf32>, vector<8x46x122xf32> -> vector<8x46x512xf32>
    %cst_2 = arith.constant 0.000000e+00 : f32
    %7 = vector.broadcast %cst_2 : f32 to vector<8x2x512xf32>
    %8 = tpu.concatenate %6, %7 in 1 : vector<8x46x512xf32>, vector<8x2x512xf32> -> vector<8x48x512xf32>
    %9 = vector.shape_cast %8 : vector<8x48x512xf32> to vector<384x512xf32>
    %c0_3 = arith.constant 0 : index
    %c0_4 = arith.constant 0 : index
    %10 = vector.load %arg2[%c0_3, %c0_4] : memref<512x128xf32, #tpu.memory_space<vmem>>, vector<512x128xf32>
    %cst_5 = arith.constant dense<0.000000e+00> : vector<384x128xf32>
    %11 = tpu.matmul %9, %10, %cst_5 {dimension_numbers = #tpu.dot_dimension_numbers<[1], [0], [0], [1], [0, 0, 1, 1], [], []>} : vector<384x512xf32>, vector<512x128xf32>, vector<384x128xf32> -> vector<384x128xf32>
    %c0_6 = arith.constant 0 : index
    %c0_7 = arith.constant 0 : index
    %12 = vector.load %arg3[%c0_6, %c0_7] : memref<1x128xf32, #tpu.memory_space<vmem>>, vector<1x128xf32>
    %13 = vector.broadcast %12 : vector<1x128xf32> to vector<384x128xf32>
    %14 = arith.addf %11, %13 : vector<384x128xf32>
    %cst_8 = arith.constant 0.000000e+00 : f32
    %15 = vector.broadcast %cst_8 : f32 to vector<384x128xf32>
    %16 = arith.maximumf %14, %15 : vector<384x128xf32>
    %17 = vector.shape_cast %16 : vector<384x128xf32> to vector<8x48x128xf32>
    %c0_9 = arith.constant 0 : index
    %c0_10 = arith.constant 0 : index
    %18 = vector.load %arg8[%c0_9, %c0_10] : memref<48x48xf32, #tpu.memory_space<vmem>>, vector<48x48xf32>
    %19 = vector.shape_cast %18 : vector<48x48xf32> to vector<1x48x48xf32>
    %20 = vector.broadcast %19 : vector<1x48x48xf32> to vector<8x48x48xf32>
    "tpu.trace_start"() <{level = 10 : i32, message = "bot,btc->boc"}> : () -> ()
    %cst_11 = arith.constant dense<0.000000e+00> : vector<8x48x128xf32>
    %21 = tpu.matmul %20, %17, %cst_11 {dimension_numbers = #tpu.dot_dimension_numbers<[2], [1], [1], [2], [0, 0, 0, 1, 1, 2], [0], [0]>} : vector<8x48x48xf32>, vector<8x48x128xf32>, vector<8x48x128xf32> -> vector<8x48x128xf32>
    %cst_12 = arith.constant 0.000000e+00 : f32
    "tpu.trace_stop"() : () -> ()
    %22 = vector.broadcast %cst_12 : f32 to vector<8x16x128xf32>
    %c0_13 = arith.constant 0 : index
    %c0_14 = arith.constant 0 : index
    %c0_15 = arith.constant 0 : index
    %23 = vector.load %arg10[%c0_13, %c0_14, %c0_15] : memref<8x16x128xf32, #tpu.memory_space<vmem>>, vector<8x16x128xf32>
    tpu.vector_store %arg10[%c0_13, %c0_14, %c0_15], %22 {strides = array<i32>} : memref<8x16x128xf32, #tpu.memory_space<vmem>>, vector<8x16x128xf32>,
    %24 = vector.extract_strided_slice %21 {offsets = [0, 0, 0], sizes = [8, 10, 8], strides = [1, 1, 1]} : vector<8x48x128xf32> to vector<8x10x8xf32>
    %c0_16 = arith.constant 0 : index
    %c0_17 = arith.constant 0 : index
    %c0_18 = arith.constant 0 : index
    %25 = vector.load %arg10[%c0_16, %c0_17, %c0_18] : memref<8x16x128xf32, #tpu.memory_space<vmem>>, vector<8x10x8xf32>
    tpu.vector_store %arg10[%c0_16, %c0_17, %c0_18], %24 {strides = array<i32>} : memref<8x16x128xf32, #tpu.memory_space<vmem>>, vector<8x10x8xf32>,
    %26 = vector.extract_strided_slice %21 {offsets = [0, 12, 0], sizes = [8, 10, 8], strides = [1, 1, 1]} : vector<8x48x128xf32> to vector<8x10x8xf32>
    %c0_19 = arith.constant 0 : index
    %c0_20 = arith.constant 0 : index
    %c8 = arith.constant 8 : index
    %27 = vector.load %arg10[%c0_19, %c0_20, %c8] : memref<8x16x128xf32, #tpu.memory_space<vmem>>, vector<8x10x8xf32>
    tpu.vector_store %arg10[%c0_19, %c0_20, %c8], %26 {strides = array<i32>} : memref<8x16x128xf32, #tpu.memory_space<vmem>>, vector<8x10x8xf32>,
    %28 = vector.extract_strided_slice %21 {offsets = [0, 24, 0], sizes = [8, 10, 8], strides = [1, 1, 1]} : vector<8x48x128xf32> to vector<8x10x8xf32>
    %c0_21 = arith.constant 0 : index
    %c0_22 = arith.constant 0 : index
    %c16 = arith.constant 16 : index
    %29 = vector.load %arg10[%c0_21, %c0_22, %c16] : memref<8x16x128xf32, #tpu.memory_space<vmem>>, vector<8x10x8xf32>
    tpu.vector_store %arg10[%c0_21, %c0_22, %c16], %28 {strides = array<i32>} : memref<8x16x128xf32, #tpu.memory_space<vmem>>, vector<8x10x8xf32>,
    %30 = vector.extract_strided_slice %21 {offsets = [0, 36, 0], sizes = [8, 10, 8], strides = [1, 1, 1]} : vector<8x48x128xf32> to vector<8x10x8xf32>
    %c0_23 = arith.constant 0 : index
    %c0_24 = arith.constant 0 : index
    %c24 = arith.constant 24 : index
    %31 = vector.load %arg10[%c0_23, %c0_24, %c24] : memref<8x16x128xf32, #tpu.memory_space<vmem>>, vector<8x10x8xf32>
    tpu.vector_store %arg10[%c0_23, %c0_24, %c24], %30 {strides = array<i32>} : memref<8x16x128xf32, #tpu.memory_space<vmem>>, vector<8x10x8xf32>,
    %32 = vector.extract_strided_slice %21 {offsets = [0, 1, 0], sizes = [8, 10, 8], strides = [1, 1, 1]} : vector<8x48x128xf32> to vector<8x10x8xf32>
    %c0_25 = arith.constant 0 : index
    %c0_26 = arith.constant 0 : index
    %c32 = arith.constant 32 : index
    %33 = vector.load %arg10[%c0_25, %c0_26, %c32] : memref<8x16x128xf32, #tpu.memory_space<vmem>>, vector<8x10x8xf32>
    tpu.vector_store %arg10[%c0_25, %c0_26, %c32], %32 {strides = array<i32>} : memref<8x16x128xf32, #tpu.memory_space<vmem>>, vector<8x10x8xf32>,
    %34 = vector.extract_strided_slice %21 {offsets = [0, 13, 0], sizes = [8, 10, 8], strides = [1, 1, 1]} : vector<8x48x128xf32> to vector<8x10x8xf32>
    %c0_27 = arith.constant 0 : index
    %c0_28 = arith.constant 0 : index
    %c40 = arith.constant 40 : index
    %35 = vector.load %arg10[%c0_27, %c0_28, %c40] : memref<8x16x128xf32, #tpu.memory_space<vmem>>, vector<8x10x8xf32>
    tpu.vector_store %arg10[%c0_27, %c0_28, %c40], %34 {strides = array<i32>} : memref<8x16x128xf32, #tpu.memory_space<vmem>>, vector<8x10x8xf32>,
    %36 = vector.extract_strided_slice %21 {offsets = [0, 25, 0], sizes = [8, 10, 8], strides = [1, 1, 1]} : vector<8x48x128xf32> to vector<8x10x8xf32>
    %c0_29 = arith.constant 0 : index
    %c0_30 = arith.constant 0 : index
    %c48 = arith.constant 48 : index
    %37 = vector.load %arg10[%c0_29, %c0_30, %c48] : memref<8x16x128xf32, #tpu.memory_space<vmem>>, vector<8x10x8xf32>
    tpu.vector_store %arg10[%c0_29, %c0_30, %c48], %36 {strides = array<i32>} : memref<8x16x128xf32, #tpu.memory_space<vmem>>, vector<8x10x8xf32>,
    %38 = vector.extract_strided_slice %21 {offsets = [0, 37, 0], sizes = [8, 10, 8], strides = [1, 1, 1]} : vector<8x48x128xf32> to vector<8x10x8xf32>
    %c0_31 = arith.constant 0 : index
    %c0_32 = arith.constant 0 : index
    %c56 = arith.constant 56 : index
    %39 = vector.load %arg10[%c0_31, %c0_32, %c56] : memref<8x16x128xf32, #tpu.memory_space<vmem>>, vector<8x10x8xf32>
    tpu.vector_store %arg10[%c0_31, %c0_32, %c56], %38 {strides = array<i32>} : memref<8x16x128xf32, #tpu.memory_space<vmem>>, vector<8x10x8xf32>,
    %40 = vector.extract_strided_slice %21 {offsets = [0, 2, 0], sizes = [8, 10, 8], strides = [1, 1, 1]} : vector<8x48x128xf32> to vector<8x10x8xf32>
    %c0_33 = arith.constant 0 : index
    %c0_34 = arith.constant 0 : index
    %c64 = arith.constant 64 : index
    %41 = vector.load %arg10[%c0_33, %c0_34, %c64] : memref<8x16x128xf32, #tpu.memory_space<vmem>>, vector<8x10x8xf32>
    tpu.vector_store %arg10[%c0_33, %c0_34, %c64], %40 {strides = array<i32>} : memref<8x16x128xf32, #tpu.memory_space<vmem>>, vector<8x10x8xf32>,
    %42 = vector.extract_strided_slice %21 {offsets = [0, 14, 0], sizes = [8, 10, 8], strides = [1, 1, 1]} : vector<8x48x128xf32> to vector<8x10x8xf32>
    %c0_35 = arith.constant 0 : index
    %c0_36 = arith.constant 0 : index
    %c72 = arith.constant 72 : index
    %43 = vector.load %arg10[%c0_35, %c0_36, %c72] : memref<8x16x128xf32, #tpu.memory_space<vmem>>, vector<8x10x8xf32>
    tpu.vector_store %arg10[%c0_35, %c0_36, %c72], %42 {strides = array<i32>} : memref<8x16x128xf32, #tpu.memory_space<vmem>>, vector<8x10x8xf32>,
    %c0_37 = arith.constant 0 : index
    %c0_38 = arith.constant 0 : index
    %c0_39 = arith.constant 0 : index
    %44 = vector.load %arg10[%c0_37, %c0_38, %c0_39] : memref<8x16x128xf32, #tpu.memory_space<vmem>>, vector<8x16x128xf32>
    %45 = vector.shape_cast %44 : vector<8x16x128xf32> to vector<128x128xf32>
    %c0_40 = arith.constant 0 : index
    %c0_41 = arith.constant 0 : index
    %46 = vector.load %arg4[%c0_40, %c0_41] : memref<128x128xf32, #tpu.memory_space<vmem>>, vector<128x128xf32>
    %cst_42 = arith.constant dense<0.000000e+00> : vector<128x128xf32>
    %47 = tpu.matmul %45, %46, %cst_42 {dimension_numbers = #tpu.dot_dimension_numbers<[1], [0], [0], [1], [0, 0, 1, 1], [], []>} : vector<128x128xf32>, vector<128x128xf32>, vector<128x128xf32> -> vector<128x128xf32>
    %c0_43 = arith.constant 0 : index
    %c0_44 = arith.constant 0 : index
    %48 = vector.load %arg5[%c0_43, %c0_44] : memref<1x128xf32, #tpu.memory_space<vmem>>, vector<1x128xf32>
    %49 = vector.broadcast %48 : vector<1x128xf32> to vector<128x128xf32>
    %50 = arith.addf %47, %49 : vector<128x128xf32>
    %cst_45 = arith.constant 0.000000e+00 : f32
    %51 = vector.broadcast %cst_45 : f32 to vector<128x128xf32>
    %52 = arith.maximumf %50, %51 : vector<128x128xf32>
    %53 = vector.shape_cast %52 : vector<128x128xf32> to vector<8x16x128xf32>
    %cst_46 = arith.constant 0.000000e+00 : f32
    %54 = vector.broadcast %cst_46 : f32 to vector<8x128xf32>
    %55 = vector.extract_strided_slice %53 {offsets = [0, 0, 0], sizes = [8, 1, 16], strides = [1, 1, 1]} : vector<8x16x128xf32> to vector<8x1x16xf32>
    %56 = vector.shape_cast %55 : vector<8x1x16xf32> to vector<8x16xf32>
    %c0_47 = arith.constant 0 : index
    %c0_48 = arith.constant 0 : index
    %c0_49 = arith.constant 0 : index
    %57 = vector.load %arg6[%c0_47, %c0_48, %c0_49] : memref<10x16x128xf32, #tpu.memory_space<vmem>>, vector<1x16x128xf32>
    %58 = vector.shape_cast %57 : vector<1x16x128xf32> to vector<16x128xf32>
    %cst_50 = arith.constant dense<0.000000e+00> : vector<8x128xf32>
    %59 = tpu.matmul %56, %58, %cst_50 {dimension_numbers = #tpu.dot_dimension_numbers<[1], [0], [0], [1], [0, 0, 1, 1], [], []>} : vector<8x16xf32>, vector<16x128xf32>, vector<8x128xf32> -> vector<8x128xf32>
    %60 = arith.addf %54, %59 : vector<8x128xf32>
    %61 = vector.extract_strided_slice %53 {offsets = [0, 1, 0], sizes = [8, 1, 16], strides = [1, 1, 1]} : vector<8x16x128xf32> to vector<8x1x16xf32>
    %62 = vector.shape_cast %61 : vector<8x1x16xf32> to vector<8x16xf32>
    %c1 = arith.constant 1 : index
    %c0_51 = arith.constant 0 : index
    %c0_52 = arith.constant 0 : index
    %63 = vector.load %arg6[%c1, %c0_51, %c0_52] : memref<10x16x128xf32, #tpu.memory_space<vmem>>, vector<1x16x128xf32>
    %64 = vector.shape_cast %63 : vector<1x16x128xf32> to vector<16x128xf32>
    %cst_53 = arith.constant dense<0.000000e+00> : vector<8x128xf32>
    %65 = tpu.matmul %62, %64, %cst_53 {dimension_numbers = #tpu.dot_dimension_numbers<[1], [0], [0], [1], [0, 0, 1, 1], [], []>} : vector<8x16xf32>, vector<16x128xf32>, vector<8x128xf32> -> vector<8x128xf32>
    %66 = arith.addf %60, %65 : vector<8x128xf32>
    %67 = vector.extract_strided_slice %53 {offsets = [0, 2, 0], sizes = [8, 1, 16], strides = [1, 1, 1]} : vector<8x16x128xf32> to vector<8x1x16xf32>
    %68 = vector.shape_cast %67 : vector<8x1x16xf32> to vector<8x16xf32>
    %c2 = arith.constant 2 : index
    %c0_54 = arith.constant 0 : index
    %c0_55 = arith.constant 0 : index
    %69 = vector.load %arg6[%c2, %c0_54, %c0_55] : memref<10x16x128xf32, #tpu.memory_space<vmem>>, vector<1x16x128xf32>
    %70 = vector.shape_cast %69 : vector<1x16x128xf32> to vector<16x128xf32>
    %cst_56 = arith.constant dense<0.000000e+00> : vector<8x128xf32>
    %71 = tpu.matmul %68, %70, %cst_56 {dimension_numbers = #tpu.dot_dimension_numbers<[1], [0], [0], [1], [0, 0, 1, 1], [], []>} : vector<8x16xf32>, vector<16x128xf32>, vector<8x128xf32> -> vector<8x128xf32>
    %72 = arith.addf %66, %71 : vector<8x128xf32>
    %73 = vector.extract_strided_slice %53 {offsets = [0, 3, 0], sizes = [8, 1, 16], strides = [1, 1, 1]} : vector<8x16x128xf32> to vector<8x1x16xf32>
    %74 = vector.shape_cast %73 : vector<8x1x16xf32> to vector<8x16xf32>
    %c3 = arith.constant 3 : index
    %c0_57 = arith.constant 0 : index
    %c0_58 = arith.constant 0 : index
    %75 = vector.load %arg6[%c3, %c0_57, %c0_58] : memref<10x16x128xf32, #tpu.memory_space<vmem>>, vector<1x16x128xf32>
    %76 = vector.shape_cast %75 : vector<1x16x128xf32> to vector<16x128xf32>
    %cst_59 = arith.constant dense<0.000000e+00> : vector<8x128xf32>
    %77 = tpu.matmul %74, %76, %cst_59 {dimension_numbers = #tpu.dot_dimension_numbers<[1], [0], [0], [1], [0, 0, 1, 1], [], []>} : vector<8x16xf32>, vector<16x128xf32>, vector<8x128xf32> -> vector<8x128xf32>
    %78 = arith.addf %72, %77 : vector<8x128xf32>
    %79 = vector.extract_strided_slice %53 {offsets = [0, 4, 0], sizes = [8, 1, 16], strides = [1, 1, 1]} : vector<8x16x128xf32> to vector<8x1x16xf32>
    %80 = vector.shape_cast %79 : vector<8x1x16xf32> to vector<8x16xf32>
    %c4 = arith.constant 4 : index
    %c0_60 = arith.constant 0 : index
    %c0_61 = arith.constant 0 : index
    %81 = vector.load %arg6[%c4, %c0_60, %c0_61] : memref<10x16x128xf32, #tpu.memory_space<vmem>>, vector<1x16x128xf32>
    %82 = vector.shape_cast %81 : vector<1x16x128xf32> to vector<16x128xf32>
    %cst_62 = arith.constant dense<0.000000e+00> : vector<8x128xf32>
    %83 = tpu.matmul %80, %82, %cst_62 {dimension_numbers = #tpu.dot_dimension_numbers<[1], [0], [0], [1], [0, 0, 1, 1], [], []>} : vector<8x16xf32>, vector<16x128xf32>, vector<8x128xf32> -> vector<8x128xf32>
    %84 = arith.addf %78, %83 : vector<8x128xf32>
    %85 = vector.extract_strided_slice %53 {offsets = [0, 5, 0], sizes = [8, 1, 16], strides = [1, 1, 1]} : vector<8x16x128xf32> to vector<8x1x16xf32>
    %86 = vector.shape_cast %85 : vector<8x1x16xf32> to vector<8x16xf32>
    %c5 = arith.constant 5 : index
    %c0_63 = arith.constant 0 : index
    %c0_64 = arith.constant 0 : index
    %87 = vector.load %arg6[%c5, %c0_63, %c0_64] : memref<10x16x128xf32, #tpu.memory_space<vmem>>, vector<1x16x128xf32>
    %88 = vector.shape_cast %87 : vector<1x16x128xf32> to vector<16x128xf32>
    %cst_65 = arith.constant dense<0.000000e+00> : vector<8x128xf32>
    %89 = tpu.matmul %86, %88, %cst_65 {dimension_numbers = #tpu.dot_dimension_numbers<[1], [0], [0], [1], [0, 0, 1, 1], [], []>} : vector<8x16xf32>, vector<16x128xf32>, vector<8x128xf32> -> vector<8x128xf32>
    %90 = arith.addf %84, %89 : vector<8x128xf32>
    %91 = vector.extract_strided_slice %53 {offsets = [0, 6, 0], sizes = [8, 1, 16], strides = [1, 1, 1]} : vector<8x16x128xf32> to vector<8x1x16xf32>
    %92 = vector.shape_cast %91 : vector<8x1x16xf32> to vector<8x16xf32>
    %c6 = arith.constant 6 : index
    %c0_66 = arith.constant 0 : index
    %c0_67 = arith.constant 0 : index
    %93 = vector.load %arg6[%c6, %c0_66, %c0_67] : memref<10x16x128xf32, #tpu.memory_space<vmem>>, vector<1x16x128xf32>
    %94 = vector.shape_cast %93 : vector<1x16x128xf32> to vector<16x128xf32>
    %cst_68 = arith.constant dense<0.000000e+00> : vector<8x128xf32>
    %95 = tpu.matmul %92, %94, %cst_68 {dimension_numbers = #tpu.dot_dimension_numbers<[1], [0], [0], [1], [0, 0, 1, 1], [], []>} : vector<8x16xf32>, vector<16x128xf32>, vector<8x128xf32> -> vector<8x128xf32>
    %96 = arith.addf %90, %95 : vector<8x128xf32>
    %97 = vector.extract_strided_slice %53 {offsets = [0, 7, 0], sizes = [8, 1, 16], strides = [1, 1, 1]} : vector<8x16x128xf32> to vector<8x1x16xf32>
    %98 = vector.shape_cast %97 : vector<8x1x16xf32> to vector<8x16xf32>
    %c7 = arith.constant 7 : index
    %c0_69 = arith.constant 0 : index
    %c0_70 = arith.constant 0 : index
    %99 = vector.load %arg6[%c7, %c0_69, %c0_70] : memref<10x16x128xf32, #tpu.memory_space<vmem>>, vector<1x16x128xf32>
    %100 = vector.shape_cast %99 : vector<1x16x128xf32> to vector<16x128xf32>
    %cst_71 = arith.constant dense<0.000000e+00> : vector<8x128xf32>
    %101 = tpu.matmul %98, %100, %cst_71 {dimension_numbers = #tpu.dot_dimension_numbers<[1], [0], [0], [1], [0, 0, 1, 1], [], []>} : vector<8x16xf32>, vector<16x128xf32>, vector<8x128xf32> -> vector<8x128xf32>
    %102 = arith.addf %96, %101 : vector<8x128xf32>
    %103 = vector.extract_strided_slice %53 {offsets = [0, 8, 0], sizes = [8, 1, 16], strides = [1, 1, 1]} : vector<8x16x128xf32> to vector<8x1x16xf32>
    %104 = vector.shape_cast %103 : vector<8x1x16xf32> to vector<8x16xf32>
    %c8_72 = arith.constant 8 : index
    %c0_73 = arith.constant 0 : index
    %c0_74 = arith.constant 0 : index
    %105 = vector.load %arg6[%c8_72, %c0_73, %c0_74] : memref<10x16x128xf32, #tpu.memory_space<vmem>>, vector<1x16x128xf32>
    %106 = vector.shape_cast %105 : vector<1x16x128xf32> to vector<16x128xf32>
    %cst_75 = arith.constant dense<0.000000e+00> : vector<8x128xf32>
    %107 = tpu.matmul %104, %106, %cst_75 {dimension_numbers = #tpu.dot_dimension_numbers<[1], [0], [0], [1], [0, 0, 1, 1], [], []>} : vector<8x16xf32>, vector<16x128xf32>, vector<8x128xf32> -> vector<8x128xf32>
    %108 = arith.addf %102, %107 : vector<8x128xf32>
    %109 = vector.extract_strided_slice %53 {offsets = [0, 9, 0], sizes = [8, 1, 16], strides = [1, 1, 1]} : vector<8x16x128xf32> to vector<8x1x16xf32>
    %110 = vector.shape_cast %109 : vector<8x1x16xf32> to vector<8x16xf32>
    %c9 = arith.constant 9 : index
    %c0_76 = arith.constant 0 : index
    %c0_77 = arith.constant 0 : index
    %111 = vector.load %arg6[%c9, %c0_76, %c0_77] : memref<10x16x128xf32, #tpu.memory_space<vmem>>, vector<1x16x128xf32>
    %112 = vector.shape_cast %111 : vector<1x16x128xf32> to vector<16x128xf32>
    %cst_78 = arith.constant dense<0.000000e+00> : vector<8x128xf32>
    %113 = tpu.matmul %110, %112, %cst_78 {dimension_numbers = #tpu.dot_dimension_numbers<[1], [0], [0], [1], [0, 0, 1, 1], [], []>} : vector<8x16xf32>, vector<16x128xf32>, vector<8x128xf32> -> vector<8x128xf32>
    %114 = arith.addf %108, %113 : vector<8x128xf32>
    %c0_79 = arith.constant 0 : index
    %c0_80 = arith.constant 0 : index
    %115 = vector.load %arg7[%c0_79, %c0_80] : memref<1x128xf32, #tpu.memory_space<vmem>>, vector<1x128xf32>
    %116 = vector.broadcast %115 : vector<1x128xf32> to vector<8x128xf32>
    %117 = arith.addf %114, %116 : vector<8x128xf32>
    %118 = tpu.iota {dimensions = array<i32: 1>} : vector<8x128xi32>
    %c3_i32 = arith.constant 3 : i32
    %119 = vector.broadcast %c3_i32 : i32 to vector<8x128xi32>
    %120 = arith.cmpi slt, %118, %119 : vector<8x128xi32>
    %cst_81 = arith.constant -1.000000e+30 : f32
    %121 = vector.broadcast %cst_81 : f32 to vector<8x128xf32>
    %122 = arith.select %120, %117, %121 : vector<8x128xi1>, vector<8x128xf32>
    %cst_82 = arith.constant dense<0xFF800000> : vector<8xf32>
    %123 = vector.multi_reduction <maximumf>, %122, %cst_82 [1] : vector<8x128xf32> to vector<8xf32>
    %124 = vector.shape_cast %123 : vector<8xf32> to vector<8x1xf32>
    %125 = vector.broadcast %124 : vector<8x1xf32> to vector<8x128xf32>
    %126 = arith.subf %122, %125 : vector<8x128xf32>
    %127 = math.exp %126 : vector<8x128xf32>
    %cst_83 = arith.constant dense<0.000000e+00> : vector<8xf32>
    %128 = vector.multi_reduction <add>, %127, %cst_83 [1] : vector<8x128xf32> to vector<8xf32>
    %129 = vector.shape_cast %128 : vector<8xf32> to vector<8x1xf32>
    %130 = tpu.reciprocal %129 {approx = true} : vector<8x1xf32> -> vector<8x1xf32>
    %131 = arith.mulf %129, %130 : vector<8x1xf32>
    %cst_84 = arith.constant 2.000000e+00 : f32
    %132 = vector.broadcast %cst_84 : f32 to vector<8x1xf32>
    %133 = arith.subf %132, %131 : vector<8x1xf32>
    %134 = arith.mulf %130, %133 : vector<8x1xf32>
    %135 = vector.broadcast %134 : vector<8x1xf32> to vector<8x128xf32>
    %136 = arith.mulf %127, %135 : vector<8x128xf32>
    %c0_85 = arith.constant 0 : index
    %c0_86 = arith.constant 0 : index
    %137 = vector.load %arg9[%c0_85, %c0_86] : memref<8x128xf32, #tpu.memory_space<vmem>>, vector<8x128xf32>
    tpu.vector_store %arg9[%c0_85, %c0_86], %136 {strides = array<i32>} : memref<8x128xf32, #tpu.memory_space<vmem>>, vector<8x128xf32>,
    return
  }
  func.func @transform_0(%arg0: i32) -> (i32, i32, i32) {
    %c0_i32 = arith.constant 0 : i32
    %c0_i32_0 = arith.constant 0 : i32
    %c0_i32_1 = arith.constant 0 : i32
    return %arg0, %c0_i32, %c0_i32_0 : i32, i32, i32
  }
  func.func @transform_1(%arg0: i32) -> (i32, i32) {
    %c0_i32 = arith.constant 0 : i32
    %c0_i32_0 = arith.constant 0 : i32
    %c0_i32_1 = arith.constant 0 : i32
    return %c0_i32, %c0_i32_0 : i32, i32
  }
  func.func @transform_2(%arg0: i32) -> (i32, i32) {
    %c0_i32 = arith.constant 0 : i32
    %c0_i32_0 = arith.constant 0 : i32
    %c0_i32_1 = arith.constant 0 : i32
    return %c0_i32, %c0_i32_0 : i32, i32
  }
  func.func @transform_3(%arg0: i32) -> (i32, i32) {
    %c0_i32 = arith.constant 0 : i32
    %c0_i32_0 = arith.constant 0 : i32
    %c0_i32_1 = arith.constant 0 : i32
    return %c0_i32, %c0_i32_0 : i32, i32
  }
  func.func @transform_4(%arg0: i32) -> (i32, i32) {
    %c0_i32 = arith.constant 0 : i32
    %c0_i32_0 = arith.constant 0 : i32
    %c0_i32_1 = arith.constant 0 : i32
    return %c0_i32, %c0_i32_0 : i32, i32
  }
  func.func @transform_5(%arg0: i32) -> (i32, i32, i32) {
    %c0_i32 = arith.constant 0 : i32
    %c0_i32_0 = arith.constant 0 : i32
    %c0_i32_1 = arith.constant 0 : i32
    %c0_i32_2 = arith.constant 0 : i32
    return %c0_i32, %c0_i32_0, %c0_i32_1 : i32, i32, i32
  }
  func.func @transform_6(%arg0: i32) -> (i32, i32) {
    %c0_i32 = arith.constant 0 : i32
    %c0_i32_0 = arith.constant 0 : i32
    %c0_i32_1 = arith.constant 0 : i32
    return %c0_i32, %c0_i32_0 : i32, i32
  }
  func.func @transform_7(%arg0: i32) -> (i32, i32) {
    %c0_i32 = arith.constant 0 : i32
    %c0_i32_0 = arith.constant 0 : i32
    %c0_i32_1 = arith.constant 0 : i32
    return %c0_i32, %c0_i32_0 : i32, i32
  }
  func.func @transform_8(%arg0: i32) -> (i32, i32) {
    %c0_i32 = arith.constant 0 : i32
    %c0_i32_0 = arith.constant 0 : i32
    return %arg0, %c0_i32 : i32, i32
  }
}

</mosaic_0001>

<bundles_post_ra>
// kernel: cnn_forward.1
= control target key start
LH: loop header
LB: loop body
LE: loop exit
PB: predicated region body
PF: predicated region fallthrough
CT: control target
= control target key end

     0   :  { %s6329_s27 = smov 0   ;;  %s9131_s0 = inlined_call_operand.vmem [shape: bf16[16,48,156], index: 0, kind: input, shape index: {}]   ;;  %s9132_s1 = inlined_call_operand.vmem [shape: f32[512,128], index: 1, kind: input, shape index: {}]   ;;  %s9133_s2 = inlined_call_operand.vmem [shape: f32[1,128], index: 2, kind: input, shape index: {}]   ;;  %s9134_s3 = inlined_call_operand.vmem [shape: f32[128,128], index: 3, kind: input, shape index: {}]   ;;  %s9135_s4 = inlined_call_operand.vmem [shape: f32[1,128], index: 4, kind: input, shape index: {}]   ;;  %s9136_s5 = inlined_call_operand.vmem [shape: f32[10,16,128], index: 5, kind: input, shape index: {}]   ;;  %s9137_s6 = inlined_call_operand.vmem [shape: f32[1,128], index: 6, kind: input, shape index: {}]   ;;  %s9138_s7 = inlined_call_operand.vmem [shape: f32[48,48], index: 7, kind: input, shape index: {}]   ;;  %s9139_s8 = inlined_call_operand.vmem [shape: f32[16,128], index: 8, kind: output, shape index: {}]  }
   0x1 LB: > { %s6335_s28 = sadd.s32 4294967295, %s6269_s27   ;;  %p4867_p0 = scmp.ge.s32.totalorder %s6269_s27, 1  ;;  %s6269_s27 = sphi %s6329_s27, %s18_s27  }
   0x2   : > { %p264_p1 = scmp.lt.s32.totalorder %s6269_s27, 3 }
   0x4   : > { %p265_p2 = pnand %p4867_p0, %p264_p1 }
   0x6   : > { %268 = sbr.rel (%p265_p2) target bundleno = 1903 (0x76f), region = 52 }
   0xd   : > { %s4868_s29 = sshll.u32 %s6335_s28, 3  ;;  %v1474_v0 = vld [vmem:[%s9132_s1] sm:$0xff]  ;;  %v9172_v1 = vmov 0.0|0.0   ;;  %v1475_v2 = vld [vmem:[%s9132_s1 + $0x8] sm:$0xff]  ;;  %v1476_v3 = vld [vmem:[%s9132_s1 + $0x10] sm:$0xff]  ;;  %vm549_vm0 = vcmask 1046528  }
   0xe   : > { %p299_p3 = scmp.lt.s32.totalorder %s4868_s29, 15  ;;  %5476 = vmatprep.subr.bf16.mxu0 %v9172_v1  ;;  %v1477_v4 = vld [vmem:[%s9132_s1 + $0x18] sm:$0xff]  ;;  %5730 = vmatprep.subr.bf16.mxu1 %v9172_v1  ;;  %v5477_v5 = vpack.c.bf16 %v1475_v2, %v1474_v0  ;;  %v1478_v6 = vld [vmem:[%s9132_s1 + $0x20] sm:$0xff]  ;;  %v1479_v7 = vld [vmem:[%s9132_s1 + $0x28] sm:$0xff]  ;;  %s6272_s20 = smov 28   ;;  %vm1063_vm1 = vcmask 1045504  }
   0xf   : > { %v1480_v8 = vld [vmem:[%s9132_s1 + $0x30] sm:$0xff]  ;;  %v1481_v9 = vld [vmem:[%s9132_s1 + $0x38] sm:$0xff]  ;;  %v5480_v10 = vpack.c.bf16 %v1477_v4, %v1476_v3  ;;  %v1482_v11 = vld [vmem:[%s9132_s1 + $0x40] sm:$0xff]  ;;  %v5483_v17 = vpack.c.bf16 %v1479_v7, %v1478_v6  ;;  %s6273_s18 = smov 56   ;;  %vm918_vm2 = vcmask 228352   ;;  %vm1393_vm3 = vcmask 48128  }
  0x10   : > { %s9487_s29 = smov (!%p299_p3, %s4868_s29), 15  ;;  %5478 = vmatpush1.bf16.msra.mxu0 %v5477_v5  ;;  %v1483_v12 = vld [vmem:[%s9132_s1 + $0x48] sm:$0xff]  ;;  %v1484_v13 = vld [vmem:[%s9132_s1 + $0x50] sm:$0xff]  ;;  %5746 = vmatpush1.bf16.msra.mxu1 %v5477_v5  ;;  %v1485_v14 = vld [vmem:[%s9132_s1 + $0x58] sm:$0xff]  ;;  %v6391_v18 = vpack.c.bf16 %v1481_v9, %v1480_v8  ;;  %vm1344_vm4 = vcmask 457728   ;;  %vm2209_vm5 = vcmask 392192  }
  0x11   : > { %s5882_s11 = smul.u32 48, %s9487_s29  ;;  %5479 = vmatprep.subr.bf16.mxu0 %v9172_v1  ;;  %v1486_v15 = vld [vmem:[%s9132_s1 + $0x60] sm:$0xff]  ;;  %v1487_v16 = vld [vmem:[%s9132_s1 + $0x68] sm:$0xff]  ;;  %5731 = vmatprep.subr.bf16.mxu1 %v9172_v1  ;;  %v6402_v22 = vpack.c.bf16 %v1483_v12, %v1482_v11  ;;  %v6404_v23 = vpack.c.bf16 %v1485_v14, %v1484_v13  ;;  %vm3006_vm6 = vcmask 58368   ;;  %vm3004_vm7 = vcmask 64512   ;;  %s6275_s16 = smov 32  }
  0x12   : > { %v6406_v24 = vpack.c.bf16 %v1487_v16, %v1486_v15  ;;  %s6277_s22 = smov 64   ;;  %s6278_s23 = smov 40   ;;  %vm9258_vm8 = vcmask 130116   ;;  %vm9257_vm9 = vcmask 128064   ;;  %vm9256_vm10 = vcmask 195712  }
  0x13   : > { %s6389_s29 = scalar_lea.vmem %s9131_s0, %s5882_s11  ;;  %s6279_s9 = smov 72   ;;  %vm9255_vm11 = vcmask 261316   ;;  %vm9254_vm12 = vcmask 189568   ;;  %vm9253_vm13 = vcmask 259264   ;;  %vm3316_vm14 = vcmask 326913  }
  0x14   : > { %v6394_v19 = vld [vmem:[%s6389_s29] sm:$0xff]  ;;  %v6397_v20 = vld [vmem:[%s6389_s29 + $0x8] sm:$0xff]  ;;  %v6400_v21 = vld [vmem:[%s6389_s29 + $0x10] sm:$0xff]  ;;  %5481 = vmatpush1.bf16.msra.mxu0 %v5480_v10  ;;  %5747 = vmatpush1.bf16.msra.mxu1 %v5480_v10  ;;  %s6280_s26 = smov 16   ;;  %s6281_s30 = smov 24   ;;  %vm3318_vm15 = vcmask 321792  }
  0x15   : > { %v6409_v25 = vunpack.c.l.bf16 %v6394_v19  ;;  %v6412_v26 = vunpack.c.l.bf16 %v6397_v20  ;;  %v6415_v27 = vunpack.c.l.bf16 %v6400_v21  ;;  %v6418_v28 = vld [vmem:[%s6389_s29 + $0x20] sm:$0xff]  ;;  %v6421_v29 = vld [vmem:[%s6389_s29 + $0x28] sm:$0xff]  ;;  %v6424_v30 = vld [vmem:[%s6389_s29 + $0x18] sm:$0xff]  ;;  %5482 = vmatprep.subr.bf16.mxu0 %v9172_v1  ;;  %5732 = vmatprep.subr.bf16.mxu1 %v9172_v1  ;;  %s6282_s14 = smov 48   ;;  %p305_p4 = scmp.lt.s32.totalorder %s6335_s28, 1 }
  0x16   : > { %v6430_v32 = vunpack.c.l.bf16 %v6418_v28  ;;  %v6433_v33 = vunpack.c.l.bf16 %v6421_v29  ;;  %v6436_v34 = vunpack.c.l.bf16 %v6424_v30  ;;  %v6439_v35 = vld [vmem:[%s6389_s29 + $0x30] sm:$0xff]  ;;  %v6442_v36 = vld [vmem:[%s6389_s29 + $0x38] sm:$0xff]  ;;  %v6445_v37 = vld [vmem:[%s6389_s29 + $0x40] sm:$0xff] }
  0x17   : > { %9260 = vst [vmem:[#allocation3_spill] sm:$0xff] %v6412_v26  ;;  %9261 = vst [vmem:[#allocation4_spill] sm:$0xff] %v6415_v27  ;;  %v550_v39 = vrot.slane %v6409_v25, 1  ;;  %v551_v40 = vrot.slane %v6412_v26, 1  ;;  %v556_v41 = vrot.slane %v6415_v27, 1  ;;  %v6452_v42 = vunpack.c.l.bf16 %v6439_v35  ;;  %v6461_v47 = vld [vmem:[%s6389_s29 + $0x48] sm:$0xff] }
  0x18   : > { %9262 = vst [vmem:[#allocation5_spill] sm:$0xff] %v6430_v32  ;;  %v564_v43 = vrot.slane %v6430_v32, 1  ;;  %v568_v44 = vrot.slane %v6433_v33, 1  ;;  %v560_v45 = vrot.slane %v6436_v34, 1  ;;  %v6458_v46 = vunpack.c.l.bf16 %v6442_v36  ;;  %5484 = vmatpush1.bf16.msra.mxu0 %v5483_v17  ;;  %5748 = vmatpush1.bf16.msra.mxu1 %v5483_v17  ;;  %v6470_v52 = vld [vmem:[%s6389_s29 + $0x50] sm:$0xff]  ;;  %v6473_v53 = vld [vmem:[%s6389_s29 + $0x58] sm:$0xff] }
  0x19   : > { %v552_v48 = vsel %vm549_vm0, %v550_v39, %v551_v40  ;;  %v557_v49 = vsel %vm549_vm0, %v551_v40, %v556_v41  ;;  %v6466_v50 = vunpack.c.l.bf16 %v6445_v37  ;;  %v572_v51 = vrot.slane %v6452_v42, 1  ;;  %v6476_v54 = vld [vmem:[%s6389_s29 + $0x60] sm:$0xff]  ;;  %5485 = vmatprep.subr.bf16.mxu0 %v9172_v1  ;;  %5733 = vmatprep.subr.bf16.mxu1 %v9172_v1  ;;  %v6484_v59 = vld [vmem:[%s6389_s29 + $0x68] sm:$0xff]  ;;  %v6487_v60 = vld [vmem:[%s6389_s29 + $0x70] sm:$0xff]  ;;  %s9489_s28 = smov (!%p305_p4, %s6335_s28), 1 }
  0x1a   : > { %v5904_v55 = vpack.i.bf16 %v557_v49, %v552_v48  ;;  %v569_v56 = vsel %vm549_vm0, %v564_v43, %v568_v44  ;;  %v561_v57 = vsel %vm549_vm0, %v556_v41, %v560_v45  ;;  %v565_v58 = vsel %vm549_vm0, %v560_v45, %v564_v43  ;;  %v6505_v6 = vld [vmem:[%s6389_s29 + $0x78] sm:$0xff]  ;;  %v6518_v11 = vld [vmem:[%s6389_s29 + $0x80] sm:$0xff]  ;;  %v6532_v41 = vld [vmem:[%s6389_s29 + $0x88] sm:$0xff] }
  0x1b   : > { %v5914_v61 = vpack.i.bf16 %v568_v44, %v569_v56  ;;  %v5909_v62 = vpack.i.bf16 %v565_v58, %v561_v57  ;;  %v573_v63 = vrot.slane %v6458_v46, 1  ;;  %v578_v0 = vrot.slane %v6466_v50, 1  ;;  %v6535_v43 = vld [vmem:[%s6389_s29 + $0x90] sm:$0xff]  ;;  %v6546_v49 = vld [vmem:[%s6389_s29 + $0x98] sm:$0xff] }
  0x1c   : > { %5905 = vrot.lane.b32.xlu0 %v5904_v55, %s6272_s20  ;;  %v6493_v2 = vunpack.c.l.bf16 %v6461_v47  ;;  %v6496_v3 = vunpack.c.l.bf16 %v6470_v52  ;;  %v6499_v4 = vunpack.c.l.bf16 %v6473_v53  ;;  %v6502_v5 = vunpack.c.l.bf16 %v6476_v54  ;;  %5487 = vmatpush1.bf16.msra.mxu0 %v6391_v18  ;;  %v6552_v55 = vld [vmem:[%s6389_s29 + $0xa8] sm:$0xff] }
  0x1d   : > { %5915 = vrot.lane.b32.xlu1 %v5914_v61, %s6272_s20  ;;  %v574_v7 = vsel %vm549_vm0, %v572_v51, %v573_v63  ;;  %v579_v8 = vsel %vm549_vm0, %v573_v63, %v578_v0  ;;  %v6512_v9 = vunpack.c.l.bf16 %v6484_v59  ;;  %v6515_v10 = vunpack.c.l.bf16 %v6487_v60  ;;  %5488 = vmatprep.subr.bf16.mxu0 %v9172_v1  ;;  %v6549_v51 = vld [vmem:[%s6389_s29 + $0xa0] sm:$0xff]  ;;  %9263 = vst [vmem:[#allocation6_spill] sm:$0xff] %v6552_v55 }
  0x1e   : > { %v5919_v12 = vpack.i.bf16 %v579_v8, %v574_v7  ;;  %v582_v13 = vrot.slane %v6493_v2, 1  ;;  %v586_v14 = vrot.slane %v6496_v3, 1  ;;  %v590_v15 = vrot.slane %v6499_v4, 1  ;;  %5749 = vmatpush1.bf16.msra.mxu1 %v6391_v18 }
  0x1f   : > { %v594_v16 = vrot.slane %v6502_v5, 1  ;;  %v595_v17 = vrot.slane %v6512_v9, 1  ;;  %v600_v39 = vrot.slane %v6515_v10, 1  ;;  %v6529_v40 = vunpack.c.l.bf16 %v6505_v6  ;;  %5734 = vmatprep.subr.bf16.mxu1 %v9172_v1 }
  0x20   : > { %5910 = vrot.lane.b32.xlu0 %v5909_v62, %s6272_s20  ;;  %v583_v18 = vsel %vm549_vm0, %v578_v0, %v582_v13  ;;  %v587_v44 = vsel %vm549_vm0, %v582_v13, %v586_v14  ;;  %v591_v45 = vsel %vm549_vm0, %v586_v14, %v590_v15  ;;  %v6543_v48 = vunpack.c.l.bf16 %v6518_v11  ;;  %5490 = vmatpush1.bf16.msra.mxu0 %v6402_v22  ;;  %v6559_v62 = vld [vmem:[%s6389_s29 + $0xb0] sm:$0xff] }
  0x21   : > { %5920 = vrot.lane.b32.xlu1 %v5919_v12, %s6272_s20  ;;  %v5924_v56 = vpack.i.bf16 %v587_v44, %v583_v18  ;;  %v5929_v57 = vpack.i.bf16 %v590_v15, %v591_v45  ;;  %v596_v58 = vsel %vm549_vm0, %v594_v16, %v595_v17  ;;  %v601_v61 = vsel %vm549_vm0, %v595_v17, %v600_v39  ;;  %v6581_v16 = vld [vmem:[%s6389_s29 + $0xb8] sm:$0xff]  ;;  %v1488_v45 = vld [vmem:[%s9132_s1 + $0x70] sm:$0xff] }
  0x22   : > { %9264 = vst [vmem:[#allocation7_spill] sm:$0xff] %v6559_v62  ;;  %v5934_v63 = vpack.i.bf16 %v601_v61, %v596_v58  ;;  %v604_v0 = vrot.slane %v6529_v40, 1  ;;  %v608_v7 = vrot.slane %v6543_v48, 1  ;;  %v6564_v8 = vunpack.c.l.bf16 %v6532_v41  ;;  %5491 = vmatprep.subr.bf16.mxu0 %v9172_v1  ;;  %5750 = vmatpush1.bf16.msra.mxu1 %v6402_v22  ;;  %9270 = vst [vmem:[#allocation13_spill] sm:$0xff] %v6581_v16  ;;  %v1489_v58 = vld [vmem:[%s9132_s1 + $0x78] sm:$0xff] }
  0x23   : > { %v6569_v12 = vunpack.c.l.bf16 %v6535_v43  ;;  %v6572_v13 = vunpack.c.l.bf16 %v6546_v49  ;;  %v6575_v14 = vunpack.c.l.bf16 %v6549_v51  ;;  %v6578_v15 = vunpack.c.l.bf16 %v6552_v55  ;;  %5735 = vmatprep.subr.bf16.mxu1 %v9172_v1 }
  0x24   : > { %9265 = vst [vmem:[#allocation8_spill] sm:$0xff] %v6564_v8  ;;  %5925 = vrot.lane.b32.xlu0 %v5924_v56, %s6272_s20  ;;  %v605_v22 = vsel %vm549_vm0, %v600_v39, %v604_v0  ;;  %v609_v17 = vsel %vm549_vm0, %v604_v0, %v608_v7  ;;  %v612_v18 = vrot.slane %v6564_v8, 1  ;;  %v6589_v44 = vunpack.c.l.bf16 %v6559_v62  ;;  %5493 = vmatpush1.bf16.msra.mxu0 %v6404_v23 }
  0x25   : > { %9266 = vst [vmem:[#allocation9_spill] sm:$0xff] %v6569_v12  ;;  %9267 = vst [vmem:[#allocation10_spill] sm:$0xff] %v6572_v13  ;;  %5930 = vrot.lane.b32.xlu1 %v5929_v57, %s6272_s20  ;;  %v5939_v39 = vpack.i.bf16 %v609_v17, %v605_v22  ;;  %v616_v56 = vrot.slane %v6569_v12, 1  ;;  %v617_v61 = vrot.slane %v6572_v13, 1  ;;  %v622_v0 = vrot.slane %v6575_v14, 1  ;;  %5494 = vmatprep.subr.bf16.mxu0 %v9172_v1 }
  0x26   : > { %9268 = vst [vmem:[#allocation11_spill] sm:$0xff] %v6575_v14  ;;  %9269 = vst [vmem:[#allocation12_spill] sm:$0xff] %v6578_v15  ;;  %v613_v38 = vsel %vm549_vm0, %v608_v7, %v612_v18  ;;  %v626_v31 = vrot.slane %v6578_v15, 1  ;;  %v630_v62 = vrot.slane %v6589_v44, 1  ;;  %v6607_v55 = vunpack.c.l.bf16 %v6581_v16  ;;  %5751 = vmatpush1.bf16.msra.mxu1 %v6404_v23  ;;  %v1490_v23 = vld [vmem:[%s9132_s1 + $0x80] sm:$0xff] }
  0x27   : > { %9271 = vst [vmem:[#allocation14_spill] sm:$0xff] %v6589_v44  ;;  %v618_v57 = vsel %vm549_vm0, %v616_v56, %v617_v61  ;;  %v623_v22 = vsel %vm549_vm0, %v617_v61, %v622_v0  ;;  %v9154_v17 = vunpack.c.h.bf16 %v6400_v21  ;;  %v5498_v14 = vpack.c.bf16 %v1489_v58, %v1488_v45  ;;  %5736 = vmatprep.subr.bf16.mxu1 %v9172_v1  ;;  %v1491_v45 = vld [vmem:[%s9132_s1 + $0x88] sm:$0xff] }
  0x28   : > { %9272 = vst [vmem:[#allocation15_spill] sm:$0xff] %v6607_v55  ;;  %5935 = vrot.lane.b32.xlu0 %v5934_v63, %s6272_s20  ;;  %v5944_v7 = vpack.i.bf16 %v612_v18, %v613_v38  ;;  %v627_v15 = vsel %vm549_vm0, %v622_v0, %v626_v31  ;;  %v631_v44 = vsel %vm549_vm0, %v626_v31, %v630_v62  ;;  %v634_v16 = vrot.slane %v6607_v55, 1 }
  0x29   : > { %5496 = vmatpush1.bf16.msra.mxu0 %v6406_v24  ;;  %5940 = vrot.lane.b32.xlu1 %v5939_v39, %s6272_s20  ;;  %v5949_v63 = vpack.i.bf16 %v623_v22, %v618_v57  ;;  %v9273_v38 = vunpack.c.h.bf16 %v6394_v19  ;;  %v9274_v31 = vunpack.c.h.bf16 %v6397_v20  ;;  %v558_v56 = vrot.slane %v9154_v17, 1 }
  0x2a   : > { %5497 = vmatprep.subr.bf16.mxu0 %v9172_v1  ;;  %v635_v61 = vsel %vm549_vm0, %v630_v62, %v634_v16  ;;  %v1064_v0 = vrot.slane %v6409_v25, 2  ;;  %v1065_v55 = vrot.slane %v6412_v26, 2  ;;  %v1067_v39 = vrot.slane %v6415_v27, 2  ;;  %5752 = vmatpush1.bf16.msra.mxu1 %v6406_v24  ;;  %v1492_v24 = vld [vmem:[%s9132_s1 + $0x90] sm:$0xff] }
  0x2b   : > { %v553_v18 = vrot.slane %v9273_v38, 1  ;;  %v554_v58 = vrot.slane %v9274_v31, 1  ;;  %v5954_v57 = vpack.i.bf16 %v631_v44, %v627_v15  ;;  %v9157_v38 = vunpack.c.h.bf16 %v6424_v30  ;;  %5737 = vmatprep.subr.bf16.mxu1 %v9172_v1  ;;  %v1493_v15 = vld [vmem:[%s9132_s1 + $0x98] sm:$0xff] }
  0x2c   : > { %v5501_v31 = vpack.c.bf16 %v1491_v45, %v1490_v23  ;;  %5945 = vrot.lane.b32.xlu0 %v5944_v7, %s6272_s20  ;;  %v1066_v17 = vsel %vm1063_vm1, %v1064_v0, %v1065_v55  ;;  %v1068_v26 = vsel %vm1063_vm1, %v1065_v55, %v1067_v39  ;;  %v9159_v27 = vunpack.c.h.bf16 %v6418_v28 }
  0x2d   : > { %v555_v22 = vsel %vm549_vm0, %v553_v18, %v554_v58  ;;  %v559_v62 = vsel %vm549_vm0, %v554_v58, %v558_v56  ;;  %5499 = vmatpush1.bf16.msra.mxu0 %v5498_v14  ;;  %5950 = vrot.lane.b32.xlu1 %v5949_v63, %s6272_s20  ;;  %v5959_v44 = vpack.i.bf16 %v634_v16, %v635_v61  ;;  %v562_v7 = vrot.slane %v9157_v38, 1 }
  0x2e   : > { %v1069_v23 = vrot.slane %v6436_v34, 2  ;;  %v1071_v55 = vrot.slane %v6430_v32, 2  ;;  %5500 = vmatprep.subr.bf16.mxu0 %v9172_v1  ;;  %v566_v45 = vrot.slane %v9159_v27, 1  ;;  %v9160_v18 = vunpack.c.h.bf16 %v6421_v29  ;;  %5753 = vmatpush1.bf16.msra.mxu1 %v5498_v14  ;;  %v1495_v14 = vld [vmem:[%s9132_s1 + $0xa8] sm:$0xff] }
  0x2f   : > { %v5964_v58 = vpack.i.bf16 %v559_v62, %v555_v22  ;;  %v5969_v0 = vpack.i.bf16 %v1068_v26, %v1066_v17  ;;  %v1073_v63 = vrot.slane %v6433_v33, 2  ;;  %v5504_v16 = vpack.c.bf16 %v1493_v15, %v1492_v24  ;;  %5738 = vmatprep.subr.bf16.mxu1 %v9172_v1  ;;  %v1494_v26 = vld [vmem:[%s9132_s1 + $0xa0] sm:$0xff] }
  0x30   : > { %5955 = vrot.lane.b32.xlu0 %v5954_v57, %s6272_s20  ;;  %v1070_v61 = vsel %vm1063_vm1, %v1067_v39, %v1069_v23  ;;  %v1072_v38 = vsel %vm1063_vm1, %v1069_v23, %v1071_v55  ;;  %v570_v32 = vrot.slane %v9160_v18, 1  ;;  %v9166_v27 = vunpack.c.h.bf16 %v6439_v35 }
  0x31   : > { %5502 = vmatpush1.bf16.msra.mxu0 %v5501_v31  ;;  %5960 = vrot.lane.b32.xlu1 %v5959_v44, %s6272_s20  ;;  %v563_v17 = vsel %vm549_vm0, %v558_v56, %v562_v7  ;;  %v567_v39 = vsel %vm549_vm0, %v562_v7, %v566_v45  ;;  %v9164_v57 = vunpack.c.h.bf16 %v6442_v36  ;;  %v9161_v22 = vunpack.c.h.bf16 %v6445_v37 }
  0x32   : > { %5503 = vmatprep.subr.bf16.mxu0 %v9172_v1  ;;  %5754 = vmatpush1.bf16.msra.mxu1 %v5501_v31  ;;  %v5979_v62 = vpack.i.bf16 %v1072_v38, %v1070_v61  ;;  %v1074_v24 = vsel %vm1063_vm1, %v1071_v55, %v1073_v63  ;;  %v9162_v15 = vunpack.c.h.bf16 %v6461_v47  ;;  %v5507_v23 = vpack.c.bf16 %v1495_v14, %v1494_v26 }
  0x33   : > { %5739 = vmatprep.subr.bf16.mxu1 %v9172_v1  ;;  %v5974_v56 = vpack.i.bf16 %v567_v39, %v563_v17  ;;  %v571_v44 = vsel %vm549_vm0, %v566_v45, %v570_v32  ;;  %v575_v7 = vrot.slane %v9166_v27, 1  ;;  %v9163_v18 = vunpack.c.h.bf16 %v6470_v52 }
  0x34   : > { %5965 = vrot.lane.b32.xlu0 %v5964_v58, %s6272_s20  ;;  %v576_v38 = vrot.slane %v9164_v57, 1  ;;  %v580_v31 = vrot.slane %v9161_v22, 1  ;;  %v1075_v55 = vrot.slane %v6452_v42, 2  ;;  %v1076_v58 = vrot.slane %v6458_v46, 2 }
  0x35   : > { %5505 = vmatpush1.bf16.msra.mxu0 %v5504_v16  ;;  %5970 = vrot.lane.b32.xlu1 %v5969_v0, %s6273_s18  ;;  %v1078_v45 = vrot.slane %v6466_v50, 2  ;;  %v584_v61 = vrot.slane %v9162_v15, 1  ;;  %v588_v0 = vrot.slane %v9163_v18, 1  ;;  %v9165_v26 = vunpack.c.h.bf16 %v6473_v53 }
  0x36   : > { %5506 = vmatprep.subr.bf16.mxu0 %v9172_v1  ;;  %5755 = vmatpush1.bf16.msra.mxu1 %v5504_v16  ;;  %v5984_v14 = vpack.i.bf16 %v570_v32, %v571_v44  ;;  %v5989_v17 = vpack.i.bf16 %v1073_v63, %v1074_v24  ;;  %v577_v39 = vsel %vm549_vm0, %v575_v7, %v576_v38  ;;  %v1080_v15 = vrot.slane %v6493_v2, 2 }
  0x37   : > { %5740 = vmatprep.subr.bf16.mxu1 %v9172_v1  ;;  %v581_v22 = vsel %vm549_vm0, %v576_v38, %v580_v31  ;;  %v1077_v16 = vsel %vm1063_vm1, %v1075_v55, %v1076_v58  ;;  %v1079_v18 = vsel %vm1063_vm1, %v1076_v58, %v1078_v45  ;;  %v585_v57 = vsel %vm549_vm0, %v580_v31, %v584_v61 }
  0x38   : > { %5975 = vrot.lane.b32.xlu0 %v5974_v56, %s6272_s20  ;;  %v1082_v32 = vrot.slane %v6496_v3, 2  ;;  %v9169_v63 = vunpack.c.h.bf16 %v6476_v54  ;;  %v592_v24 = vrot.slane %v9165_v26, 1  ;;  %v9168_v56 = vunpack.c.h.bf16 %v6484_v59 }
  0x39   : > { %5508 = vmatpush1.bf16.msra.mxu0 %v5507_v23  ;;  %5980 = vrot.lane.b32.xlu1 %v5979_v62, %s6273_s18  ;;  %v589_v62 = vsel %vm549_vm0, %v584_v61, %v588_v0  ;;  %v9167_v44 = vunpack.c.h.bf16 %v6487_v60  ;;  %v5994_v7 = vpack.i.bf16 %v581_v22, %v577_v39  ;;  %v5999_v38 = vpack.i.bf16 %v1079_v18, %v1077_v16 }
  0x3a   : > { %5509 = vmatprep.subr.bf16.mxu0 %v9172_v1  ;;  %5756 = vmatpush1.bf16.msra.mxu1 %v5507_v23  ;;  %v1081_v31 = vsel %vm1063_vm1, %v1078_v45, %v1080_v15  ;;  %v6004_v23 = vpack.i.bf16 %v589_v62, %v585_v57  ;;  %v1083_v55 = vsel %vm1063_vm1, %v1080_v15, %v1082_v32  ;;  %v1084_v58 = vrot.slane %v6499_v4, 2 }
  0x3b   : > { %5741 = vmatprep.subr.bf16.mxu1 %v9172_v1  ;;  %v597_v61 = vrot.slane %v9169_v63, 1  ;;  %v593_v26 = vsel %vm549_vm0, %v588_v0, %v592_v24  ;;  %v598_v27 = vrot.slane %v9168_v56, 1  ;;  %v602_v22 = vrot.slane %v9167_v44, 1 }
  0x3c   : > { %5985 = vrot.lane.b32.xlu0 %v5984_v14, %s6272_s20  ;;  %v1086_v18 = vrot.slane %v6502_v5, 2  ;;  %v1087_v57 = vrot.slane %v6512_v9, 2  ;;  %v1089_v15 = vrot.slane %v6515_v10, 2  ;;  %v9171_v45 = vunpack.c.h.bf16 %v6505_v6 }
  0x3d   : > { %5990 = vrot.lane.b32.xlu1 %v5989_v17, %s6273_s18  ;;  %v9170_v14 = vunpack.c.h.bf16 %v6518_v11  ;;  %v6009_v0 = vpack.i.bf16 %v1083_v55, %v1081_v31  ;;  %v1085_v17 = vsel %vm1063_vm1, %v1082_v32, %v1084_v58  ;;  %v6014_v39 = vpack.i.bf16 %v592_v24, %v593_v26  ;;  %v1496_v24 = vld [vmem:[%s9132_s1 + $0xb0] sm:$0xff]  ;;  %v1497_v31 = vld [vmem:[%s9132_s1 + $0xb8] sm:$0xff] }
  0x3e   : > { %v599_v16 = vsel %vm549_vm0, %v597_v61, %v598_v27  ;;  %v603_v62 = vsel %vm549_vm0, %v598_v27, %v602_v22  ;;  %v1088_v44 = vsel %vm1063_vm1, %v1086_v18, %v1087_v57  ;;  %v1090_v56 = vsel %vm1063_vm1, %v1087_v57, %v1089_v15 }
  0x3f   : > { %v606_v63 = vrot.slane %v9171_v45, 1  ;;  %v6019_v26 = vpack.i.bf16 %v1084_v58, %v1085_v17  ;;  %v1093_v32 = vrot.slane %v6543_v48, 2  ;;  %v9176_v27 = vunpack.c.h.bf16 %v6532_v41 }
  0x40   : > { %5995 = vrot.lane.b32.xlu0 %v5994_v7, %s6272_s20  ;;  %v1091_v7 = vrot.slane %v6529_v40, 2  ;;  %v6029_v55 = vpack.i.bf16 %v1090_v56, %v1088_v44  ;;  %v1095_v18 = vrot.slane %v6564_v8, 2  ;;  %v9174_v17 = vunpack.c.h.bf16 %v6546_v49  ;;  %v1499_v56 = vld [vmem:[%s9132_s1 + $0xc8] sm:$0xff] }
  0x41   : > { %6000 = vrot.lane.b32.xlu1 %v5999_v38, %s6273_s18  ;;  %v610_v38 = vrot.slane %v9170_v14, 1  ;;  %v607_v58 = vsel %vm549_vm0, %v602_v22, %v606_v63  ;;  %v1498_v14 = vld [vmem:[%s9132_s1 + $0xc0] sm:$0xff]  ;;  %v614_v22 = vrot.slane %v9176_v27, 1 }
  0x42   : > { %v1092_v61 = vsel %vm1063_vm1, %v1089_v15, %v1091_v7  ;;  %v1094_v44 = vsel %vm1063_vm1, %v1091_v7, %v1093_v32  ;;  %v5510_v15 = vpack.c.bf16 %v1497_v31, %v1496_v24  ;;  %v1096_v45 = vsel %vm1063_vm1, %v1093_v32, %v1095_v18  ;;  %v1500_v24 = vld [vmem:[%s9132_s1 + $0xd0] sm:$0xff] }
  0x43   : > { %v611_v57 = vsel %vm549_vm0, %v606_v63, %v610_v38  ;;  %v9177_v63 = vunpack.c.h.bf16 %v6549_v51  ;;  %v620_v7 = vrot.slane %v9174_v17, 1  ;;  %v615_v32 = vsel %vm549_vm0, %v610_v38, %v614_v22  ;;  %v9278_v17 = vld [vmem:[#allocation11_spill] sm:$0xff] }
  0x44   : > { %6005 = vrot.lane.b32.xlu0 %v6004_v23, %s6272_s20  ;;  %v6024_v23 = vpack.i.bf16 %v603_v62, %v599_v16  ;;  %5511 = vmatpush1.bf16.msra.mxu0 %v5510_v15  ;;  %v5513_v16 = vpack.c.bf16 %v1499_v56, %v1498_v14  ;;  %v6039_v62 = vpack.i.bf16 %v1094_v44, %v1092_v61  ;;  %v1501_v14 = vld [vmem:[%s9132_s1 + $0xd8] sm:$0xff]  ;;  %v1097_v56 = vrot.slane %v6569_v12, 2 }
  0x45   : > { %6010 = vrot.lane.b32.xlu1 %v6009_v0, %s6273_s18  ;;  %v9175_v0 = vunpack.c.h.bf16 %v6535_v43  ;;  %v624_v31 = vrot.slane %v9177_v63, 1  ;;  %v1098_v44 = vrot.slane %v6572_v13, 2  ;;  %5757 = vmatpush1.bf16.msra.mxu1 %v5510_v15  ;;  %v5516_v27 = vpack.c.bf16 %v1501_v14, %v1500_v24  ;;  %v1503_v15 = vld [vmem:[%s9132_s1 + $0xe8] sm:$0xff]  ;;  %v9282_v12 = vld [vmem:[#allocation14_spill] sm:$0xff] }
  0x46   : > { %v6044_v38 = vpack.i.bf16 %v614_v22, %v615_v32  ;;  %v1104_v8 = vrot.slane %v9282_v12, 2 }
  0x47   : > { %v619_v1 = vrot.slane %v9175_v0, 1  ;;  %v1100_v0 = vrot.slane %v9278_v17, 2  ;;  %v625_v24 = vsel %vm549_vm0, %v620_v7, %v624_v31  ;;  %v1099_v14 = vsel %vm1063_vm1, %v1097_v56, %v1098_v44  ;;  %v9281_v17 = vld [vmem:[#allocation12_spill] sm:$0xff]  ;;  %v1504_v56 = vld [vmem:[%s9132_s1 + $0xf0] sm:$0xff] }
  0x48   : > { %6015 = vrot.lane.b32.xlu0 %v6014_v39, %s6272_s20  ;;  %v6034_v39 = vpack.i.bf16 %v611_v57, %v607_v58  ;;  %v9277_v58 = vld [vmem:[#allocation7_spill] sm:$0xff]  ;;  %v1102_v13 = vrot.slane %v9281_v17, 2 }
  0x49   : > { %6020 = vrot.lane.b32.xlu1 %v6019_v26, %s6273_s18  ;;  %v9275_v26 = vmov 0.0|0.0   ;;  %v621_v63 = vsel %vm549_vm0, %v619_v1, %v620_v7  ;;  %v1502_v57 = vld [vmem:[%s9132_s1 + $0xe0] sm:$0xff]  ;;  %v1101_v32 = vsel %vm1063_vm1, %v1098_v44, %v1100_v0  ;;  %v1505_v44 = vld [vmem:[%s9132_s1 + $0xf8] sm:$0xff] }
  0x4a   : > { %5512 = vmatprep.subr.bf16.mxu0 %v9275_v26  ;;  %5742 = vmatprep.subr.bf16.mxu1 %v9275_v26  ;;  %v6054_v7 = vpack.i.bf16 %v625_v24, %v621_v63  ;;  %v1105_v24 = vsel %vm1063_vm1, %v1102_v13, %v1104_v8  ;;  %v5522_v12 = vpack.c.bf16 %v1505_v44, %v1504_v56 }
  0x4b   : > { %5514 = vmatpush1.bf16.msra.mxu0 %v5513_v16  ;;  %5758 = vmatpush1.bf16.msra.mxu1 %v5513_v16  ;;  %v6059_v16 = vpack.i.bf16 %v1101_v32, %v1099_v14 }
  0x4c   : > { %6025 = vrot.lane.b32.xlu0 %v6024_v23, %s6272_s20  ;;  %v9276_v23 = vld [vmem:[#allocation6_spill] sm:$0xff]  ;;  %5515 = vmatprep.subr.bf16.mxu0 %v9275_v26 }
  0x4d   : > { %6030 = vrot.lane.b32.xlu1 %v6029_v55, %s6273_s18  ;;  %v9181_v61 = vunpack.c.h.bf16 %v9276_v23  ;;  %v6049_v55 = vpack.i.bf16 %v1095_v18, %v1096_v45  ;;  %v9279_v45 = vunpack.c.h.bf16 %v9277_v58  ;;  %v9280_v18 = vld [vmem:[#allocation13_spill] sm:$0xff]  ;;  %5743 = vmatprep.subr.bf16.mxu1 %v9275_v26 }
  0x4f   : > { %v628_v22 = vrot.slane %v9181_v61, 1  ;;  %v632_v1 = vrot.slane %v9279_v45, 1  ;;  %5517 = vmatpush1.bf16.msra.mxu0 %v5516_v27  ;;  %v9283_v45 = vld [vmem:[#allocation15_spill] sm:$0xff]  ;;  %5759 = vmatpush1.bf16.msra.mxu1 %v5516_v27 }
  0x50   : > { %6035 = vrot.lane.b32.xlu0 %v6034_v39, %s6272_s20  ;;  %v9184_v39 = vunpack.c.h.bf16 %v9280_v18  ;;  %5518 = vmatprep.subr.bf16.mxu0 %v9275_v26  ;;  %v1106_v61 = vrot.slane %v9283_v45, 2 }
  0x51   : > { %6040 = vrot.lane.b32.xlu1 %v6039_v62, %s6273_s18  ;;  %v5519_v62 = vpack.c.bf16 %v1503_v15, %v1502_v57  ;;  %v629_v57 = vsel %vm549_vm0, %v624_v31, %v628_v22  ;;  %v633_v15 = vsel %vm549_vm0, %v628_v22, %v632_v1  ;;  %5744 = vmatprep.subr.bf16.mxu1 %v9275_v26 }
  0x52   : > { %v636_v63 = vrot.slane %v9184_v39, 1 }
  0x53   : > { %5520 = vmatpush1.bf16.msra.mxu0 %v5519_v62  ;;  %5760 = vmatpush1.bf16.msra.mxu1 %v5519_v62 }
  0x54   : > { %6045 = vrot.lane.b32.xlu0 %v6044_v38, %s6272_s20  ;;  %v1103_v38 = vsel %vm1063_vm1, %v1100_v0, %v1102_v13  ;;  %5521 = vmatprep.subr.bf16.mxu0 %v9275_v26  ;;  %v637_v0 = vsel %vm549_vm0, %v632_v1, %v636_v63  ;;  %v1107_v13 = vsel %vm1063_vm1, %v1104_v8, %v1106_v61  ;;  %v6851_v1 = vld [vmem:[%s6389_s29 + $0xc0] sm:$0xff]  ;;  %v6854_v8 = vld [vmem:[%s6389_s29 + $0xc8] sm:$0xff] }
  0x55   : > { %6050 = vrot.lane.b32.xlu1 %v6049_v55, %s6273_s18  ;;  %v6064_v55 = vpack.i.bf16 %v633_v15, %v629_v57  ;;  %v6069_v31 = vpack.i.bf16 %v1105_v24, %v1103_v38  ;;  %5745 = vmatprep.subr.bf16.mxu1 %v9275_v26  ;;  %v6074_v27 = vpack.i.bf16 %v636_v63, %v637_v0  ;;  %v6857_v14 = vunpack.c.l.bf16 %v6851_v1 }
  0x56   : > { %v6079_v22 = vpack.i.bf16 %v1106_v61, %v1107_v13  ;;  %v9183_v32 = vunpack.c.h.bf16 %v6851_v1  ;;  %v6861_v62 = vunpack.c.l.bf16 %v6854_v8 }
  0x57   : > { %5523 = vmatpush1.bf16.msra.mxu0 %v5522_v12  ;;  %5761 = vmatpush1.bf16.msra.mxu1 %v5522_v12  ;;  %v638_v12 = vrot.slane %v6857_v14, 1 }
  0x58   : > { %6055 = vrot.lane.b32.xlu0 %v6054_v7, %s6272_s20  ;;  %5524 = vmatprep.subr.bf16.mxu0 %v9275_v26  ;;  %9284 = vst [vmem:[#allocation6_spill] sm:$0xff] %v6861_v62  ;;  %v9182_v7 = vunpack.c.h.bf16 %v6854_v8  ;;  %v639_v61 = vrot.slane %v6861_v62, 1  ;;  %v641_v56 = vrot.slane %v9183_v32, 1 }
  0x59   : > { %6060 = vrot.lane.b32.xlu1 %v6059_v16, %s6273_s18  ;;  %v6871_v16 = vld [vmem:[%s6389_s29 + $0xd0] sm:$0xff] }
  0x5a   : > { %v642_v44 = vrot.slane %v9182_v7, 1  ;;  %9285 = vst [vmem:[#allocation7_spill] sm:$0xff] %v6871_v16  ;;  %v6874_v57 = vunpack.c.l.bf16 %v6871_v16  ;;  %v640_v15 = vsel %vm549_vm0, %v638_v12, %v639_v61  ;;  %v9186_v38 = vunpack.c.h.bf16 %v6871_v16  ;;  %v6919_v16 = vld [vmem:[%s6389_s29 + $0xe8] sm:$0xff] }
  0x5b   : > { %9291 = vst [vmem:[#allocation18_spill] sm:$0xff] %v6919_v16 }
  0x5c   : > { %6065 = vrot.lane.b32.xlu0 %v6064_v55, %s6272_s20  ;;  %9286 = vst [vmem:[#allocation13_spill] sm:$0xff] %v6874_v57  ;;  %v643_v63 = vsel %vm549_vm0, %v641_v56, %v642_v44  ;;  %v1108_v55 = vrot.slane %v6857_v14, 2  ;;  %v1111_v0 = vrot.slane %v6874_v57, 2  ;;  %v644_v13 = vrot.slane %v6874_v57, 1  ;;  %v6889_v56 = vld [vmem:[%s6389_s29 + $0xd8] sm:$0xff] }
  0x5d   : > { %6070 = vrot.lane.b32.xlu1 %v6069_v31, %s6273_s18  ;;  %v6084_v24 = vpack.i.bf16 %v643_v63, %v640_v15  ;;  %v1109_v31 = vrot.slane %v6861_v62, 2  ;;  %9287 = vst [vmem:[#allocation12_spill] sm:$0xff] %v6889_v56  ;;  %v6894_v32 = vunpack.c.l.bf16 %v6889_v56  ;;  %v9187_v57 = vunpack.c.h.bf16 %v6889_v56 }
  0x5e   : > { %v645_v63 = vsel %vm549_vm0, %v639_v61, %v644_v13 }
  0x5f   : > { %v1112_v12 = vsel %vm1063_vm1, %v1109_v31, %v1111_v0  ;;  %9288 = vst [vmem:[#allocation15_spill] sm:$0xff] %v6894_v32  ;;  %v650_v61 = vrot.slane %v9187_v57, 1 }
  0x60   : > { %6075 = vrot.lane.b32.xlu0 %v6074_v27, %s6272_s20  ;;  %v646_v27 = vrot.slane %v9186_v38, 1 }
  0x61   : > { %6080 = vrot.lane.b32.xlu1 %v6079_v22, %s6273_s18  ;;  %v1110_v22 = vsel %vm1063_vm1, %v1108_v55, %v1109_v31  ;;  %v6900_v55 = vld [vmem:[%s6389_s29 + $0xe0] sm:$0xff] }
  0x62   : > { %v6089_v15 = vpack.i.bf16 %v1112_v12, %v1110_v22  ;;  %v647_v7 = vsel %vm549_vm0, %v642_v44, %v646_v27  ;;  %9289 = vst [vmem:[#allocation16_spill] sm:$0xff] %v6900_v55  ;;  %v6906_v44 = vunpack.c.l.bf16 %v6900_v55  ;;  %v651_v22 = vsel %vm549_vm0, %v646_v27, %v650_v61 }
  0x63   : > { %v6094_v39 = vpack.i.bf16 %v647_v7, %v645_v63  ;;  %v9191_v7 = vunpack.c.h.bf16 %v6900_v55  ;;  %v1113_v12 = vrot.slane %v6894_v32, 2 }
  0x64   : > { %6085 = vrot.lane.b32.xlu0 %v6084_v24, %s6272_s20  ;;  %v648_v24 = vrot.slane %v6894_v32, 1  ;;  %9290 = vst [vmem:[#allocation17_spill] sm:$0xff] %v6906_v44  ;;  %v652_v38 = vrot.slane %v6906_v44, 1 }
  0x65   : > { %6090 = vrot.lane.b32.xlu1 %v6089_v15, %s6273_s18  ;;  %v1115_v15 = vrot.slane %v6906_v44, 2  ;;  %v1114_v57 = vsel %vm1063_vm1, %v1111_v0, %v1113_v12  ;;  %v1507_v0 = vld [vmem:[%s9132_s1 + $0x108] sm:$0xff] }
  0x66   : > { %v649_v31 = vsel %vm549_vm0, %v644_v13, %v648_v24  ;;  %v653_v27 = vsel %vm549_vm0, %v648_v24, %v652_v38 }
  0x67   : > { %v6099_v63 = vpack.i.bf16 %v651_v22, %v649_v31  ;;  %v1116_v56 = vsel %vm1063_vm1, %v1113_v12, %v1115_v15  ;;  %v6925_v31 = vunpack.c.l.bf16 %v6919_v16  ;;  %v1506_v22 = vld [vmem:[%s9132_s1 + $0x100] sm:$0xff] }
  0x68   : > { %6095 = vrot.lane.b32.xlu0 %v6094_v39, %s6272_s20  ;;  %v654_v39 = vrot.slane %v9191_v7, 1  ;;  %v6104_v13 = vpack.i.bf16 %v1116_v56, %v1114_v57  ;;  %v9194_v7 = vunpack.c.h.bf16 %v6919_v16  ;;  %v5525_v44 = vpack.c.bf16 %v1507_v0, %v1506_v22  ;;  %v1508_v56 = vld [vmem:[%s9132_s1 + $0x110] sm:$0xff]  ;;  %v1509_v16 = vld [vmem:[%s9132_s1 + $0x118] sm:$0xff] }
  0x69   : > { %6100 = vrot.lane.b32.xlu1 %v6099_v63, %s6272_s20  ;;  %9292 = vst [vmem:[#allocation19_spill] sm:$0xff] %v6925_v31  ;;  %v656_v57 = vrot.slane %v6925_v31, 1  ;;  %v1117_v0 = vrot.slane %v6925_v31, 2  ;;  %v5528_v31 = vpack.c.bf16 %v1509_v16, %v1508_v56  ;;  %v6987_v56 = vld [vmem:[%s6389_s29 + $0xf8] sm:$0xff] }
  0x6a   : > { %v655_v32 = vsel %vm549_vm0, %v650_v61, %v654_v39  ;;  %v658_v61 = vrot.slane %v9194_v7, 1  ;;  %v9295_v7 = vunpack.c.h.bf16 %v6397_v20  ;;  %v1510_v20 = vld [vmem:[%s9132_s1 + $0x120] sm:$0xff]  ;;  %9299 = vst [vmem:[#allocation20_spill] sm:$0xff] %v6987_v56 }
  0x6b   : > { %v6109_v12 = vpack.i.bf16 %v655_v32, %v653_v27  ;;  %v657_v32 = vsel %vm549_vm0, %v652_v38, %v656_v57  ;;  %v9293_v27 = vunpack.c.h.bf16 %v6394_v19 }
  0x6c   : > { %6105 = vrot.lane.b32.xlu0 %v6104_v13, %s6273_s18  ;;  %v659_v22 = vsel %vm549_vm0, %v654_v39, %v658_v61  ;;  %v1118_v39 = vsel %vm1063_vm1, %v1115_v15, %v1117_v0  ;;  %v6124_v16 = vpack.i.bf16 %v658_v61, %v656_v57  ;;  %v6984_v15 = vld [vmem:[%s6389_s29 + $0xf0] sm:$0xff] }
  0x6d   : > { %6110 = vrot.lane.b32.xlu1 %v6109_v12, %s6272_s20  ;;  %v6114_v38 = vpack.i.bf16 %v659_v22, %v657_v32  ;;  %v6119_v55 = vpack.i.bf16 %v1117_v0, %v1118_v39  ;;  %v9296_v32 = vunpack.c.h.bf16 %v6400_v21  ;;  %v9297_v21 = vld [vmem:[#allocation3_spill] sm:$0xff]  ;;  %v6992_v22 = vunpack.c.l.bf16 %v6984_v15  ;;  %v1512_v61 = vld [vmem:[%s9132_s1 + $0x130] sm:$0xff]  ;;  %v1513_v0 = vld [vmem:[%s9132_s1 + $0x138] sm:$0xff] }
  0x6e   : > { %9298 = vst [vmem:[#allocation3_spill] sm:$0xff] %v6984_v15  ;;  %v9199_v57 = vunpack.c.h.bf16 %v6984_v15  ;;  %v9306_v15 = vunpack.c.h.bf16 %v6418_v28 }
  0x6f   : > { %9300 = vst [vmem:[#allocation21_spill] sm:$0xff] %v6992_v22 }
  0x70   : > { %6115 = vrot.lane.b32.xlu0 %v6114_v38, %s6272_s20  ;;  %v9201_v38 = vunpack.c.h.bf16 %v6987_v56  ;;  %v663_v39 = vrot.slane %v9199_v57, 1 }
  0x71   : > { %6120 = vrot.lane.b32.xlu1 %v6119_v55, %s6273_s18 }
  0x74   : > { %6125 = vrot.lane.b32.xlu0 %v6124_v16, %s6272_s20 }
  0x8e   : > { %v6934_v63 = vpop.permute.xlu0 %5905 }
  0x8f   : > { %v9195_v24 = vunpack.i.l.bf16 %v6934_v63 }
  0x91   : > { %v1296_v13 = vsel %vm918_vm2, %v9293_v27, %v9195_v24  ;;  %v9294_v27 = vunpack.i.h.bf16 %v6934_v63 }
  0x92   : > { %v6957_v12 = vpop.permute.xlu0 %5910  ;;  %1609 = vmatprep.mubr.f32.mxu0 %v1296_v13 }
  0x93   : > { %v9198_v19 = vunpack.i.l.bf16 %v6957_v12  ;;  %1610 = vmatmul.mubr.f32.vlgmr.msra.gmra.mrb[0].mxu0 %v6409_v25  ;;  %v1297_v24 = vsel %vm918_vm2, %v9295_v7, %v9294_v27  ;;  %v1511_v7 = vld [vmem:[%s9132_s1 + $0x128] sm:$0xff]  ;;  %v660_v27 = vrot.slane %v6992_v22, 1 }
  0x94   : > { %1614 = vmatprep.mubr.f32.mxu0 %v1297_v24  ;;  %5526 = vmatpush1.bf16.msra.mxu0 %v5525_v44  ;;  %v9202_v44 = vunpack.i.h.bf16 %v6957_v12  ;;  %v6989_v24 = vpop.permute.xlu1 %5915  ;;  %v5531_v13 = vpack.c.bf16 %v1511_v7, %v1510_v20  ;;  %v9304_v20 = vunpack.c.h.bf16 %v6424_v30 }
  0x95   : > { %v1298_v25 = vsel %vm918_vm2, %v9296_v32, %v9198_v19  ;;  %5527 = vmatprep.subr.bf16.mxu0 %v9275_v26  ;;  %v7012_v32 = vld [vmem:[%s6389_s29 + $0x100] sm:$0xff]  ;;  %v5534_v19 = vpack.c.bf16 %v1513_v0, %v1512_v61 }
  0x96   : > { %9302 = vst [vmem:[#allocation23_spill] sm:$0xff] %v7012_v32  ;;  %v1299_v7 = vsel %vm918_vm2, %v9304_v20, %v9202_v44  ;;  %v7024_v57 = vunpack.c.l.bf16 %v7012_v32  ;;  %v9204_v55 = vunpack.c.h.bf16 %v7012_v32  ;;  %v1514_v20 = vld [vmem:[%s9132_s1 + $0x140] sm:$0xff]  ;;  %v1119_v44 = vrot.slane %v6992_v22, 2 }
  0x97   : > { %1615 = vmatmul.mubr.f32.gmra.mrb[2].mxu0 %v9297_v21  ;;  %v664_v21 = vrot.slane %v9201_v38, 1  ;;  %v9309_v32 = vunpack.i.h.bf16 %v6989_v24 }
  0x98   : > { %1619 = vmatprep.mubr.f32.mxu0 %v1298_v25  ;;  %5529 = vmatpush1.bf16.msra.mxu0 %v5528_v31  ;;  %v7005_v31 = vunpack.c.l.bf16 %v6987_v56  ;;  %v9303_v25 = vld [vmem:[#allocation4_spill] sm:$0xff]  ;;  %v668_v38 = vrot.slane %v9204_v55, 1  ;;  %v7069_v55 = vld [vmem:[%s6389_s29 + $0x110] sm:$0xff] }
  0x99   : > { %5530 = vmatprep.subr.bf16.mxu0 %v9275_v26  ;;  %v665_v0 = vsel %vm549_vm0, %v663_v39, %v664_v21 }
  0x9a   : > { %9301 = vst [vmem:[#allocation22_spill] sm:$0xff] %v7005_v31  ;;  %v661_v16 = vrot.slane %v7005_v31, 1  ;;  %v1120_v56 = vrot.slane %v7005_v31, 2  ;;  %v9310_v31 = vunpack.c.h.bf16 %v6421_v29  ;;  %v9313_v29 = vunpack.c.h.bf16 %v6439_v35 }
  0x9b   : > { %1620 = vmatmul.mubr.f32.gmra.mrb[4].mxu0 %v9303_v25  ;;  %v9305_v25 = vunpack.i.l.bf16 %v6989_v24 }
  0x9c   : > { %1624 = vmatprep.mubr.f32.mxu0 %v1299_v7  ;;  %5532 = vmatpush1.bf16.msra.mxu0 %v5531_v13  ;;  %v1515_v13 = vld [vmem:[%s9132_s1 + $0x148] sm:$0xff]  ;;  %v662_v61 = vsel %vm549_vm0, %v660_v27, %v661_v16  ;;  %v7041_v7 = vpop.permute.xlu1 %5920  ;;  %v1301_v22 = vsel %vm918_vm2, %v9310_v31, %v9309_v32  ;;  %v7100_v32 = vunpack.c.l.bf16 %v7069_v55 }
  0x9d   : > { %v1300_v30 = vsel %vm918_vm2, %v9306_v15, %v9305_v25  ;;  %5533 = vmatprep.subr.bf16.mxu0 %v9275_v26  ;;  %v6129_v28 = vpack.i.bf16 %v665_v0, %v662_v61  ;;  %v666_v15 = vrot.slane %v7024_v57, 1  ;;  %v5537_v27 = vpack.c.bf16 %v1515_v13, %v1514_v20  ;;  %v7052_v61 = vld [vmem:[%s6389_s29 + $0x108] sm:$0xff]  ;;  %v7055_v25 = vpop.permute.xlu0 %5925  ;;  %v9308_v0 = vld [vmem:[#allocation5_spill] sm:$0xff] }
  0x9e   : > { %9307 = vst [vmem:[#allocation4_spill] sm:$0xff] %v7052_v61  ;;  %v1121_v13 = vsel %vm1063_vm1, %v1119_v44, %v1120_v56 }
  0x9f   : > { %1625 = vmatmul.mubr.f32.gmra.mrb[6].mxu0 %v6436_v34  ;;  %v667_v39 = vsel %vm549_vm0, %v661_v16, %v666_v15  ;;  %v1516_v34 = vld [vmem:[%s9132_s1 + $0x150] sm:$0xff]  ;;  %6130 = vrot.lane.b32.xlu1 %v6129_v28, %s6272_s20  ;;  %v669_v16 = vsel %vm549_vm0, %v664_v21, %v668_v38  ;;  %v7079_v28 = vunpack.c.l.bf16 %v7052_v61 }
  0xa0   : > { %1629 = vmatprep.mubr.f32.mxu0 %v1300_v30  ;;  %5535 = vmatpush1.bf16.msra.mxu0 %v5534_v19  ;;  %v1517_v19 = vld [vmem:[%s9132_s1 + $0x158] sm:$0xff]  ;;  %v1122_v30 = vrot.slane %v7024_v57, 2  ;;  %v6139_v20 = vpack.i.bf16 %v669_v16, %v667_v39  ;;  %v7081_v21 = vpop.permute.xlu1 %5930  ;;  %v9312_v16 = vunpack.i.l.bf16 %v7041_v7 }
  0xa1   : > { %5536 = vmatprep.subr.bf16.mxu0 %v9275_v26  ;;  %9311 = vst [vmem:[#allocation5_spill] sm:$0xff] %v7079_v28  ;;  %v5540_v44 = vpack.c.bf16 %v1517_v19, %v1516_v34  ;;  %v7107_v19 = vpop.permute.xlu0 %5935  ;;  %v9316_v34 = vunpack.c.h.bf16 %v6442_v36  ;;  %v9318_v36 = vunpack.i.l.bf16 %v7055_v25 }
  0xa2   : > { %v1123_v62 = vsel %vm1063_vm1, %v1120_v56, %v1122_v30  ;;  %v1302_v31 = vsel %vm918_vm2, %v9313_v29, %v9312_v16  ;;  %v1518_v56 = vld [vmem:[%s9132_s1 + $0x160] sm:$0xff] }
  0xa3   : > { %1630 = vmatmul.mubr.f32.gmra.mrb[8].mxu0 %v9308_v0  ;;  %v6134_v39 = vpack.i.bf16 %v1123_v62, %v1121_v13  ;;  %v9209_v0 = vunpack.c.h.bf16 %v7052_v61  ;;  %6140 = vrot.lane.b32.xlu1 %v6139_v20, %s6272_s20  ;;  %v670_v62 = vrot.slane %v7079_v28, 1  ;;  %v1126_v13 = vrot.slane %v7100_v32, 2 }
  0xa4   : > { %4872 = vmatprep.mubr.msk.f32.mxu0 %vm1063_vm1, %v1301_v22  ;;  %5538 = vmatpush1.bf16.msra.mxu0 %v5537_v27  ;;  %v1519_v22 = vld [vmem:[%s9132_s1 + $0x168] sm:$0xff]  ;;  %v1124_v27 = vrot.slane %v7079_v28, 2  ;;  %v674_v61 = vrot.slane %v7100_v32, 1 }
  0xa5   : > { %5539 = vmatprep.subr.bf16.mxu0 %v9275_v26  ;;  %6135 = vrot.lane.b32.xlu0 %v6134_v39, %s6273_s18  ;;  %v672_v35 = vrot.slane %v9209_v0, 1  ;;  %v671_v20 = vsel %vm549_vm0, %v666_v15, %v670_v62  ;;  %v5543_v16 = vpack.c.bf16 %v1519_v22, %v1518_v56  ;;  %v7116_v0 = vld [vmem:[%s6389_s29 + $0x118] sm:$0xff]  ;;  %v9212_v56 = vunpack.c.h.bf16 %v7069_v55 }
  0xa6   : > { %v1125_v29 = vsel %vm1063_vm1, %v1122_v30, %v1124_v27  ;;  %9314 = vst [vmem:[#allocation24_spill] sm:$0xff] %v7116_v0  ;;  %v1521_v15 = vld [vmem:[%s9132_s1 + $0x178] sm:$0xff]  ;;  %v9315_v22 = vunpack.i.h.bf16 %v7041_v7 }
  0xa7   : > { %4873 = vmatmul.mubr.msk.f32.gmra.mrb[10].mxu0 %vm1063_vm1, %v6433_v33  ;;  %v673_v39 = vsel %vm549_vm0, %v668_v38, %v672_v35  ;;  %v1520_v33 = vld [vmem:[%s9132_s1 + $0x170] sm:$0xff]  ;;  %v7127_v38 = vpop.permute.xlu1 %5940 }
  0xa8   : > { %1639 = vmatprep.mubr.f32.mxu0 %v1302_v31  ;;  %5541 = vmatpush1.bf16.msra.mxu0 %v5540_v44  ;;  %v6144_v44 = vpack.i.bf16 %v673_v39, %v671_v20  ;;  %v1127_v31 = vsel %vm1063_vm1, %v1124_v27, %v1126_v13  ;;  %v1303_v28 = vsel %vm918_vm2, %v9316_v34, %v9315_v22  ;;  %v7139_v20 = vunpack.c.l.bf16 %v7116_v0 }
  0xa9   : > { %5542 = vmatprep.subr.bf16.mxu0 %v9275_v26  ;;  %v6149_v30 = vpack.i.bf16 %v1127_v31, %v1125_v29  ;;  %v5546_v27 = vpack.c.bf16 %v1521_v15, %v1520_v33  ;;  %v676_v39 = vrot.slane %v9212_v56, 1  ;;  %v7144_v29 = vpop.permute.xlu0 %5945  ;;  %v9319_v34 = vunpack.c.h.bf16 %v6445_v37  ;;  %v7168_v56 = vld [vmem:[%s6389_s29 + $0x120] sm:$0xff] }
  0xaa   : > { %6145 = vrot.lane.b32.xlu0 %v6144_v44, %s6272_s20  ;;  %9317 = vst [vmem:[#allocation25_spill] sm:$0xff] %v7139_v20  ;;  %v675_v33 = vsel %vm549_vm0, %v670_v62, %v674_v61  ;;  %v678_v15 = vrot.slane %v7139_v20, 1  ;;  %v9217_v22 = vunpack.i.h.bf16 %v7055_v25 }
  0xab   : > { %1640 = vmatmul.mubr.f32.gmra.mrb[12].mxu0 %v6452_v42  ;;  %v9214_v42 = vunpack.c.h.bf16 %v7116_v0  ;;  %v1304_v44 = vsel %vm918_vm2, %v9319_v34, %v9318_v36  ;;  %6150 = vrot.lane.b32.xlu1 %v6149_v30, %s6273_s18  ;;  %v677_v37 = vsel %vm549_vm0, %v672_v35, %v676_v39  ;;  %v7170_v30 = vpop.permute.xlu1 %5950  ;;  %v1128_v0 = vrot.slane %v7139_v20, 2 }
  0xac   : > { %1644 = vmatprep.mubr.f32.mxu0 %v1303_v28  ;;  %5544 = vmatpush1.bf16.msra.mxu0 %v5543_v16  ;;  %v1522_v28 = vld [vmem:[%s9132_s1 + $0x180] sm:$0xff]  ;;  %v1523_v16 = vld [vmem:[%s9132_s1 + $0x188] sm:$0xff]  ;;  %v6154_v36 = vpack.i.bf16 %v677_v37, %v675_v33  ;;  %v679_v34 = vsel %vm549_vm0, %v674_v61, %v678_v15  ;;  %v1525_v61 = vld [vmem:[%s9132_s1 + $0x198] sm:$0xff] }
  0xad   : > { %5545 = vmatprep.subr.bf16.mxu0 %v9275_v26  ;;  %v680_v31 = vrot.slane %v9214_v42, 1  ;;  %v5549_v62 = vpack.c.bf16 %v1523_v16, %v1522_v28  ;;  %v7189_v28 = vpop.permute.xlu0 %5955  ;;  %v9322_v16 = vunpack.c.h.bf16 %v6461_v47  ;;  %v9324_v47 = vunpack.i.l.bf16 %v7081_v21 }
  0xae   : > { %6155 = vrot.lane.b32.xlu0 %v6154_v36, %s6272_s20  ;;  %v1129_v36 = vsel %vm1063_vm1, %v1126_v13, %v1128_v0  ;;  %v1526_v13 = vld [vmem:[%s9132_s1 + $0x1a0] sm:$0xff] }
  0xaf   : > { %1645 = vmatmul.mubr.f32.gmra.mrb[14].mxu0 %v6458_v46  ;;  %v681_v35 = vsel %vm549_vm0, %v676_v39, %v680_v31  ;;  %v1524_v46 = vld [vmem:[%s9132_s1 + $0x190] sm:$0xff]  ;;  %v7187_v39 = vunpack.c.l.bf16 %v7168_v56  ;;  %v1305_v33 = vsel %vm918_vm2, %v9322_v16, %v9217_v22  ;;  %v6169_v37 = vpack.i.bf16 %v680_v31, %v678_v15 }
  0xb0   : > { %1649 = vmatprep.mubr.f32.mxu0 %v1304_v44  ;;  %5547 = vmatpush1.bf16.msra.mxu0 %v5546_v27  ;;  %v6159_v27 = vpack.i.bf16 %v681_v35, %v679_v34  ;;  %v7184_v44 = vld [vmem:[%s6389_s29 + $0x128] sm:$0xff]  ;;  %v9216_v34 = vunpack.c.h.bf16 %v7168_v56  ;;  %v5552_v35 = vpack.c.bf16 %v1525_v61, %v1524_v46  ;;  %v6164_v42 = vpack.i.bf16 %v1128_v0, %v1129_v36 }
  0xb1   : > { %5548 = vmatprep.subr.bf16.mxu0 %v9275_v26  ;;  %9320 = vst [vmem:[#allocation26_spill] sm:$0xff] %v7184_v44  ;;  %9321 = vst [vmem:[#allocation27_spill] sm:$0xff] %v7187_v39  ;;  %v7201_v20 = vunpack.c.l.bf16 %v7184_v44  ;;  %v9325_v16 = vunpack.c.h.bf16 %v6470_v52  ;;  %v1527_v0 = vld [vmem:[%s9132_s1 + $0x1a8] sm:$0xff]  ;;  %v9218_v15 = vunpack.c.h.bf16 %v7184_v44  ;;  %v682_v31 = vrot.slane %v7187_v39, 1  ;;  %v7237_v22 = vpop.permute.xlu0 %5965 }
  0xb2   : > { %6160 = vrot.lane.b32.xlu1 %v6159_v27, %s6272_s20  ;;  %6165 = vrot.lane.b32.xlu0 %v6164_v42, %s6273_s18  ;;  %v685_v46 = vrot.slane %v9216_v34, 1  ;;  %v9221_v61 = vunpack.i.h.bf16 %v7081_v21  ;;  %v5555_v42 = vpack.c.bf16 %v1527_v0, %v1526_v13 }
  0xb3   : > { %1650 = vmatmul.mubr.f32.gmra.mrb[16].mxu0 %v6466_v50  ;;  %v7204_v50 = vld [vmem:[%s6389_s29 + $0x130] sm:$0xff]  ;;  %v1306_v27 = vsel %vm918_vm2, %v9325_v16, %v9324_v47  ;;  %v683_v52 = vrot.slane %v7201_v20, 1  ;;  %v1130_v16 = vrot.slane %v7187_v39, 2 }
  0xb4   : > { %1654 = vmatprep.mubr.f32.mxu0 %v1305_v33  ;;  %5550 = vmatpush1.bf16.msra.mxu0 %v5549_v62  ;;  %9323 = vst [vmem:[#allocation28_spill] sm:$0xff] %v7204_v50  ;;  %v7220_v62 = vpop.permute.xlu1 %5960  ;;  %v686_v33 = vrot.slane %v9218_v15, 1  ;;  %v7232_v36 = vunpack.c.l.bf16 %v7204_v50  ;;  %v9222_v44 = vunpack.c.h.bf16 %v7204_v50  ;;  %v9333_v50 = vunpack.i.l.bf16 %v7127_v38 }
  0xb5   : > { %5551 = vmatprep.subr.bf16.mxu0 %v9275_v26  ;;  %v684_v47 = vsel %vm549_vm0, %v682_v31, %v683_v52  ;;  %v9326_v31 = vunpack.c.h.bf16 %v6473_v53  ;;  %v7265_v53 = vld [vmem:[%s6389_s29 + $0x138] sm:$0xff] }
  0xb6   : > { %6170 = vrot.lane.b32.xlu1 %v6169_v37, %s6272_s20  ;;  %v1529_v37 = vld [vmem:[%s9132_s1 + $0x1b8] sm:$0xff]  ;;  %v9223_v0 = vrot.slane %v7232_v36, 2  ;;  %9327 = vst [vmem:[#allocation29_spill] sm:$0xff] %v7265_v53 }
  0xb7   : > { %1655 = vmatmul.mubr.f32.gmra.mrb[18].mxu0 %v6493_v2  ;;  %v1528_v2 = vld [vmem:[%s9132_s1 + $0x1b0] sm:$0xff]  ;;  %v1307_v15 = vsel %vm918_vm2, %v9326_v31, %v9221_v61 }
  0xb8   : > { %1659 = vmatprep.mubr.f32.mxu0 %v1306_v27  ;;  %5553 = vmatpush1.bf16.msra.mxu0 %v5552_v35  ;;  %v687_v35 = vsel %vm549_vm0, %v685_v46, %v686_v33  ;;  %v1131_v27 = vrot.slane %v7201_v20, 2  ;;  %v7257_v39 = vpop.permute.xlu1 %5970  ;;  %v5558_v46 = vpack.c.bf16 %v1529_v37, %v1528_v2  ;;  %v690_v37 = vrot.slane %v9222_v44, 1 }
  0xb9   : > { %5554 = vmatprep.subr.bf16.mxu0 %v9275_v26  ;;  %v6174_v13 = vpack.i.bf16 %v687_v35, %v684_v47  ;;  %v688_v47 = vrot.slane %v7232_v36, 1  ;;  %v9328_v35 = vunpack.i.l.bf16 %v7107_v19 }
  0xba   : > { %v1132_v34 = vsel %vm1063_vm1, %v1130_v16, %v1131_v27  ;;  %v9329_v16 = vunpack.c.h.bf16 %v6476_v54  ;;  %v691_v61 = vsel %vm549_vm0, %v686_v33, %v690_v37  ;;  %v1533_v33 = vld [vmem:[%s9132_s1 + $0x1d8] sm:$0xff] }
  0xbb   : > { %1660 = vmatmul.mubr.f32.gmra.mrb[20].mxu0 %v6496_v3  ;;  %v1134_v3 = vsel %vm1063_vm1, %v1131_v27, %v9223_v0  ;;  %6175 = vrot.lane.b32.xlu0 %v6174_v13, %s6272_s20  ;;  %v689_v54 = vsel %vm549_vm0, %v683_v52, %v688_v47  ;;  %v7284_v27 = vld [vmem:[%s6389_s29 + $0x140] sm:$0xff] }
  0xbc   : > { %4874 = vmatprep.mubr.msk.f32.mxu0 %vm1063_vm1, %v1307_v15  ;;  %5556 = vmatpush1.bf16.msra.mxu0 %v5555_v42  ;;  %v1308_v31 = vsel %vm918_vm2, %v9329_v16, %v9328_v35  ;;  %v1530_v15 = vld [vmem:[%s9132_s1 + $0x1c0] sm:$0xff]  ;;  %v1531_v42 = vld [vmem:[%s9132_s1 + $0x1c8] sm:$0xff]  ;;  %v6179_v2 = vpack.i.bf16 %v1134_v3, %v1132_v34  ;;  %9330 = vst [vmem:[#allocation30_spill] sm:$0xff] %v7284_v27  ;;  %v9228_v35 = vunpack.i.h.bf16 %v7107_v19  ;;  %v7287_v16 = vpop.permute.xlu0 %5975  ;;  %v7294_v34 = vunpack.c.l.bf16 %v7265_v53 }
  0xbd   : > { %5557 = vmatprep.subr.bf16.mxu0 %v9275_v26  ;;  %v5561_v13 = vpack.c.bf16 %v1531_v42, %v1530_v15  ;;  %v6184_v52 = vpack.i.bf16 %v691_v61, %v689_v54  ;;  %v9224_v3 = vunpack.c.h.bf16 %v7265_v53  ;;  %v7309_v61 = vpop.permute.xlu1 %5980  ;;  %v9227_v15 = vunpack.c.h.bf16 %v7284_v27 }
  0xbe   : > { %6180 = vrot.lane.b32.xlu1 %v6179_v2, %s6273_s18  ;;  %v692_v2 = vrot.slane %v7294_v34, 1  ;;  %v9332_v42 = vunpack.c.h.bf16 %v6484_v59  ;;  %v9334_v59 = vunpack.c.h.bf16 %v6487_v60  ;;  %v1135_v60 = vrot.slane %v7294_v34, 2 }
  0xbf   : > { %4875 = vmatmul.mubr.msk.f32.gmra.mrb[22].mxu0 %vm1063_vm1, %v6499_v4  ;;  %v1532_v4 = vld [vmem:[%s9132_s1 + $0x1d0] sm:$0xff]  ;;  %6185 = vrot.lane.b32.xlu0 %v6184_v52, %s6272_s20  ;;  %v698_v53 = vrot.slane %v9227_v15, 1 }
  0xc0   : > { %1669 = vmatprep.mubr.f32.mxu0 %v1308_v31  ;;  %5559 = vmatpush1.bf16.msra.mxu0 %v5558_v46  ;;  %v7307_v46 = vunpack.c.l.bf16 %v7284_v27  ;;  %v694_v31 = vrot.slane %v9224_v3, 1  ;;  %v1309_v54 = vsel %vm918_vm2, %v9332_v42, %v9228_v35  ;;  %v693_v0 = vsel %vm549_vm0, %v688_v47, %v692_v2  ;;  %v1534_v47 = vld [vmem:[%s9132_s1 + $0x1e0] sm:$0xff] }
  0xc1   : > { %5560 = vmatprep.subr.bf16.mxu0 %v9275_v26  ;;  %v5564_v52 = vpack.c.bf16 %v1533_v33, %v1532_v4  ;;  %v1310_v42 = vsel %vm918_vm2, %v9334_v59, %v9333_v50  ;;  %v7342_v33 = vld [vmem:[%s6389_s29 + $0x148] sm:$0xff]  ;;  %v9232_v50 = vunpack.i.h.bf16 %v7127_v38  ;;  %v7350_v35 = vpop.permute.xlu1 %5990  ;;  %v9341_v27 = vunpack.c.h.bf16 %v6518_v11 }
  0xc2   : > { %9331 = vst [vmem:[#allocation31_spill] sm:$0xff] %v7307_v46  ;;  %v696_v44 = vrot.slane %v7307_v46, 1  ;;  %v695_v3 = vsel %vm549_vm0, %v690_v37, %v694_v31  ;;  %v1535_v37 = vld [vmem:[%s9132_s1 + $0x1e8] sm:$0xff]  ;;  %9335 = vst [vmem:[#allocation32_spill] sm:$0xff] %v7342_v33  ;;  %v1137_v15 = vrot.slane %v7307_v46, 2 }
  0xc3   : > { %1670 = vmatmul.mubr.f32.gmra.mrb[24].mxu0 %v6502_v5  ;;  %v7326_v5 = vpop.permute.xlu0 %5985 }
  0xc4   : > { %1674 = vmatprep.mubr.f32.mxu0 %v1309_v54  ;;  %5562 = vmatpush1.bf16.msra.mxu0 %v5561_v13  ;;  %v6189_v13 = vpack.i.bf16 %v695_v3, %v693_v0  ;;  %v697_v4 = vsel %vm549_vm0, %v692_v2, %v696_v44  ;;  %v699_v54 = vsel %vm549_vm0, %v694_v31, %v698_v53  ;;  %v9336_v3 = vrot.slane %v7232_v36, 2 }
  0xc5   : > { %5563 = vmatprep.subr.bf16.mxu0 %v9275_v26  ;;  %v6199_v59 = vpack.i.bf16 %v699_v54, %v697_v4  ;;  %v5567_v0 = vpack.c.bf16 %v1535_v37, %v1534_v47  ;;  %v7356_v31 = vunpack.c.l.bf16 %v7342_v33  ;;  %v9231_v47 = vunpack.c.h.bf16 %v7342_v33  ;;  %v7369_v4 = vld [vmem:[%s6389_s29 + $0x150] sm:$0xff] }
  0xc6   : > { %6190 = vrot.lane.b32.xlu1 %v6189_v13, %s6272_s20  ;;  %v1136_v2 = vsel %vm1063_vm1, %v9336_v3, %v1135_v60  ;;  %v1536_v13 = vld [vmem:[%s9132_s1 + $0x1f0] sm:$0xff]  ;;  %9338 = vst [vmem:[#allocation34_spill] sm:$0xff] %v7369_v4  ;;  %v9339_v3 = vunpack.c.h.bf16 %v6505_v6 }
  0xc7   : > { %1675 = vmatmul.mubr.f32.gmra.mrb[26].mxu0 %v6512_v9  ;;  %9337 = vst [vmem:[#allocation33_spill] sm:$0xff] %v7356_v31  ;;  %v7371_v54 = vpop.permute.xlu0 %5995  ;;  %v1139_v46 = vrot.slane %v7356_v31, 2 }
  0xc8   : > { %1679 = vmatprep.mubr.f32.mxu0 %v1310_v42  ;;  %5565 = vmatpush1.bf16.msra.mxu0 %v5564_v52  ;;  %v1537_v52 = vld [vmem:[%s9132_s1 + $0x1f8] sm:$0xff]  ;;  %v1138_v42 = vsel %vm1063_vm1, %v1135_v60, %v1137_v15  ;;  %v1311_v9 = vsel %vm918_vm2, %v9339_v3, %v9232_v50  ;;  %v700_v60 = vrot.slane %v7356_v31, 1  ;;  %v9236_v50 = vunpack.i.l.bf16 %v7170_v30 }
  0xc9   : > { %5566 = vmatprep.subr.bf16.mxu0 %v9275_v26  ;;  %v6194_v37 = vpack.i.bf16 %v1138_v42, %v1136_v2  ;;  %v702_v2 = vrot.slane %v9231_v47, 1  ;;  %v5570_v42 = vpack.c.bf16 %v1537_v52, %v1536_v13  ;;  %v7393_v3 = vld [vmem:[%s6389_s29 + $0x158] sm:$0xff]  ;;  %v1140_v11 = vsel %vm1063_vm1, %v1137_v15, %v1139_v46  ;;  %v7409_v47 = vld [vmem:[%s6389_s29 + $0x160] sm:$0xff] }
  0xca   : > { %6200 = vrot.lane.b32.xlu1 %v6199_v59, %s6272_s20  ;;  %v701_v59 = vsel %vm549_vm0, %v696_v44, %v700_v60  ;;  %9342 = vst [vmem:[#allocation35_spill] sm:$0xff] %v7393_v3  ;;  %v9235_v52 = vunpack.i.h.bf16 %v7144_v29  ;;  %v7406_v44 = vunpack.c.l.bf16 %v7393_v3  ;;  %9345 = vst [vmem:[#allocation38_spill] sm:$0xff] %v7409_v47 }
  0xcb   : > { %1680 = vmatmul.mubr.f32.gmra.mrb[28].mxu0 %v6515_v10  ;;  %v9340_v10 = vunpack.i.l.bf16 %v7144_v29  ;;  %6195 = vrot.lane.b32.xlu0 %v6194_v37, %s6273_s18  ;;  %v703_v13 = vsel %vm549_vm0, %v698_v53, %v702_v2  ;;  %v7412_v53 = vpop.permute.xlu0 %6005  ;;  %v6214_v15 = vpack.i.bf16 %v702_v2, %v700_v60  ;;  %v9346_v60 = vunpack.c.h.bf16 %v6532_v41 }
  0xcc   : > { %1684 = vmatprep.mubr.f32.mxu0 %v1311_v9  ;;  %5568 = vmatpush1.bf16.msra.mxu0 %v5567_v0  ;;  %v7396_v0 = vunpack.c.l.bf16 %v7369_v4  ;;  %v7398_v9 = vpop.permute.xlu1 %6000  ;;  %v6204_v37 = vpack.i.bf16 %v703_v13, %v701_v59  ;;  %9344 = vst [vmem:[#allocation37_spill] sm:$0xff] %v7406_v44  ;;  %v705_v59 = vrot.slane %v7406_v44, 1  ;;  %v9348_v41 = vunpack.c.h.bf16 %v6535_v43 }
  0xcd   : > { %v1312_v6 = vsel %vm918_vm2, %v9341_v27, %v9340_v10  ;;  %5569 = vmatprep.subr.bf16.mxu0 %v9275_v26  ;;  %v9233_v27 = vunpack.c.h.bf16 %v7369_v4  ;;  %v6209_v10 = vpack.i.bf16 %v1139_v46, %v1140_v11  ;;  %v1313_v2 = vsel %vm918_vm2, %v9346_v60, %v9235_v52 }
  0xce   : > { %9343 = vst [vmem:[#allocation36_spill] sm:$0xff] %v7396_v0  ;;  %v704_v46 = vrot.slane %v7396_v0, 1  ;;  %v1314_v60 = vsel %vm918_vm2, %v9348_v41, %v9236_v50  ;;  %v9353_v43 = vunpack.i.l.bf16 %v7189_v28  ;;  %v9354_v41 = vunpack.c.h.bf16 %v6549_v51 }
  0xcf   : > { %1685 = vmatmul.mubr.f32.gmra.mrb[30].mxu0 %v6529_v40  ;;  %6205 = vrot.lane.b32.xlu0 %v6204_v37, %s6272_s20  ;;  %v9234_v40 = vunpack.c.h.bf16 %v7393_v3  ;;  %v707_v13 = vrot.slane %v9233_v27, 1  ;;  %v7432_v37 = vunpack.c.l.bf16 %v7409_v47  ;;  %v7466_v26 = vpop.permute.xlu0 %6015  ;;  %v9355_v3 = vld [vmem:[#allocation8_spill] sm:$0xff] }
  0xd0   : > { %1689 = vmatprep.mubr.f32.mxu0 %v1312_v6  ;;  %5571 = vmatpush1.bf16.msra.mxu0 %v5570_v42  ;;  %v706_v27 = vsel %vm549_vm0, %v704_v46, %v705_v59  ;;  %v7448_v6 = vld [vmem:[%s6389_s29 + $0x168] sm:$0xff]  ;;  %v7451_v42 = vld [vmem:[%s6389_s29 + $0x170] sm:$0xff]  ;;  %v9351_v46 = vunpack.i.h.bf16 %v7170_v30 }
  0xd1   : > { %6210 = vrot.lane.b32.xlu1 %v6209_v10, %s6273_s18  ;;  %v708_v11 = vrot.slane %v9234_v40, 1  ;;  %9347 = vst [vmem:[#allocation39_spill] sm:$0xff] %v7432_v37  ;;  %v7434_v10 = vpop.permute.xlu1 %6010  ;;  %v710_v52 = vrot.slane %v7432_v37, 1  ;;  %9349 = vst [vmem:[#allocation40_spill] sm:$0xff] %v7448_v6  ;;  %v1144_v51 = vrot.slane %v7432_v37, 2 }
  0xd2   : > { %9350 = vst [vmem:[#allocation41_spill] sm:$0xff] %v7451_v42 }
  0xd3   : > { %1690 = vmatmul.mubr.f32.gmra.mrb[32].mxu0 %v6543_v48  ;;  %6215 = vrot.lane.b32.xlu0 %v6214_v15, %s6272_s20  ;;  %v709_v40 = vsel %vm549_vm0, %v707_v13, %v708_v11  ;;  %v1316_v15 = vsel %vm918_vm2, %v9354_v41, %v9353_v43  ;;  %v7464_v13 = vld [vmem:[%s6389_s29 + $0x178] sm:$0xff]  ;;  %v711_v4 = vsel %vm549_vm0, %v705_v59, %v710_v52  ;;  %s6276_s29 = smov 8  }
  0xd4   : > { %4876 = vmatprep.mubr.msk.f32.mxu0 %vm1063_vm1, %v1313_v2  ;;  %v9352_v2 = vunpack.c.h.bf16 %v6546_v49  ;;  %v6219_v50 = vpack.i.bf16 %v709_v40, %v706_v27  ;;  %v9356_v49 = vunpack.c.h.bf16 %v7409_v47  ;;  %v7478_v27 = vunpack.c.l.bf16 %v7448_v6 }
  0xd5   : > { %v9247_v40 = vunpack.c.h.bf16 %v7448_v6 }
  0xd6   : > { %v1315_v48 = vsel %vm918_vm2, %v9352_v2, %v9351_v46  ;;  %v712_v31 = vrot.slane %v9356_v49, 1  ;;  %v1141_v46 = vrot.slane %v7396_v0, 2  ;;  %v1142_v2 = vrot.slane %v7406_v44, 2  ;;  %6220 = vrot.lane.b32.xlu1 %v6219_v50, %s6272_s20  ;;  %9357 = vst [vmem:[#allocation8_spill] sm:$0xff] %v7478_v27  ;;  %v7490_v50 = vpop.permute.xlu1 %6020  ;;  %v9359_v0 = vld [vmem:[#allocation9_spill] sm:$0xff] }
  0xd7   : > { %4877 = vmatmul.mubr.msk.f32.gmra.mrb[34].mxu0 %vm1063_vm1, %v9355_v3  ;;  %v7482_v3 = vunpack.c.l.bf16 %v7451_v42  ;;  %v714_v47 = vrot.slane %v7478_v27, 1  ;;  %v716_v44 = vrot.slane %v9247_v40, 1  ;;  %v452_v40 = vunpack.c.h.bf16 %v7464_v13 }
  0xd8   : > { %1699 = vmatprep.mubr.f32.mxu0 %v1314_v60  ;;  %v713_v59 = vsel %vm549_vm0, %v708_v11, %v712_v31  ;;  %v1143_v43 = vsel %vm1063_vm1, %v1141_v46, %v1142_v2  ;;  %v7488_v60 = vunpack.c.l.bf16 %v7464_v13  ;;  %v1145_v37 = vsel %vm1063_vm1, %v1142_v2, %v1144_v51  ;;  %v8039_v13 = vld [vmem:[%s9138_s7] sm:$0xff] }
  0xd9   : > { %9358 = vst [vmem:[#allocation42_spill] sm:$0xff] %v7482_v3  ;;  %v6229_v49 = vpack.i.bf16 %v713_v59, %v711_v4  ;;  %v6224_v11 = vpack.i.bf16 %v1145_v37, %v1143_v43  ;;  %v1146_v46 = vrot.slane %v7478_v27, 2  ;;  %v1148_v41 = vrot.slane %v7482_v3, 2 }
  0xda   : > { %v718_v33 = vrot.slane %v7482_v3, 1  ;;  %v715_v4 = vsel %vm549_vm0, %v710_v52, %v714_v47  ;;  %v717_v2 = vsel %vm549_vm0, %v712_v31, %v716_v44  ;;  %v9360_v59 = vunpack.c.h.bf16 %v7451_v42  ;;  %v9361_v42 = vld [vmem:[#allocation10_spill] sm:$0xff] }
  0xdb   : > { %1700 = vmatmul.mubr.f32.gmra.mrb[36].mxu0 %v9359_v0  ;;  %6230 = vrot.lane.b32.xlu1 %v6229_v49, %s6272_s20  ;;  %v7506_v0 = vpop.permute.xlu0 %6025  ;;  %v6234_v37 = vpack.i.bf16 %v717_v2, %v715_v4  ;;  %v1147_v43 = vsel %vm1063_vm1, %v1144_v51, %v1146_v46  ;;  %v722_v31 = vrot.slane %v7488_v60, 1  ;;  %v5958_v27 = vunpack.i.h.bf16 %v7189_v28 }
  0xdc   : > { %1704 = vmatprep.mubr.f32.mxu0 %v1315_v48  ;;  %v720_v6 = vrot.slane %v9360_v59, 1  ;;  %6225 = vrot.lane.b32.xlu0 %v6224_v11, %s6273_s18  ;;  %v1149_v48 = vsel %vm1063_vm1, %v1146_v46, %v1148_v41  ;;  %v719_v49 = vsel %vm549_vm0, %v714_v47, %v718_v33  ;;  %v724_v59 = vrot.slane %v452_v40, 1  ;;  %v7518_v11 = vpop.permute.xlu1 %6030 }
  0xdd   : > { %v6239_v3 = vpack.i.bf16 %v1149_v48, %v1147_v43  ;;  %v723_v51 = vsel %vm549_vm0, %v718_v33, %v722_v31  ;;  %v1150_v43 = vrot.slane %v7488_v60, 2 }
  0xde   : > { %v721_v52 = vsel %vm549_vm0, %v716_v44, %v720_v6  ;;  %v725_v47 = vsel %vm549_vm0, %v720_v6, %v724_v59  ;;  %v5962_v44 = vunpack.i.l.bf16 %v7220_v62  ;;  %v6254_v6 = vpack.i.bf16 %v724_v59, %v722_v31  ;;  %v9365_v59 = vld [vmem:[#allocation14_spill] sm:$0xff] }
  0xdf   : > { %1705 = vmatmul.mubr.f32.gmra.mrb[38].mxu0 %v9361_v42  ;;  %6240 = vrot.lane.b32.xlu1 %v6239_v3, %s6273_s18  ;;  %v7524_v46 = vpop.permute.xlu0 %6035  ;;  %v6244_v4 = vpack.i.bf16 %v721_v52, %v719_v49  ;;  %v6249_v2 = vpack.i.bf16 %v725_v47, %v723_v51  ;;  %v9362_v42 = vld [vmem:[#allocation11_spill] sm:$0xff]  ;;  %v5963_v52 = vunpack.i.h.bf16 %v7220_v62  ;;  %v9432_v62 = vld [vmem:[#allocation34_spill] sm:$0xff]  ;;  %vm3382_vm0 = vcmask 392517  }
  0xe0   : > { %1709 = vmatprep.mubr.f32.mxu0 %v1316_v15  ;;  %6235 = vrot.lane.b32.xlu0 %v6234_v37, %s6272_s20  ;;  %v9363_v15 = vunpack.c.h.bf16 %v9276_v23  ;;  %v7534_v3 = vpop.permute.xlu1 %6040  ;;  %v9364_v37 = vunpack.c.h.bf16 %v9277_v58  ;;  %v1151_v23 = vsel %vm1063_vm1, %v1148_v41, %v1150_v43  ;;  %v5967_v58 = vunpack.i.l.bf16 %v7237_v22 }
  0xe1   : > { %v9366_v41 = vunpack.c.h.bf16 %v9280_v18  ;;  %v9367_v18 = vunpack.i.l.bf16 %v6934_v63 }
  0xe2   : > { %v1317_v33 = vsel %vm918_vm2, %v9363_v15, %v5958_v27  ;;  %v1318_v49 = vsel %vm918_vm2, %v9364_v37, %v5962_v44 }
  0xe3   : > { %1710 = vmatmul.mubr.f32.gmra.mrb[40].mxu0 %v9362_v42  ;;  %6250 = vrot.lane.b32.xlu1 %v6249_v2, %s6272_s20  ;;  %v7537_v48 = vpop.permute.xlu0 %6045  ;;  %v1319_v47 = vsel %vm918_vm2, %v9366_v41, %v5963_v52  ;;  %v5972_v2 = vunpack.i.l.bf16 %v7257_v39  ;;  %v5968_v42 = vunpack.i.h.bf16 %v7237_v22  ;;  %v919_v15 = vsel %vm918_vm2, %v9367_v18, %v5967_v58 }
  0xe4   : > { %1714 = vmatprep.mubr.f32.mxu0 %v1317_v33  ;;  %6245 = vrot.lane.b32.xlu0 %v6244_v4, %s6272_s20  ;;  %v7548_v51 = vpop.permute.xlu1 %6050  ;;  %v5977_v22 = vunpack.i.l.bf16 %v7287_v16  ;;  %v9370_v18 = vunpack.c.h.bf16 %v6851_v1 }
  0xe5   : > { %v1345_v37 = vsel %vm1344_vm4, %v919_v15, %v5972_v2 }
  0xe7   : > { %1715 = vmatmul.mubr.f32.gmra.mrb[42].mxu0 %v9281_v17  ;;  %6255 = vrot.lane.b32.xlu1 %v6254_v6, %s6272_s20  ;;  %v7551_v31 = vpop.permute.xlu0 %6055 }
  0xe8   : > { %1719 = vmatprep.mubr.f32.mxu0 %v1318_v49  ;;  %1244 = vrot.lane.b32.xlu0 %v1151_v23, %s6273_s18  ;;  %v7561_v17 = vpop.permute.xlu1 %6060 }
  0xeb   : > { %1720 = vmatmul.mubr.f32.gmra.mrb[44].mxu0 %v9365_v59  ;;  %v7564_v4 = vpop.permute.xlu0 %6065  ;;  %v5982_v59 = vunpack.i.l.bf16 %v7309_v61 }
  0xec   : > { %4878 = vmatprep.mubr.msk.f32.mxu0 %vm1063_vm1, %v1319_v47  ;;  %1246 = vrot.lane.b32.xlu0 %v1150_v43, %s6273_s18  ;;  %v7574_v33 = vpop.permute.xlu1 %6070  ;;  %v5973_v43 = vunpack.i.h.bf16 %v7257_v39  ;;  %v5978_v47 = vunpack.i.h.bf16 %v7287_v16  ;;  %v5983_v16 = vunpack.i.h.bf16 %v7309_v61 }
  0xef   : > { %4879 = vmatmul.mubr.msk.f32.gmra.mrb[46].mxu0 %vm1063_vm1, %v9283_v45  ;;  %v7577_v6 = vpop.permute.xlu0 %6075  ;;  %v9368_v45 = vunpack.i.h.bf16 %v6934_v63 }
  0xf0   : > { %4888 = vmatprep.mubr.msk.f32.mxu0 %vm1393_vm3, %v5972_v2  ;;  %v7585_v23 = vpop.permute.xlu1 %6080  ;;  %v9369_v2 = vunpack.i.l.bf16 %v6957_v12 }
  0xf1   : > { %v920_v49 = vsel %vm918_vm2, %v9368_v45, %v5968_v42 }
  0xf2   : > { %v1346_v41 = vsel %vm1344_vm4, %v920_v49, %v5973_v43  ;;  %v921_v63 = vsel %vm918_vm2, %v9369_v2, %v5977_v22  ;;  %v5987_v22 = vunpack.i.l.bf16 %v7326_v5  ;;  %v9371_v49 = vunpack.i.h.bf16 %v6957_v12 }
  0xf3   : > { %1915 = vmatmul.mubr.f32.vlgmr.msra.gmra.mrb[0].mxu0 %v1345_v37  ;;  %v7588_v58 = vpop.permute.xlu0 %6085  ;;  %v1347_v37 = vsel %vm1344_vm4, %v921_v63, %v5982_v59  ;;  %v9373_v63 = vld [vmem:[#allocation6_spill] sm:$0xff]  ;;  %v5988_v12 = vunpack.i.h.bf16 %v7326_v5 }
  0xf4   : > { %4889 = vmatprep.mubr.msk.f32.mxu0 %vm1393_vm3, %v5973_v43  ;;  %v6087_v39 = vunpack.i.l.bf16 %v7588_v58  ;;  %v7598_v42 = vpop.permute.xlu1 %6090  ;;  %v922_v1 = vsel %vm918_vm2, %v9371_v49, %v5978_v47  ;;  %v5993_v47 = vunpack.i.h.bf16 %v7350_v35  ;;  %v9375_v49 = vld [vmem:[#allocation7_spill] sm:$0xff] }
  0xf6   : > { %v1320_v15 = vsel %vm918_vm2, %v9370_v18, %v6087_v39  ;;  %v9374_v18 = vunpack.i.l.bf16 %v6989_v24 }
  0xf7   : > { %1920 = vmatmul.mubr.f32.gmra.mrb[2].mxu0 %v1346_v41  ;;  %v7605_v43 = vpop.permute.xlu0 %6095  ;;  %1729 = vmatprep.mubr.f32.mxu1 %v1320_v15  ;;  %v9372_v41 = vunpack.c.h.bf16 %v6854_v8 }
  0xf8   : > { %4890 = vmatprep.mubr.msk.f32.mxu0 %vm1393_vm3, %v5982_v59  ;;  %v6097_v45 = vunpack.i.l.bf16 %v7605_v43  ;;  %1730 = vmatmul.mubr.f32.vlgmr.msra.gmra.mrb[0].mxu1 %v6857_v14  ;;  %v5992_v59 = vunpack.i.l.bf16 %v7350_v35  ;;  %v1348_v14 = vsel %vm1344_vm4, %v922_v1, %v5983_v16  ;;  %v7623_v2 = vpop.permute.xlu1 %6100  ;;  %v923_v8 = vsel %vm918_vm2, %v9374_v18, %v5987_v22  ;;  %v9378_v18 = vld [vmem:[#allocation13_spill] sm:$0xff] }
  0xf9   : > { %v6102_v15 = vunpack.i.l.bf16 %v7623_v2  ;;  %v9376_v1 = vunpack.c.h.bf16 %v9375_v49  ;;  %v5997_v22 = vunpack.i.l.bf16 %v7371_v54  ;;  %v9379_v49 = vld [vmem:[#allocation12_spill] sm:$0xff] }
  0xfa   : > { %v1321_v61 = vsel %vm918_vm2, %v9372_v41, %v6097_v45  ;;  %v1349_v35 = vsel %vm1344_vm4, %v923_v8, %v5992_v59 }
  0xfb   : > { %1925 = vmatmul.mubr.f32.gmra.mrb[4].mxu0 %v1347_v37  ;;  %1734 = vmatprep.mubr.f32.mxu1 %v1321_v61  ;;  %v1399_v37 = vsel %vm1393_vm3, %v5993_v47, 0.0  ;;  %v1322_v5 = vsel %vm918_vm2, %v9376_v1, %v6102_v15  ;;  %v9377_v61 = vunpack.i.h.bf16 %v6989_v24  ;;  %v6002_v1 = vunpack.i.l.bf16 %v7398_v9 }
  0xfc   : > { %4891 = vmatprep.mubr.msk.f32.mxu0 %vm1393_vm3, %v5983_v16  ;;  %1735 = vmatmul.mubr.f32.gmra.mrb[2].mxu1 %v9373_v63  ;;  %v7634_v16 = vpop.permute.xlu0 %6105  ;;  %v7642_v41 = vpop.permute.xlu1 %6110  ;;  %v5998_v24 = vunpack.i.h.bf16 %v7371_v54  ;;  %v9383_v54 = vld [vmem:[#allocation16_spill] sm:$0xff] }
  0xfd   : > { %1739 = vmatprep.mubr.f32.mxu1 %v1322_v5  ;;  %v6112_v63 = vunpack.i.l.bf16 %v7642_v41 }
  0xff   : > { %1930 = vmatmul.mubr.f32.gmra.mrb[6].mxu0 %v1348_v14  ;;  %v924_v14 = vsel %vm918_vm2, %v9377_v61, %v5988_v12  ;;  %v9381_v12 = vunpack.i.l.bf16 %v7041_v7  ;;  %v9382_v61 = vld [vmem:[#allocation15_spill] sm:$0xff] }
 0x100   : > { %4892 = vmatprep.mubr.msk.f32.mxu0 %vm1393_vm3, %v5992_v59  ;;  %1740 = vmatmul.mubr.f32.gmra.mrb[4].mxu1 %v9378_v18  ;;  %v9380_v59 = vunpack.c.h.bf16 %v9379_v49  ;;  %v1350_v5 = vsel %vm1344_vm4, %v924_v14, %v5993_v47  ;;  %v6003_v49 = vunpack.i.h.bf16 %v7398_v9  ;;  %v9384_v14 = vunpack.c.h.bf16 %v9383_v54 }
 0x102   : > { %v1323_v8 = vsel %vm918_vm2, %v9380_v59, %v6112_v63 }
 0x103   : > { %1935 = vmatmul.mubr.f32.gmra.mrb[8].mxu0 %v1349_v35  ;;  %1744 = vmatprep.mubr.f32.mxu1 %v1323_v8  ;;  %v925_v35 = vsel %vm918_vm2, %v9381_v12, %v5997_v22  ;;  %v6007_v22 = vunpack.i.l.bf16 %v7412_v53  ;;  %v9385_v8 = vunpack.i.h.bf16 %v7041_v7 }
 0x104   : > { %4893 = vmatprep.mubr.msk.f32.mxu0 %vm1063_vm1, %v1399_v37  ;;  %v7663_v37 = vpop.permute.xlu0 %6115  ;;  %1745 = vmatmul.mubr.f32.gmra.mrb[6].mxu1 %v9382_v61  ;;  %v1351_v47 = vsel %vm1344_vm4, %v925_v35, %v6002_v1  ;;  %v6012_v35 = vunpack.i.l.bf16 %v7434_v10 }
 0x105   : > { %v6117_v18 = vunpack.i.l.bf16 %v7663_v37 }
 0x107   : > { %4894 = vmatmul.mubr.msk.f32.gmra.mrb[10].mxu0 %vm1063_vm1, %v1350_v5  ;;  %v1324_v59 = vsel %vm918_vm2, %v9384_v14, %v6117_v18  ;;  %v926_v5 = vsel %vm918_vm2, %v9385_v8, %v5998_v24  ;;  %v6008_v24 = vunpack.i.h.bf16 %v7412_v53  ;;  %v9389_v14 = vunpack.i.l.bf16 %v7055_v25  ;;  %v7695_v8 = vpop.permute.xlu1 %6120 }
 0x108   : > { %4895 = vmatprep.mubr.msk.f32.mxu0 %vm1393_vm3, %v6002_v1  ;;  %v7679_v12 = vpop.permute.xlu0 %6125  ;;  %1749 = vmatprep.mubr.f32.mxu1 %v1324_v59  ;;  %v9386_v1 = vld [vmem:[#allocation17_spill] sm:$0xff]  ;;  %v1352_v61 = vsel %vm1344_vm4, %v926_v5, %v6003_v49  ;;  %v6013_v5 = vunpack.i.h.bf16 %v7434_v10  ;;  %v6017_v53 = vunpack.i.l.bf16 %v7466_v26  ;;  %v9392_v10 = vld [vmem:[#allocation3_spill] sm:$0xff] }
 0x109   : > { %v9252_v9 = vunpack.i.l.bf16 %v7679_v12  ;;  %1750 = vmatmul.mubr.f32.gmra.mrb[8].mxu1 %v9386_v1  ;;  %v927_v59 = vsel %vm918_vm2, %v9389_v14, %v6007_v22 }
 0x10a   : > { %v1353_v1 = vsel %vm1344_vm4, %v927_v59, %v6012_v35 }
 0x10b   : > { %1945 = vmatmul.mubr.f32.gmra.mrb[12].mxu0 %v1351_v47  ;;  %v9387_v47 = vld [vmem:[#allocation18_spill] sm:$0xff] }
 0x10c   : > { %4896 = vmatprep.mubr.msk.f32.mxu0 %vm1393_vm3, %v6003_v49  ;;  %v9388_v54 = vunpack.c.h.bf16 %v9387_v47  ;;  %v9390_v49 = vld [vmem:[#allocation19_spill] sm:$0xff] }
 0x10e   : > { %v1325_v7 = vsel %vm918_vm2, %v9388_v54, %v9252_v9 }
 0x10f   : > { %1950 = vmatmul.mubr.f32.gmra.mrb[14].mxu0 %v1352_v61  ;;  %4880 = vmatprep.mubr.msk.f32.mxu1 %vm1063_vm1, %v1325_v7  ;;  %v9391_v61 = vunpack.i.h.bf16 %v7055_v25  ;;  %v6022_v7 = vunpack.i.l.bf16 %v7490_v50  ;;  %v6018_v25 = vunpack.i.h.bf16 %v7466_v26 }
 0x110   : > { %4897 = vmatprep.mubr.msk.f32.mxu0 %vm1393_vm3, %v6012_v35  ;;  %4881 = vmatmul.mubr.msk.f32.gmra.mrb[10].mxu1 %vm1063_vm1, %v9390_v49  ;;  %v9393_v35 = vunpack.c.h.bf16 %v9392_v10  ;;  %v9394_v49 = vunpack.i.l.bf16 %v7081_v21  ;;  %v9395_v10 = vld [vmem:[#allocation21_spill] sm:$0xff] }
 0x111   : > { %v928_v22 = vsel %vm918_vm2, %v9391_v61, %v6008_v24  ;;  %v7707_v47 = vpop.permute.xlu1 %6130  ;;  %v6023_v24 = vunpack.i.h.bf16 %v7490_v50 }
 0x112   : > { %v9251_v54 = vunpack.i.l.bf16 %v7707_v47  ;;  %v1354_v14 = vsel %vm1344_vm4, %v928_v22, %v6013_v5 }
 0x113   : > { %1955 = vmatmul.mubr.f32.gmra.mrb[16].mxu0 %v1353_v1  ;;  %v929_v1 = vsel %vm918_vm2, %v9394_v49, %v6017_v53  ;;  %v1405_v26 = vsel %vm1393_vm3, %v6023_v24, 0.0  ;;  %v9398_v49 = vunpack.i.h.bf16 %v7081_v21  ;;  %v9400_v21 = vunpack.i.l.bf16 %v7107_v19 }
 0x114   : > { %4898 = vmatprep.mubr.msk.f32.mxu0 %vm1393_vm3, %v6013_v5  ;;  %v1326_v59 = vsel %vm918_vm2, %v9393_v35, %v9251_v54  ;;  %v1355_v50 = vsel %vm1344_vm4, %v929_v1, %v6022_v7 }
 0x115   : > { %v7723_v61 = vpop.permute.xlu1 %6140  ;;  %1759 = vmatprep.mubr.f32.mxu1 %v1326_v59  ;;  %v6027_v59 = vunpack.i.l.bf16 %v7506_v0  ;;  %v930_v54 = vsel %vm918_vm2, %v9398_v49, %v6018_v25  ;;  %v6037_v49 = vunpack.i.l.bf16 %v7524_v46 }
 0x116   : > { %v6142_v5 = vunpack.i.l.bf16 %v7723_v61  ;;  %1760 = vmatmul.mubr.f32.gmra.mrb[12].mxu1 %v9395_v10  ;;  %v9399_v10 = vld [vmem:[#allocation22_spill] sm:$0xff]  ;;  %v1356_v1 = vsel %vm1344_vm4, %v930_v54, %v6023_v24  ;;  %v6033_v24 = vunpack.i.h.bf16 %v7518_v11 }
 0x117   : > { %1960 = vmatmul.mubr.f32.gmra.mrb[18].mxu0 %v1354_v14  ;;  %v7727_v22 = vpop.permute.xlu0 %6135  ;;  %v9396_v14 = vld [vmem:[#allocation20_spill] sm:$0xff]  ;;  %v931_v25 = vsel %vm918_vm2, %v9400_v21, %v6027_v59  ;;  %v9403_v59 = vunpack.i.h.bf16 %v7107_v19 }
 0x118   : > { %4899 = vmatprep.mubr.msk.f32.mxu0 %vm1393_vm3, %v6022_v7  ;;  %v9397_v35 = vunpack.c.h.bf16 %v9396_v14  ;;  %v6032_v7 = vunpack.i.l.bf16 %v7518_v11  ;;  %v6042_v11 = vunpack.i.l.bf16 %v7534_v3 }
 0x11a   : > { %v1327_v53 = vsel %vm918_vm2, %v9397_v35, %v6142_v5  ;;  %v6028_v35 = vunpack.i.h.bf16 %v7506_v0  ;;  %v1357_v0 = vsel %vm1344_vm4, %v931_v25, %v6032_v7  ;;  %v9404_v25 = vld [vmem:[#allocation4_spill] sm:$0xff] }
 0x11b   : > { %1965 = vmatmul.mubr.f32.gmra.mrb[20].mxu0 %v1355_v50  ;;  %1764 = vmatprep.mubr.f32.mxu1 %v1327_v53  ;;  %v9405_v19 = vunpack.c.h.bf16 %v9404_v25 }
 0x11c   : > { %4900 = vmatprep.mubr.msk.f32.mxu0 %vm1063_vm1, %v1405_v26  ;;  %1765 = vmatmul.mubr.f32.gmra.mrb[14].mxu1 %v9399_v10  ;;  %v7743_v9 = vpop.permute.xlu0 %6145  ;;  %v9401_v26 = vld [vmem:[#allocation23_spill] sm:$0xff]  ;;  %v932_v10 = vsel %vm918_vm2, %v9403_v59, %v6028_v35  ;;  %v9407_v59 = vld [vmem:[#allocation5_spill] sm:$0xff] }
 0x11d   : > { %v6147_v14 = vunpack.i.l.bf16 %v7743_v9  ;;  %v7753_v50 = vpop.permute.xlu1 %6150  ;;  %v9402_v53 = vunpack.c.h.bf16 %v9401_v26 }
 0x11f   : > { %4901 = vmatmul.mubr.msk.f32.gmra.mrb[22].mxu0 %vm1063_vm1, %v1356_v1  ;;  %v1328_v54 = vsel %vm918_vm2, %v9402_v53, %v6147_v14  ;;  %v6038_v53 = vunpack.i.h.bf16 %v7524_v46  ;;  %v6043_v46 = vunpack.i.h.bf16 %v7534_v3 }
 0x120   : > { %4902 = vmatprep.mubr.msk.f32.mxu0 %vm1393_vm3, %v6032_v7  ;;  %1769 = vmatprep.mubr.f32.mxu1 %v1328_v54  ;;  %v7768_v1 = vpop.permute.xlu0 %6155  ;;  %v1358_v7 = vsel %vm1344_vm4, %v932_v10, %v6033_v24  ;;  %v9406_v54 = vunpack.i.l.bf16 %v7127_v38 }
 0x121   : > { %1770 = vmatmul.mubr.f32.gmra.mrb[16].mxu1 %v7024_v57  ;;  %v6157_v21 = vunpack.i.l.bf16 %v7768_v1 }
 0x123   : > { %1975 = vmatmul.mubr.f32.gmra.mrb[24].mxu0 %v1357_v0  ;;  %v1329_v35 = vsel %vm918_vm2, %v9405_v19, %v6157_v21  ;;  %v933_v0 = vsel %vm918_vm2, %v9406_v54, %v6037_v49  ;;  %v9409_v54 = vunpack.i.h.bf16 %v7127_v38  ;;  %v6048_v38 = vunpack.i.h.bf16 %v7537_v48 }
 0x124   : > { %4903 = vmatprep.mubr.msk.f32.mxu0 %vm1393_vm3, %v6033_v24  ;;  %v7772_v26 = vpop.permute.xlu1 %6160  ;;  %1774 = vmatprep.mubr.f32.mxu1 %v1329_v35  ;;  %v9408_v24 = vunpack.c.h.bf16 %v7069_v55  ;;  %v7795_v19 = vpop.permute.xlu0 %6165  ;;  %v1359_v49 = vsel %vm1344_vm4, %v933_v0, %v6042_v11  ;;  %v6047_v35 = vunpack.i.l.bf16 %v7537_v48 }
 0x125   : > { %v6162_v57 = vunpack.i.l.bf16 %v7772_v26  ;;  %1775 = vmatmul.mubr.f32.gmra.mrb[18].mxu1 %v9407_v59  ;;  %v934_v55 = vsel %vm918_vm2, %v9409_v54, %v6038_v53  ;;  %v9410_v59 = vld [vmem:[#allocation24_spill] sm:$0xff]  ;;  %v6053_v53 = vunpack.i.h.bf16 %v7548_v51 }
 0x126   : > { %v1360_v0 = vsel %vm1344_vm4, %v934_v55, %v6043_v46 }
 0x127   : > { %1980 = vmatmul.mubr.f32.gmra.mrb[26].mxu0 %v1358_v7  ;;  %v1330_v10 = vsel %vm918_vm2, %v9408_v24, %v6162_v57  ;;  %v9411_v24 = vunpack.c.h.bf16 %v9410_v59  ;;  %v9413_v59 = vld [vmem:[#allocation25_spill] sm:$0xff] }
 0x128   : > { %4904 = vmatprep.mubr.msk.f32.mxu0 %vm1393_vm3, %v6042_v11  ;;  %v7793_v25 = vpop.permute.xlu1 %6170  ;;  %1779 = vmatprep.mubr.f32.mxu1 %v1330_v10  ;;  %v6052_v11 = vunpack.i.l.bf16 %v7548_v51  ;;  %v9412_v10 = vunpack.i.l.bf16 %v7144_v29  ;;  %v9414_v51 = vunpack.c.h.bf16 %v7168_v56 }
 0x129   : > { %v6172_v7 = vunpack.i.l.bf16 %v7793_v25  ;;  %1780 = vmatmul.mubr.f32.gmra.mrb[20].mxu1 %v7100_v32 }
 0x12a   : > { %v935_v32 = vsel %vm918_vm2, %v9412_v10, %v6047_v35  ;;  %v6057_v35 = vunpack.i.l.bf16 %v7551_v31 }
 0x12b   : > { %1985 = vmatmul.mubr.f32.gmra.mrb[28].mxu0 %v1359_v49  ;;  %v1331_v3 = vsel %vm918_vm2, %v9411_v24, %v6172_v7  ;;  %v1361_v48 = vsel %vm1344_vm4, %v935_v32, %v6052_v11  ;;  %v9415_v24 = vunpack.i.h.bf16 %v7144_v29  ;;  %v6062_v32 = vunpack.i.l.bf16 %v7561_v17 }
 0x12c   : > { %4905 = vmatprep.mubr.msk.f32.mxu0 %vm1393_vm3, %v6043_v46  ;;  %4882 = vmatprep.mubr.msk.f32.mxu1 %vm1063_vm1, %v1331_v3  ;;  %v1411_v46 = vsel %vm1393_vm3, %v6053_v53, 0.0  ;;  %v9417_v29 = vunpack.i.l.bf16 %v7170_v30 }
 0x12d   : > { %v7819_v49 = vpop.permute.xlu0 %6175  ;;  %4883 = vmatmul.mubr.msk.f32.gmra.mrb[22].mxu1 %vm1063_vm1, %v9413_v59  ;;  %v936_v3 = vsel %vm918_vm2, %v9415_v24, %v6048_v38 }
 0x12e   : > { %v6177_v54 = vunpack.i.l.bf16 %v7819_v49  ;;  %v1362_v59 = vsel %vm1344_vm4, %v936_v3, %v6053_v53  ;;  %v937_v38 = vsel %vm918_vm2, %v9417_v29, %v6057_v35  ;;  %v6067_v35 = vunpack.i.l.bf16 %v7564_v4  ;;  %v9421_v29 = vld [vmem:[#allocation28_spill] sm:$0xff] }
 0x12f   : > { %1990 = vmatmul.mubr.f32.gmra.mrb[30].mxu0 %v1360_v0  ;;  %v1363_v53 = vsel %vm1344_vm4, %v937_v38, %v6062_v32 }
 0x130   : > { %4906 = vmatprep.mubr.msk.f32.mxu0 %vm1393_vm3, %v6052_v11  ;;  %v1332_v55 = vsel %vm918_vm2, %v9414_v51, %v6177_v54  ;;  %v7836_v0 = vpop.permute.xlu1 %6180  ;;  %v9416_v11 = vld [vmem:[#allocation27_spill] sm:$0xff] }
 0x131   : > { %1789 = vmatprep.mubr.f32.mxu1 %v1332_v55  ;;  %v7839_v10 = vpop.permute.xlu0 %6185 }
 0x132   : > { %1790 = vmatmul.mubr.f32.gmra.mrb[24].mxu1 %v9416_v11  ;;  %v6187_v56 = vunpack.i.l.bf16 %v7839_v10  ;;  %v9420_v11 = vunpack.i.h.bf16 %v7170_v30  ;;  %v6068_v30 = vunpack.i.h.bf16 %v7564_v4 }
 0x133   : > { %1995 = vmatmul.mubr.f32.gmra.mrb[32].mxu0 %v1361_v48  ;;  %v6058_v48 = vunpack.i.h.bf16 %v7551_v31  ;;  %v6063_v31 = vunpack.i.h.bf16 %v7561_v17 }
 0x134   : > { %4907 = vmatprep.mubr.msk.f32.mxu0 %vm1063_vm1, %v1411_v46  ;;  %v9418_v46 = vld [vmem:[#allocation26_spill] sm:$0xff] }
 0x135   : > { %v9419_v51 = vunpack.c.h.bf16 %v9418_v46  ;;  %v9422_v46 = vunpack.c.h.bf16 %v9421_v29 }
 0x137   : > { %4908 = vmatmul.mubr.msk.f32.gmra.mrb[34].mxu0 %vm1063_vm1, %v1362_v59  ;;  %v1333_v55 = vsel %vm918_vm2, %v9419_v51, %v6187_v56  ;;  %v938_v59 = vsel %vm918_vm2, %v9420_v11, %v6058_v48  ;;  %v9423_v48 = vunpack.i.l.bf16 %v7189_v28  ;;  %v9424_v11 = vld [vmem:[#allocation29_spill] sm:$0xff] }
 0x138   : > { %4909 = vmatprep.mubr.msk.f32.mxu0 %vm1393_vm3, %v6062_v32  ;;  %1794 = vmatprep.mubr.f32.mxu1 %v1333_v55  ;;  %v7856_v24 = vpop.permute.xlu1 %6190  ;;  %v6072_v32 = vunpack.i.l.bf16 %v7574_v33  ;;  %v1364_v38 = vsel %vm1344_vm4, %v938_v59, %v6063_v31  ;;  %v9425_v29 = vunpack.c.h.bf16 %v9424_v11  ;;  %v6077_v59 = vunpack.i.l.bf16 %v7577_v6 }
 0x139   : > { %1795 = vmatmul.mubr.f32.gmra.mrb[26].mxu1 %v7201_v20  ;;  %v6192_v3 = vunpack.i.l.bf16 %v7856_v24  ;;  %v939_v55 = vsel %vm918_vm2, %v9423_v48, %v6067_v35  ;;  %v940_v35 = vsel %vm918_vm2, %v5958_v27, %v6068_v30  ;;  %v6078_v27 = vunpack.i.h.bf16 %v7577_v6 }
 0x13a   : > { %v1365_v4 = vsel %vm1344_vm4, %v939_v55, %v6072_v32  ;;  %v6083_v30 = vunpack.i.h.bf16 %v7585_v23  ;;  %v941_v55 = vsel %vm918_vm2, %v5962_v44, %v6077_v59  ;;  %v6088_v6 = vunpack.i.h.bf16 %v7588_v58  ;;  %v9429_v44 = vld [vmem:[#allocation32_spill] sm:$0xff] }
 0x13b   : > { %2005 = vmatmul.mubr.f32.gmra.mrb[36].mxu0 %v1363_v53  ;;  %v1334_v20 = vsel %vm918_vm2, %v9422_v46, %v6192_v3  ;;  %v9430_v59 = vunpack.c.h.bf16 %v9429_v44  ;;  %v6093_v58 = vunpack.i.h.bf16 %v7598_v42 }
 0x13c   : > { %4910 = vmatprep.mubr.msk.f32.mxu0 %vm1393_vm3, %v6063_v31  ;;  %v7872_v17 = vpop.permute.xlu1 %6200  ;;  %1799 = vmatprep.mubr.f32.mxu1 %v1334_v20 }
 0x13d   : > { %v6202_v51 = vunpack.i.l.bf16 %v7872_v17  ;;  %1800 = vmatmul.mubr.f32.gmra.mrb[28].mxu1 %v7232_v36  ;;  %v7882_v53 = vpop.permute.xlu0 %6195  ;;  %v6073_v36 = vunpack.i.h.bf16 %v7574_v33  ;;  %v6082_v33 = vunpack.i.l.bf16 %v7585_v23 }
 0x13f   : > { %2010 = vmatmul.mubr.f32.gmra.mrb[38].mxu0 %v1364_v38  ;;  %v1335_v31 = vsel %vm918_vm2, %v9425_v29, %v6202_v51  ;;  %v1367_v23 = vsel %vm1344_vm4, %v941_v55, %v6082_v33  ;;  %v943_v55 = vsel %vm918_vm2, %v6087_v39, %v6088_v6  ;;  %v9434_v6 = vld [vmem:[#allocation36_spill] sm:$0xff] }
 0x140   : > { %4911 = vmatprep.mubr.msk.f32.mxu0 %vm1393_vm3, %v6072_v32  ;;  %1804 = vmatprep.mubr.f32.mxu1 %v1335_v31  ;;  %v1366_v32 = vsel %vm1344_vm4, %v940_v35, %v6073_v36  ;;  %v9428_v31 = vld [vmem:[#allocation31_spill] sm:$0xff] }
 0x141   : > { %1805 = vmatmul.mubr.f32.gmra.mrb[30].mxu1 %v7294_v34  ;;  %v7897_v46 = vpop.permute.xlu0 %6205  ;;  %v9426_v34 = vld [vmem:[#allocation30_spill] sm:$0xff] }
 0x142   : > { %v6207_v20 = vunpack.i.l.bf16 %v7897_v46  ;;  %v9427_v48 = vunpack.c.h.bf16 %v9426_v34 }
 0x143   : > { %2015 = vmatmul.mubr.f32.gmra.mrb[40].mxu0 %v1365_v4  ;;  %v7901_v38 = vpop.permute.xlu1 %6210 }
 0x144   : > { %4912 = vmatprep.mubr.msk.f32.mxu0 %vm1393_vm3, %v6073_v36  ;;  %v1336_v28 = vsel %vm918_vm2, %v9427_v48, %v6207_v20  ;;  %v1417_v36 = vsel %vm1393_vm3, %v6083_v30, 0.0  ;;  %v9431_v48 = vld [vmem:[#allocation33_spill] sm:$0xff] }
 0x145   : > { %v7915_v11 = vpop.permute.xlu0 %6215  ;;  %1809 = vmatprep.mubr.f32.mxu1 %v1336_v28  ;;  %v6098_v28 = vunpack.i.h.bf16 %v7605_v43 }
 0x146   : > { %v6217_v29 = vunpack.i.l.bf16 %v7915_v11  ;;  %1810 = vmatmul.mubr.f32.gmra.mrb[32].mxu1 %v9428_v31 }
 0x147   : > { %2020 = vmatmul.mubr.f32.gmra.mrb[42].mxu0 %v1366_v32  ;;  %v942_v32 = vsel %vm918_vm2, %v5963_v52, %v6078_v27  ;;  %v9433_v52 = vunpack.c.h.bf16 %v9432_v62 }
 0x148   : > { %4913 = vmatprep.mubr.msk.f32.mxu0 %vm1393_vm3, %v6082_v33  ;;  %v7923_v4 = vpop.permute.xlu1 %6220  ;;  %v1337_v35 = vsel %vm918_vm2, %v9430_v59, %v6217_v29  ;;  %v6092_v33 = vunpack.i.l.bf16 %v7598_v42  ;;  %v1368_v31 = vsel %vm1344_vm4, %v942_v32, %v6083_v30  ;;  %v6103_v59 = vunpack.i.h.bf16 %v7623_v2 }
 0x149   : > { %v6222_v34 = vunpack.i.l.bf16 %v7923_v4  ;;  %4884 = vmatprep.mubr.msk.f32.mxu1 %vm1063_vm1, %v1337_v35  ;;  %v944_v30 = vsel %vm918_vm2, %v6097_v45, %v6098_v28  ;;  %v9435_v35 = vld [vmem:[#allocation35_spill] sm:$0xff]  ;;  %v9437_v28 = vld [vmem:[#allocation37_spill] sm:$0xff] }
 0x14a   : > { %4885 = vmatmul.mubr.msk.f32.gmra.mrb[34].mxu1 %vm1063_vm1, %v9431_v48  ;;  %v1369_v39 = vsel %vm1344_vm4, %v943_v55, %v6092_v33  ;;  %v9436_v32 = vunpack.c.h.bf16 %v9435_v35  ;;  %v1370_v43 = vsel %vm1344_vm4, %v944_v30, %v6093_v58  ;;  %v6113_v55 = vunpack.i.h.bf16 %v7642_v41 }
 0x14b   : > { %2025 = vmatmul.mubr.f32.gmra.mrb[44].mxu0 %v1367_v23  ;;  %v1338_v27 = vsel %vm918_vm2, %v9433_v52, %v6222_v34  ;;  %v945_v52 = vsel %vm918_vm2, %v6102_v15, %v6103_v59  ;;  %v6108_v35 = vunpack.i.h.bf16 %v7634_v16  ;;  %v9440_v59 = vld [vmem:[#allocation39_spill] sm:$0xff] }
 0x14c   : > { %4914 = vmatprep.mubr.msk.f32.mxu0 %vm1063_vm1, %v1417_v36  ;;  %1819 = vmatprep.mubr.f32.mxu1 %v1338_v27  ;;  %v9438_v27 = vld [vmem:[#allocation38_spill] sm:$0xff] }
 0x14d   : > { %v7949_v36 = vpop.permute.xlu1 %6230 }
 0x14e   : > { %v6232_v23 = vunpack.i.l.bf16 %v7949_v36  ;;  %v7953_v44 = vpop.permute.xlu0 %6225  ;;  %1820 = vmatmul.mubr.f32.gmra.mrb[36].mxu1 %v9434_v6 }
 0x14f   : > { %4915 = vmatmul.mubr.msk.f32.gmra.mrb[46].mxu0 %vm1063_vm1, %v1368_v31  ;;  %v9439_v31 = vunpack.c.h.bf16 %v9438_v27 }
 0x150   : > { %4916 = vmatprep.mubr.msk.f32.mxu0 %vm1393_vm3, %v6092_v33  ;;  %v1339_v48 = vsel %vm918_vm2, %v9436_v32, %v6232_v23  ;;  %v6107_v33 = vunpack.i.l.bf16 %v7634_v16  ;;  %v6118_v32 = vunpack.i.h.bf16 %v7663_v37  ;;  %v9447_v37 = vunpack.i.l.bf16 %v7679_v12 }
 0x151   : > { %1824 = vmatprep.mubr.f32.mxu1 %v1339_v48  ;;  %v7968_v42 = vpop.permute.xlu1 %6240  ;;  %v946_v48 = vsel %vm918_vm2, %v6112_v63, %v6113_v55  ;;  %v6122_v63 = vunpack.i.l.bf16 %v7695_v8 }
 0x152   : > { %v7970_v62 = vpop.permute.xlu0 %6235  ;;  %1825 = vmatmul.mubr.f32.gmra.mrb[38].mxu1 %v9437_v28  ;;  %v1371_v2 = vsel %vm1344_vm4, %v945_v52, %v6107_v33  ;;  %v1372_v55 = vsel %vm1344_vm4, %v946_v48, %v6108_v35  ;;  %v9446_v48 = vld [vmem:[#allocation42_spill] sm:$0xff] }
 0x153   : > { %2035 = vmatmul.mubr.f32.gmra.mrb[48].mxu0 %v1369_v39  ;;  %v6237_v45 = vunpack.i.l.bf16 %v7970_v62 }
 0x154   : > { %4917 = vmatprep.mubr.msk.f32.mxu0 %vm1393_vm3, %v6093_v58 }
 0x155   : > { %v1340_v39 = vsel %vm918_vm2, %v9439_v31, %v6237_v45  ;;  %v7986_v6 = vpop.permute.xlu1 %6250 }
 0x156   : > { %v7988_v58 = vpop.permute.xlu0 %6245  ;;  %1829 = vmatprep.mubr.f32.mxu1 %v1340_v39  ;;  %v6252_v30 = vunpack.i.l.bf16 %v7986_v6  ;;  %v9445_v39 = vld [vmem:[#allocation8_spill] sm:$0xff] }
 0x157   : > { %2040 = vmatmul.mubr.f32.gmra.mrb[50].mxu0 %v1370_v43  ;;  %v6247_v15 = vunpack.i.l.bf16 %v7988_v58  ;;  %1830 = vmatmul.mubr.f32.gmra.mrb[40].mxu1 %v9440_v59  ;;  %v9441_v43 = vld [vmem:[#allocation40_spill] sm:$0xff]  ;;  %v6123_v59 = vunpack.i.h.bf16 %v7695_v8 }
 0x158   : > { %4918 = vmatprep.mubr.msk.f32.mxu0 %vm1393_vm3, %v6107_v33  ;;  %v9442_v28 = vunpack.c.h.bf16 %v9441_v43  ;;  %v9443_v33 = vld [vmem:[#allocation41_spill] sm:$0xff]  ;;  %v6128_v43 = vunpack.i.h.bf16 %v7679_v12  ;;  %v6143_v12 = vunpack.i.h.bf16 %v7723_v61 }
 0x159   : > { %v8005_v27 = vpop.permute.xlu1 %6255  ;;  %v9444_v52 = vunpack.c.h.bf16 %v9443_v33  ;;  %v1423_v8 = vsel %vm1393_vm3, %v6123_v59, 0.0  ;;  %v9448_v33 = vunpack.i.l.bf16 %v7707_v47 }
 0x15a   : > { %v1341_v16 = vsel %vm918_vm2, %v9442_v28, %v6247_v15  ;;  %v6257_v41 = vunpack.i.l.bf16 %v8005_v27  ;;  %v947_v28 = vsel %vm918_vm2, %v6117_v18, %v6118_v32  ;;  %v948_v18 = vsel %vm918_vm2, %v9447_v37, %v6128_v43 }
 0x15b   : > { %v1342_v31 = vsel %vm918_vm2, %v9444_v52, %v6252_v30  ;;  %2045 = vmatmul.mubr.f32.gmra.mrb[52].mxu0 %v1371_v2  ;;  %1834 = vmatprep.mubr.f32.mxu1 %v1341_v16  ;;  %v6133_v32 = vunpack.i.h.bf16 %v7707_v47  ;;  %v6137_v16 = vunpack.i.l.bf16 %v7727_v22  ;;  %v6152_v47 = vunpack.i.l.bf16 %v7753_v50 }
 0x15c   : > { %4919 = vmatprep.mubr.msk.f32.mxu0 %vm1393_vm3, %v6108_v35  ;;  %1835 = vmatmul.mubr.f32.gmra.mrb[42].mxu1 %v9445_v39  ;;  %v1343_v2 = vsel %vm918_vm2, %v452_v40, %v6257_v41  ;;  %v1373_v35 = vsel %vm1344_vm4, %v947_v28, %v6122_v63  ;;  %v1374_v40 = vsel %vm1344_vm4, %v948_v18, %v6123_v59  ;;  %v6158_v59 = vunpack.i.h.bf16 %v7768_v1 }
 0x15d   : > { %1839 = vmatprep.mubr.f32.mxu1 %v1342_v31  ;;  %v949_v52 = vsel %vm918_vm2, %v9448_v33, %v6133_v32  ;;  %v6138_v31 = vunpack.i.h.bf16 %v7727_v22  ;;  %v6153_v43 = vunpack.i.h.bf16 %v7753_v50  ;;  %v6168_v50 = vunpack.i.h.bf16 %v7795_v19 }
 0x15e   : > { %v952_v28 = vsel %vm918_vm2, %v6157_v21, %v6158_v59  ;;  %v6178_v21 = vunpack.i.h.bf16 %v7819_v49  ;;  %v6183_v18 = vunpack.i.h.bf16 %v7836_v0  ;;  %v6212_v33 = vunpack.i.l.bf16 %v7901_v38 }
 0x15f   : > { %2050 = vmatmul.mubr.f32.gmra.mrb[54].mxu0 %v1372_v55  ;;  %v6148_v55 = vunpack.i.h.bf16 %v7743_v9  ;;  %v1378_v9 = vsel %vm1344_vm4, %v952_v28, %v6153_v43  ;;  %v6243_v59 = vunpack.i.h.bf16 %v7968_v42 }
 0x160   : > { %4920 = vmatprep.mubr.msk.f32.mxu0 %vm1393_vm3, %v6122_v63  ;;  %1840 = vmatmul.mubr.f32.gmra.mrb[44].mxu1 %v9446_v48  ;;  %v1375_v63 = vsel %vm1344_vm4, %v949_v52, %v6137_v16  ;;  %v1429_v48 = vsel %vm1393_vm3, %v6168_v50, 0.0  ;;  %v955_v37 = vsel %vm918_vm2, %v6177_v54, %v6178_v21  ;;  %v6203_v54 = vunpack.i.h.bf16 %v7872_v17 }
 0x161   : > { %4886 = vmatprep.mubr.msk.f32.mxu1 %vm1063_vm1, %v1343_v2  ;;  %v951_v22 = vsel %vm918_vm2, %v6147_v14, %v6148_v55  ;;  %v6167_v2 = vunpack.i.l.bf16 %v7795_v19  ;;  %v6173_v14 = vunpack.i.h.bf16 %v7793_v25  ;;  %v6182_v19 = vunpack.i.l.bf16 %v7836_v0 }
 0x162   : > { %v1377_v61 = vsel %vm1344_vm4, %v951_v22, %v6152_v47  ;;  %v6253_v22 = vunpack.i.h.bf16 %v7986_v6  ;;  %v8180_v6 = vld [vmem:[%s9133_s2] ss:$0 sm:$0xff] }
 0x163   : > { %2055 = vmatmul.mubr.f32.gmra.mrb[56].mxu0 %v1373_v35  ;;  %v1381_v25 = vsel %vm1344_vm4, %v955_v37, %v6182_v19 }
 0x164   : > { %4921 = vmatprep.mubr.msk.f32.mxu0 %vm1063_vm1, %v1423_v8  ;;  %4887 = vmatmul.mubr.msk.f32.gmra.mrb[46].mxu1 %vm1063_vm1, %v7488_v60  ;;  %v950_v60 = vsel %vm918_vm2, %v6142_v5, %v6143_v12  ;;  %v6163_v5 = vunpack.i.h.bf16 %v7772_v26  ;;  %v954_v8 = vsel %vm918_vm2, %v6172_v7, %v6173_v14  ;;  %v6193_v7 = vunpack.i.h.bf16 %v7856_v24 }
 0x165   : > { %5194 = vmatprep.mubr.msk.f32.mxu1 %vm2209_vm5, %v8039_v13  ;;  %v1376_v39 = vsel %vm1344_vm4, %v950_v60, %v6138_v31  ;;  %v1380_v26 = vsel %vm1344_vm4, %v954_v8, %v6168_v50  ;;  %v958_v12 = vsel %vm918_vm2, %v6202_v51, %v6203_v54  ;;  %v6223_v51 = vunpack.i.h.bf16 %v7923_v4 }
 0x166   : > { %v953_v35 = vsel %vm918_vm2, %v6162_v57, %v6163_v5  ;;  %v6188_v57 = vunpack.i.h.bf16 %v7839_v10  ;;  %v957_v0 = vsel %vm918_vm2, %v6192_v3, %v6193_v7  ;;  %v6213_v3 = vunpack.i.h.bf16 %v7901_v38 }
 0x167   : > { %4922 = vmatmul.mubr.msk.f32.gmra.mrb[58].mxu0 %vm1063_vm1, %v1374_v40  ;;  %v1379_v1 = vsel %vm1344_vm4, %v953_v35, %v6167_v2  ;;  %v6197_v40 = vunpack.i.l.bf16 %v7882_v53  ;;  %v6227_v38 = vunpack.i.l.bf16 %v7953_v44  ;;  %v961_v55 = vsel %vm918_vm2, %v6222_v34, %v6223_v51 }
 0x168   : > { %4923 = vmatprep.mubr.msk.f32.mxu0 %vm1393_vm3, %v6137_v16  ;;  %v956_v32 = vsel %vm918_vm2, %v6187_v56, %v6188_v57  ;;  %v6198_v16 = vunpack.i.h.bf16 %v7882_v53  ;;  %v6208_v56 = vunpack.i.h.bf16 %v7897_v46  ;;  %v6218_v53 = vunpack.i.h.bf16 %v7915_v11 }
 0x169   : > { %v1382_v49 = vsel %vm1344_vm4, %v956_v32, %v6183_v18  ;;  %v1383_v10 = vsel %vm1344_vm4, %v957_v0, %v6197_v40  ;;  %v6228_v60 = vunpack.i.h.bf16 %v7953_v44  ;;  %v1387_v11 = vsel %vm1344_vm4, %v961_v55, %v6227_v38 }
 0x16a   : > { %v1384_v24 = vsel %vm1344_vm4, %v958_v12, %v6198_v16  ;;  %v959_v52 = vsel %vm918_vm2, %v6207_v20, %v6208_v56  ;;  %v6233_v20 = vunpack.i.h.bf16 %v7949_v36  ;;  %v6248_v34 = vunpack.i.h.bf16 %v7988_v58 }
 0x16b   : > { %2065 = vmatmul.mubr.f32.gmra.mrb[60].mxu0 %v1375_v63  ;;  %v1385_v17 = vsel %vm1344_vm4, %v959_v52, %v6212_v33  ;;  %v960_v63 = vsel %vm918_vm2, %v6217_v29, %v6218_v53  ;;  %v6238_v29 = vunpack.i.h.bf16 %v7970_v62 }
 0x16c   : > { %4924 = vmatprep.mubr.msk.f32.mxu0 %vm1393_vm3, %v6138_v31  ;;  %v1435_v31 = vsel %vm1393_vm3, %v6213_v3, 0.0  ;;  %v1386_v46 = vsel %vm1344_vm4, %v960_v63, %v6213_v3 }
 0x16d   : > { %v963_v44 = vsel %vm918_vm2, %v6237_v45, %v6238_v29  ;;  %v6258_v45 = vunpack.i.h.bf16 %v8005_v27 }
 0x16f   : > { %2070 = vmatmul.mubr.f32.gmra.mrb[62].mxu0 %v1376_v39  ;;  %v6242_v39 = vunpack.i.l.bf16 %v7968_v42  ;;  %v965_v42 = vsel %vm918_vm2, %v6252_v30, %v6253_v22 }
 0x170   : > { %4925 = vmatprep.mubr.msk.f32.mxu0 %vm1393_vm3, %v6152_v47  ;;  %v962_v47 = vsel %vm918_vm2, %v6232_v23, %v6233_v20  ;;  %v1245_v23 = vpop.permute.xlu0 %1244 }
 0x171   : > { %v1388_v4 = vsel %vm1344_vm4, %v962_v47, %v6228_v60  ;;  %v1389_v36 = vsel %vm1344_vm4, %v963_v44, %v6242_v39  ;;  %v1391_v5 = vsel %vm1344_vm4, %v965_v42, %v1245_v23  ;;  %v8208_v47 = vld [vmem:[%s9138_s7 + $0x10] sm:$0xff]  ;;  %v8234_v42 = vld [vmem:[%s9138_s7 + $0x28] sm:$0xff] }
 0x173   : > { %2075 = vmatmul.mubr.f32.gmra.mrb[64].mxu0 %v1377_v61 }
 0x174   : > { %4926 = vmatprep.mubr.msk.f32.mxu0 %vm1393_vm3, %v6153_v43  ;;  %v964_v43 = vsel %vm918_vm2, %v6247_v15, %v6248_v34  ;;  %v1247_v61 = vpop.permute.xlu0 %1246  ;;  %v966_v15 = vsel %vm918_vm2, %v6257_v41, %v6258_v45  ;;  %vm3448_vm2 = vcmask 458113  }
 0x175   : > { %v1390_v62 = vsel %vm1344_vm4, %v964_v43, %v6243_v59  ;;  %v1441_v58 = vsel %vm1393_vm3, %v1247_v61, 0.0  ;;  %v1392_v28 = vsel %vm1344_vm4, %v966_v15, %v1247_v61  ;;  %v8224_v43 = vld [vmem:[%s9138_s7 + $0x20] sm:$0xff]  ;;  %vm3514_vm4 = vcmask 523717  }
 0x177   : > { %2080 = vmatmul.mubr.f32.gmra.mrb[66].mxu0 %v1378_v9 }
 0x178   : > { %4927 = vmatprep.mubr.msk.f32.mxu0 %vm1393_vm3, %v6167_v2 }
 0x17b   : > { %2085 = vmatmul.mubr.f32.gmra.mrb[68].mxu0 %v1379_v1 }
 0x17c   : > { %4928 = vmatprep.mubr.msk.f32.mxu0 %vm1063_vm1, %v1429_v48 }
 0x17f   : > { %4929 = vmatmul.mubr.msk.f32.gmra.mrb[70].mxu0 %vm1063_vm1, %v1380_v26 }
 0x180   : > { %4930 = vmatprep.mubr.msk.f32.mxu0 %vm1393_vm3, %v6182_v19 }
 0x183   : > { %2095 = vmatmul.mubr.f32.gmra.mrb[72].mxu0 %v1381_v25 }
 0x184   : > { %4931 = vmatprep.mubr.msk.f32.mxu0 %vm1393_vm3, %v6183_v18 }
 0x187   : > { %2100 = vmatmul.mubr.f32.gmra.mrb[74].mxu0 %v1382_v49 }
 0x188   : > { %4932 = vmatprep.mubr.msk.f32.mxu0 %vm1393_vm3, %v6197_v40 }
 0x18b   : > { %2105 = vmatmul.mubr.f32.gmra.mrb[76].mxu0 %v1383_v10 }
 0x18c   : > { %4933 = vmatprep.mubr.msk.f32.mxu0 %vm1393_vm3, %v6198_v16 }
 0x18f   : > { %2110 = vmatmul.mubr.f32.gmra.mrb[78].mxu0 %v1384_v24 }
 0x190   : > { %4934 = vmatprep.mubr.msk.f32.mxu0 %vm1393_vm3, %v6212_v33 }
 0x193   : > { %2115 = vmatmul.mubr.f32.gmra.mrb[80].mxu0 %v1385_v17 }
 0x194   : > { %4935 = vmatprep.mubr.msk.f32.mxu0 %vm1063_vm1, %v1435_v31 }
 0x197   : > { %4936 = vmatmul.mubr.msk.f32.gmra.mrb[82].mxu0 %vm1063_vm1, %v1386_v46 }
 0x198   : > { %4937 = vmatprep.mubr.msk.f32.mxu0 %vm1393_vm3, %v6227_v38 }
 0x19b   : > { %2125 = vmatmul.mubr.f32.gmra.mrb[84].mxu0 %v1387_v11 }
 0x19c   : > { %4938 = vmatprep.mubr.msk.f32.mxu0 %vm1393_vm3, %v6228_v60  ;;  %v8202_v60 = vld [vmem:[%s9138_s7 + $0x8] sm:$0xff] }
 0x19f   : > { %2130 = vmatmul.mubr.f32.gmra.mrb[86].mxu0 %v1388_v4 }
 0x1a0   : > { %4939 = vmatprep.mubr.msk.f32.mxu0 %vm1393_vm3, %v6242_v39 }
 0x1a3   : > { %2135 = vmatmul.mubr.f32.gmra.mrb[88].mxu0 %v1389_v36  ;;  %v8219_v36 = vld [vmem:[%s9138_s7 + $0x18] sm:$0xff] }
 0x1a4   : > { %4940 = vmatprep.mubr.msk.f32.mxu0 %vm1393_vm3, %v6243_v59 }
 0x1a7   : > { %2140 = vmatmul.mubr.f32.gmra.mrb[90].mxu0 %v1390_v62 }
 0x1a8   : > { %4941 = vmatprep.mubr.msk.f32.mxu0 %vm1393_vm3, %v1245_v23  ;;  %vm3450_vm3 = vcmask 452992  }
 0x1ab   : > { %2145 = vmatmul.mubr.f32.gmra.mrb[92].mxu0 %v1391_v5 }
 0x1ac   : > { %4942 = vmatprep.mubr.msk.f32.mxu0 %vm1063_vm1, %v1441_v58 }
 0x1af   : > { %4943 = vmatmul.mubr.msk.f32.gmra.mrb[94].mxu0 %vm1063_vm1, %v1392_v28  ;;  %vm3384_vm1 = vcmask 391488  }
 0x1c6   : > { %v1916_v30 = vpop.f32.mrb[0].mxu0 }
 0x1c7   : > { %v1918_v2 = vpop.f32.mrb[1].mxu0  ;;  %v5762_v9 = vadd.f32 %v8180_v6, %v1916_v30 }
 0x1c9   : > { %v2155_v50 = vmax.f32 %v5762_v9, 0.0 }
 0x1ca   : > { %v1921_v14 = vpop.f32.mrb[2].mxu0 }
 0x1cb   : > { %v5763_v27 = vadd.f32 %v8180_v6, %v1921_v14  ;;  %v1923_v41 = vpop.f32.mrb[3].mxu0  ;;  %v8184_v1 = vpop.f32.mrb[0].mxu1 }
 0x1cc   : > { %v1733_v48 = vpop.f32.mrb[1].mxu1 }
 0x1cd   : > { %v2156_v35 = vmax.f32 %v5763_v27, 0.0 }
 0x1ce   : > { %v1926_v21 = vpop.f32.mrb[4].mxu0 }
 0x1cf   : > { %v5572_v8 = vpack.c.bf16 %v2156_v35, %v2155_v50  ;;  %v1928_v19 = vpop.f32.mrb[5].mxu0  ;;  %v5764_v26 = vadd.f32 %v8180_v6, %v1926_v21  ;;  %v8187_v57 = vpop.f32.mrb[2].mxu1 }
 0x1d0   : > { %v1738_v18 = vpop.f32.mrb[3].mxu1 }
 0x1d1   : > { %5573 = vmatprep.subr.bf16.mxu1 %v5572_v8  ;;  %v2157_v32 = vmax.f32 %v5764_v26, 0.0 }
 0x1d2   : > { %v1931_v37 = vpop.f32.mrb[6].mxu0  ;;  %5575 = vmatpush3.bf16.msra.mxu1 %v5572_v8 }
 0x1d3   : > { %v5765_v25 = vadd.f32 %v8180_v6, %v1931_v37  ;;  %v1933_v7 = vpop.f32.mrb[7].mxu0  ;;  %v8190_v54 = vpop.f32.mrb[4].mxu1 }
 0x1d4   : > { %v1743_v10 = vpop.f32.mrb[5].mxu1 }
 0x1d5   : > { %v2158_v40 = vmax.f32 %v5765_v25, 0.0 }
 0x1d6   : > { %v1936_v49 = vpop.f32.mrb[8].mxu0 }
 0x1d7   : > { %v5576_v0 = vpack.c.bf16 %v2158_v40, %v2157_v32  ;;  %v1938_v16 = vpop.f32.mrb[9].mxu0  ;;  %v5766_v56 = vadd.f32 %v8180_v6, %v1936_v49  ;;  %v8193_v33 = vpop.f32.mrb[6].mxu1 }
 0x1d8   : > { %v1748_v53 = vpop.f32.mrb[7].mxu1 }
 0x1d9   : > { %5577 = vmatprep.subr.bf16.mxu1 %v5576_v0  ;;  %v2159_v52 = vmax.f32 %v5766_v56, 0.0 }
 0x1da   : > { %v1941_v12 = vpop.f32.mrb[10].mxu0  ;;  %5579 = vmatpush3.bf16.msra.mxu1 %v5576_v0 }
 0x1db   : > { %v5767_v24 = vadd.f32 %v8180_v6, %v1941_v12  ;;  %v1943_v3 = vpop.f32.mrb[11].mxu0 }
 0x1dc   : > { %v8196_v38 = vpop.f32.mrb[8].mxu1 }
 0x1dd   : > { %v2160_v17 = vmax.f32 %v5767_v24, 0.0  ;;  %v1753_v46 = vpop.f32.mrb[9].mxu1 }
 0x1de   : > { %v1946_v51 = vpop.f32.mrb[12].mxu0 }
 0x1df   : > { %v5580_v31 = vpack.c.bf16 %v2160_v17, %v2159_v52  ;;  %v1948_v63 = vpop.f32.mrb[13].mxu0  ;;  %v5768_v20 = vadd.f32 %v8180_v6, %v1946_v51 }
 0x1e1   : > { %5581 = vmatprep.subr.bf16.mxu1 %v5580_v31  ;;  %v2161_v34 = vmax.f32 %v5768_v20, 0.0 }
 0x1e2   : > { %v1951_v55 = vpop.f32.mrb[14].mxu0  ;;  %5583 = vmatpush3.bf16.msra.mxu1 %v5580_v31 }
 0x1e3   : > { %v5769_v11 = vadd.f32 %v8180_v6, %v1951_v55  ;;  %v1953_v29 = vpop.f32.mrb[15].mxu0  ;;  %v8210_v39 = vpop.f32.mrb[10].mxu1 }
 0x1e4   : > { %v1758_v4 = vpop.f32.mrb[11].mxu1 }
 0x1e5   : > { %v2162_v44 = vmax.f32 %v5769_v11, 0.0  ;;  %5195 = vmatmul.mubr.msk.f32.vlgmr.msra.gmra.mrb[48].mxu1 %vm2209_vm5, %v8202_v60 }
 0x1e6   : > { %v1956_v59 = vpop.f32.mrb[16].mxu0  ;;  %5197 = vmatprep.mubr.msk.f32.mxu1 %vm2209_vm5, %v8208_v47 }
 0x1e7   : > { %v5584_v23 = vpack.c.bf16 %v2162_v44, %v2161_v34  ;;  %v1958_v22 = vpop.f32.mrb[17].mxu0  ;;  %v5770_v62 = vadd.f32 %v8180_v6, %v1956_v59 }
 0x1e9   : > { %5585 = vmatprep.subr.bf16.mxu1 %v5584_v23  ;;  %5198 = vmatmul.mubr.msk.f32.gmra.mrb[50].mxu1 %vm2209_vm5, %v8219_v36  ;;  %v8237_v58 = vpop.f32.mrb[12].mxu1  ;;  %v2163_v28 = vmax.f32 %v5770_v62, 0.0 }
 0x1ea   : > { %v1961_v45 = vpop.f32.mrb[18].mxu0  ;;  %5587 = vmatpush3.bf16.msra.mxu1 %v5584_v23  ;;  %5200 = vmatprep.mubr.msk.f32.mxu1 %vm2209_vm5, %v8224_v43  ;;  %v1763_v15 = vpop.f32.mrb[13].mxu1 }
 0x1eb   : > { %v5771_v61 = vadd.f32 %v8180_v6, %v1961_v45  ;;  %v1963_v5 = vpop.f32.mrb[19].mxu0 }
 0x1ed   : > { %v2164_v30 = vmax.f32 %v5771_v61, 0.0  ;;  %5201 = vmatmul.mubr.msk.f32.gmra.mrb[52].mxu1 %vm2209_vm5, %v8234_v42 }
 0x1ee   : > { %v1966_v2 = vpop.f32.mrb[20].mxu0  ;;  %5215 = vmatprep.mubr.msk.f32.mxu1 %vm2209_vm5, %v8039_v13 }
 0x1ef   : > { %v5588_v9 = vpack.c.bf16 %v2164_v30, %v2163_v28  ;;  %v1968_v14 = vpop.f32.mrb[21].mxu0  ;;  %v8243_v27 = vpop.f32.mrb[14].mxu1  ;;  %v5772_v50 = vadd.f32 %v8180_v6, %v1966_v2 }
 0x1f0   : > { %v1768_v41 = vpop.f32.mrb[15].mxu1 }
 0x1f1   : > { %5589 = vmatprep.subr.bf16.mxu1 %v5588_v9  ;;  %v2165_v8 = vmax.f32 %v5772_v50, 0.0 }
 0x1f2   : > { %v1971_v35 = vpop.f32.mrb[22].mxu0  ;;  %5591 = vmatpush3.bf16.msra.mxu1 %v5588_v9 }
 0x1f3   : > { %v5773_v21 = vadd.f32 %v8180_v6, %v1971_v35  ;;  %v1973_v48 = vpop.f32.mrb[23].mxu0 }
 0x1f4   : > { %v8247_v26 = vpop.f32.mrb[16].mxu1 }
 0x1f5   : > { %v2166_v19 = vmax.f32 %v5773_v21, 0.0  ;;  %v1773_v18 = vpop.f32.mrb[17].mxu1 }
 0x1f6   : > { %v1976_v37 = vpop.f32.mrb[24].mxu0 }
 0x1f7   : > { %v5592_v25 = vpack.c.bf16 %v2166_v19, %v2165_v8  ;;  %v1978_v7 = vpop.f32.mrb[25].mxu0  ;;  %v5774_v32 = vadd.f32 %v8180_v6, %v1976_v37 }
 0x1f8   : > { %v8251_v16 = vpop.f32.mrb[18].mxu1 }
 0x1f9   : > { %5593 = vmatprep.subr.bf16.mxu1 %v5592_v25  ;;  %v1778_v10 = vpop.f32.mrb[19].mxu1  ;;  %v2167_v56 = vmax.f32 %v5774_v32, 0.0 }
 0x1fa   : > { %v1981_v40 = vpop.f32.mrb[26].mxu0  ;;  %5595 = vmatpush3.bf16.msra.mxu1 %v5592_v25 }
 0x1fb   : > { %v5775_v49 = vadd.f32 %v8180_v6, %v1981_v40  ;;  %v1983_v0 = vpop.f32.mrb[27].mxu0 }
 0x1fc   : > { %v8257_v52 = vpop.f32.mrb[20].mxu1 }
 0x1fd   : > { %v2168_v12 = vmax.f32 %v5775_v49, 0.0  ;;  %5216 = vmatmul.mubr.msk.f32.vlgmr.msra.gmra.mrb[54].mxu1 %vm2209_vm5, %v8202_v60  ;;  %v1783_v17 = vpop.f32.mrb[21].mxu1 }
 0x1fe   : > { %v1986_v24 = vpop.f32.mrb[28].mxu0  ;;  %5218 = vmatprep.mubr.msk.f32.mxu1 %vm2209_vm5, %v8208_v47 }
 0x1ff   : > { %v5596_v3 = vpack.c.bf16 %v2168_v12, %v2167_v56  ;;  %v1988_v53 = vpop.f32.mrb[29].mxu0  ;;  %v5776_v51 = vadd.f32 %v8180_v6, %v1986_v24 }
 0x200   : > { %v8265_v20 = vpop.f32.mrb[22].mxu1 }
 0x201   : > { %5597 = vmatprep.subr.bf16.mxu1 %v5596_v3  ;;  %5219 = vmatmul.mubr.msk.f32.gmra.mrb[56].mxu1 %vm2209_vm5, %v8219_v36  ;;  %v1788_v55 = vpop.f32.mrb[23].mxu1  ;;  %v2169_v11 = vmax.f32 %v5776_v51, 0.0 }
 0x202   : > { %v1991_v31 = vpop.f32.mrb[30].mxu0  ;;  %5599 = vmatpush3.bf16.msra.mxu1 %v5596_v3  ;;  %5221 = vmatprep.mubr.msk.f32.mxu1 %vm2209_vm5, %v8224_v43 }
 0x203   : > { %v5777_v63 = vadd.f32 %v8180_v6, %v1991_v31  ;;  %v1993_v46 = vpop.f32.mrb[31].mxu0 }
 0x205   : > { %v2170_v29 = vmax.f32 %v5777_v63, 0.0  ;;  %5222 = vmatmul.mubr.msk.f32.gmra.mrb[58].mxu1 %vm2209_vm5, %v8234_v42  ;;  %v8271_v59 = vpop.f32.mrb[24].mxu1 }
 0x206   : > { %v1996_v4 = vpop.f32.mrb[32].mxu0  ;;  %5236 = vmatprep.mubr.msk.f32.mxu1 %vm2209_vm5, %v8039_v13  ;;  %v1793_v23 = vpop.f32.mrb[25].mxu1 }
 0x207   : > { %v5600_v34 = vpack.c.bf16 %v2170_v29, %v2169_v11  ;;  %v1998_v44 = vpop.f32.mrb[33].mxu0  ;;  %v5778_v22 = vadd.f32 %v8180_v6, %v1996_v4 }
 0x209   : > { %5601 = vmatprep.subr.bf16.mxu1 %v5600_v34  ;;  %v2171_v15 = vmax.f32 %v5778_v22, 0.0 }
 0x20a   : > { %v2001_v62 = vpop.f32.mrb[34].mxu0  ;;  %5603 = vmatpush3.bf16.msra.mxu1 %v5600_v34  ;;  %v1732_v34 = vadd.f32 %v8180_v6, %v8184_v1  ;;  %v1742_v1 = vadd.f32 %v8180_v6, %v8190_v54 }
 0x20b   : > { %v5779_v45 = vadd.f32 %v8180_v6, %v2001_v62  ;;  %v2003_v61 = vpop.f32.mrb[35].mxu0 }
 0x20c   : > { %v8275_v5 = vpop.f32.mrb[26].mxu1 }
 0x20d   : > { %v2172_v28 = vmax.f32 %v5779_v45, 0.0  ;;  %v1798_v30 = vpop.f32.mrb[27].mxu1 }
 0x20e   : > { %v2006_v2 = vpop.f32.mrb[36].mxu0 }
 0x20f   : > { %v5604_v9 = vpack.c.bf16 %v2172_v28, %v2171_v15  ;;  %v2008_v14 = vpop.f32.mrb[37].mxu0  ;;  %v5780_v41 = vadd.f32 %v8180_v6, %v2006_v2  ;;  %v1737_v15 = vadd.f32 %v8180_v6, %v8187_v57 }
 0x210   : > { %v8278_v50 = vpop.f32.mrb[28].mxu1 }
 0x211   : > { %5605 = vmatprep.subr.bf16.mxu1 %v5604_v9  ;;  %v1803_v21 = vpop.f32.mrb[29].mxu1  ;;  %v2173_v19 = vmax.f32 %v5780_v41, 0.0 }
 0x212   : > { %v2011_v35 = vpop.f32.mrb[38].mxu0  ;;  %5607 = vmatpush3.bf16.msra.mxu1 %v5604_v9 }
 0x213   : > { %v5781_v48 = vadd.f32 %v8180_v6, %v2011_v35  ;;  %v2013_v8 = vpop.f32.mrb[39].mxu0 }
 0x214   : > { %v8283_v18 = vpop.f32.mrb[30].mxu1 }
 0x215   : > { %v2174_v37 = vmax.f32 %v5781_v48, 0.0  ;;  %5237 = vmatmul.mubr.msk.f32.vlgmr.msra.gmra.mrb[60].mxu1 %vm2209_vm5, %v8202_v60  ;;  %v1808_v7 = vpop.f32.mrb[31].mxu1 }
 0x216   : > { %v2016_v25 = vpop.f32.mrb[40].mxu0  ;;  %5239 = vmatprep.mubr.msk.f32.mxu1 %vm2209_vm5, %v8208_v47 }
 0x217   : > { %v5608_v32 = vpack.c.bf16 %v2174_v37, %v2173_v19  ;;  %v2018_v40 = vpop.f32.mrb[41].mxu0  ;;  %v5782_v49 = vadd.f32 %v8180_v6, %v2016_v25  ;;  %v1747_v25 = vadd.f32 %v8180_v6, %v8193_v33 }
 0x219   : > { %5609 = vmatprep.subr.bf16.mxu1 %v5608_v32  ;;  %5240 = vmatmul.mubr.msk.f32.gmra.mrb[62].mxu1 %vm2209_vm5, %v8219_v36  ;;  %v8293_v12 = vpop.f32.mrb[32].mxu1  ;;  %v2175_v3 = vmax.f32 %v5782_v49, 0.0 }
 0x21a   : > { %v2021_v0 = vpop.f32.mrb[42].mxu0  ;;  %5611 = vmatpush3.bf16.msra.mxu1 %v5608_v32  ;;  %5242 = vmatprep.mubr.msk.f32.mxu1 %vm2209_vm5, %v8224_v43  ;;  %v1813_v24 = vpop.f32.mrb[33].mxu1 }
 0x21b   : > { %v5783_v10 = vadd.f32 %v8180_v6, %v2021_v0  ;;  %v2023_v56 = vpop.f32.mrb[43].mxu0 }
 0x21d   : > { %v2176_v53 = vmax.f32 %v5783_v10, 0.0  ;;  %5243 = vmatmul.mubr.msk.f32.gmra.mrb[64].mxu1 %vm2209_vm5, %v8234_v42  ;;  %v8299_v63 = vpop.f32.mrb[34].mxu1  ;;  %v1752_v10 = vadd.f32 %v8180_v6, %v8196_v38 }
 0x21e   : > { %v2026_v17 = vpop.f32.mrb[44].mxu0  ;;  %5257 = vmatprep.mubr.msk.f32.mxu1 %vm2209_vm5, %v8039_v13  ;;  %v1818_v46 = vpop.f32.mrb[35].mxu1 }
 0x21f   : > { %v5612_v51 = vpack.c.bf16 %v2176_v53, %v2175_v3  ;;  %v2028_v31 = vpop.f32.mrb[45].mxu0  ;;  %v5784_v55 = vadd.f32 %v8180_v6, %v2026_v17 }
 0x220   : > { %v1757_v31 = vadd.f32 %v8180_v6, %v8210_v39 }
 0x221   : > { %5613 = vmatprep.subr.bf16.mxu1 %v5612_v51  ;;  %v8305_v44 = vpop.f32.mrb[36].mxu1  ;;  %v2177_v22 = vmax.f32 %v5784_v55, 0.0 }
 0x222   : > { %v2031_v11 = vpop.f32.mrb[46].mxu0  ;;  %5615 = vmatpush3.bf16.msra.mxu1 %v5612_v51  ;;  %v1823_v23 = vpop.f32.mrb[37].mxu1 }
 0x223   : > { %v5785_v29 = vadd.f32 %v8180_v6, %v2031_v11  ;;  %v2033_v4 = vpop.f32.mrb[47].mxu0  ;;  %v1762_v23 = vadd.f32 %v8180_v6, %v8237_v58 }
 0x225   : > { %v2178_v62 = vmax.f32 %v5785_v29, 0.0  ;;  %v8309_v2 = vpop.f32.mrb[38].mxu1  ;;  %v6274_v29 = vmov 0.0  }
 0x226   : > { %v2036_v45 = vpop.f32.mrb[48].mxu0  ;;  %v1828_v9 = vpop.f32.mrb[39].mxu1  ;;  %2988 = vst [vmem:[#allocation2] sm:$0xff] %v6274_v29  ;;  %2989 = vst [vmem:[#allocation2 + $0x8] sm:$0xff] %v6274_v29 }
 0x227   : > { %v5616_v61 = vpack.c.bf16 %v2178_v62, %v2177_v22  ;;  %v2037_v28 = vadd.f32 %v2036_v45, %v1732_v34  ;;  %v2038_v30 = vpop.f32.mrb[49].mxu0  ;;  %2990 = vst [vmem:[#allocation2 + $0x10] sm:$0xff] %v6274_v29  ;;  %2991 = vst [vmem:[#allocation2 + $0x18] sm:$0xff] %v6274_v29 }
 0x228   : > { %2992 = vst [vmem:[#allocation2 + $0x20] sm:$0xff] %v6274_v29  ;;  %2993 = vst [vmem:[#allocation2 + $0x28] sm:$0xff] %v6274_v29 }
 0x229   : > { %5617 = vmatprep.subr.bf16.mxu1 %v5616_v61  ;;  %v2179_v41 = vmax.f32 %v2037_v28, 0.0  ;;  %2994 = vst [vmem:[#allocation2 + $0x30] sm:$0xff] %v6274_v29  ;;  %2995 = vst [vmem:[#allocation2 + $0x38] sm:$0xff] %v6274_v29 }
 0x22a   : > { %5619 = vmatpush3.bf16.msra.mxu1 %v5616_v61  ;;  %v2041_v14 = vpop.f32.mrb[50].mxu0  ;;  %v8313_v48 = vpop.f32.mrb[40].mxu1  ;;  %2996 = vst [vmem:[#allocation2 + $0x40] sm:$0xff] %v6274_v29  ;;  %2997 = vst [vmem:[#allocation2 + $0x48] sm:$0xff] %v6274_v29 }
 0x22b   : > { %v2042_v35 = vadd.f32 %v2041_v14, %v1737_v15  ;;  %v2043_v21 = vpop.f32.mrb[51].mxu0  ;;  %v1833_v8 = vpop.f32.mrb[41].mxu1  ;;  %2998 = vst [vmem:[#allocation2 + $0x50] sm:$0xff] %v6274_v29  ;;  %2999 = vst [vmem:[#allocation2 + $0x58] sm:$0xff] %v6274_v29  ;;  %v1767_v15 = vadd.f32 %v8180_v6, %v8243_v27 }
 0x22c   : > { %3000 = vst [vmem:[#allocation2 + $0x60] sm:$0xff] %v6274_v29  ;;  %3001 = vst [vmem:[#allocation2 + $0x68] sm:$0xff] %v6274_v29  ;;  %v1777_v8 = vadd.f32 %v8180_v6, %v8251_v16 }
 0x22d   : > { %5258 = vmatmul.mubr.msk.f32.vlgmr.msra.gmra.mrb[66].mxu1 %vm2209_vm5, %v8202_v60  ;;  %v2180_v57 = vmax.f32 %v2042_v35, 0.0  ;;  %3002 = vst [vmem:[#allocation2 + $0x70] sm:$0xff] %v6274_v29  ;;  %3003 = vst [vmem:[#allocation2 + $0x78] sm:$0xff] %v6274_v29 }
 0x22e   : > { %5260 = vmatprep.mubr.msk.f32.mxu1 %vm2209_vm5, %v8208_v47  ;;  %v2046_v19 = vpop.f32.mrb[52].mxu0 }
 0x22f   : > { %v5620_v37 = vpack.c.bf16 %v2180_v57, %v2179_v41  ;;  %v2047_v7 = vadd.f32 %v2046_v19, %v1742_v1  ;;  %v2048_v32 = vpop.f32.mrb[53].mxu0  ;;  %v8321_v54 = vpop.f32.mrb[42].mxu1  ;;  %v1772_v41 = vadd.f32 %v8180_v6, %v8247_v26 }
 0x230   : > { %v1838_v40 = vpop.f32.mrb[43].mxu1 }
 0x231   : > { %5261 = vmatmul.mubr.msk.f32.gmra.mrb[68].mxu1 %vm2209_vm5, %v8219_v36  ;;  %5621 = vmatprep.subr.bf16.mxu1 %v5620_v37  ;;  %v2181_v0 = vmax.f32 %v2047_v7, 0.0 }
 0x232   : > { %5263 = vmatprep.mubr.msk.f32.mxu1 %vm2209_vm5, %v8224_v43  ;;  %v2051_v49 = vpop.f32.mrb[54].mxu0  ;;  %5623 = vmatpush3.bf16.msra.mxu1 %v5620_v37 }
 0x233   : > { %v2052_v56 = vadd.f32 %v2051_v49, %v1747_v25  ;;  %v2053_v33 = vpop.f32.mrb[55].mxu0  ;;  %v8329_v24 = vpop.f32.mrb[44].mxu1  ;;  %v1782_v25 = vadd.f32 %v8180_v6, %v8257_v52 }
 0x234   : > { %v1843_v3 = vpop.f32.mrb[45].mxu1 }
 0x235   : > { %5264 = vmatmul.mubr.msk.f32.gmra.mrb[70].mxu1 %vm2209_vm5, %v8234_v42  ;;  %v2182_v53 = vmax.f32 %v2052_v56, 0.0 }
 0x236   : > { %v2056_v17 = vpop.f32.mrb[56].mxu0  ;;  %5278 = vmatprep.mubr.msk.f32.mxu1 %vm2209_vm5, %v8039_v13 }
 0x237   : > { %v5624_v51 = vpack.c.bf16 %v2182_v53, %v2181_v0  ;;  %v2057_v46 = vadd.f32 %v2056_v17, %v1752_v10  ;;  %v2058_v55 = vpop.f32.mrb[57].mxu0  ;;  %v8337_v38 = vpop.f32.mrb[46].mxu1  ;;  %v1787_v0 = vadd.f32 %v8180_v6, %v8265_v20  ;;  %v1792_v53 = vadd.f32 %v8180_v6, %v8271_v59 }
 0x238   : > { %v1848_v11 = vpop.f32.mrb[47].mxu1  ;;  %v1797_v55 = vadd.f32 %v8180_v6, %v8275_v5  ;;  %v1807_v5 = vadd.f32 %v8180_v6, %v8283_v18 }
 0x239   : > { %5625 = vmatprep.subr.bf16.mxu1 %v5624_v51  ;;  %v2183_v4 = vmax.f32 %v2057_v46, 0.0 }
 0x23a   : > { %v2061_v39 = vpop.f32.mrb[58].mxu0  ;;  %5627 = vmatpush3.bf16.msra.mxu1 %v5624_v51 }
 0x23b   : > { %v2062_v34 = vadd.f32 %v2061_v39, %v1757_v31  ;;  %v2063_v22 = vpop.f32.mrb[59].mxu0 }
 0x23d   : > { %v2184_v62 = vmax.f32 %v2062_v34, 0.0 }
 0x23e   : > { %v2066_v45 = vpop.f32.mrb[60].mxu0 }
 0x23f   : > { %v5628_v61 = vpack.c.bf16 %v2184_v62, %v2183_v4  ;;  %v2067_v28 = vadd.f32 %v2066_v45, %v1762_v23  ;;  %v2068_v30 = vpop.f32.mrb[61].mxu0  ;;  %v1802_v4 = vadd.f32 %v8180_v6, %v8278_v50 }
 0x241   : > { %5629 = vmatprep.subr.bf16.mxu1 %v5628_v61  ;;  %v2185_v14 = vmax.f32 %v2067_v28, 0.0  ;;  %v1812_v28 = vadd.f32 %v8180_v6, %v8293_v12  ;;  %v1822_v12 = vadd.f32 %v8180_v6, %v8305_v44 }
 0x242   : > { %5631 = vmatpush3.bf16.msra.mxu1 %v5628_v61  ;;  %v2071_v9 = vpop.f32.mrb[62].mxu0 }
 0x243   : > { %v2072_v1 = vadd.f32 %v2071_v9, %v1767_v15  ;;  %v2073_v35 = vpop.f32.mrb[63].mxu0 }
 0x245   : > { %5279 = vmatmul.mubr.msk.f32.vlgmr.msra.gmra.mrb[72].mxu1 %vm2209_vm5, %v8202_v60  ;;  %v2186_v58 = vmax.f32 %v2072_v1, 0.0  ;;  %v1817_v1 = vadd.f32 %v8180_v6, %v8299_v63 }
 0x246   : > { %5281 = vmatprep.mubr.msk.f32.mxu1 %vm2209_vm5, %v8208_v47  ;;  %v2076_v21 = vpop.f32.mrb[64].mxu0 }
 0x247   : > { %v5632_v27 = vpack.c.bf16 %v2186_v58, %v2185_v14  ;;  %v2077_v57 = vadd.f32 %v2076_v21, %v1772_v41  ;;  %v2078_v19 = vpop.f32.mrb[65].mxu0 }
 0x249   : > { %5282 = vmatmul.mubr.msk.f32.gmra.mrb[74].mxu1 %vm2209_vm5, %v8219_v36  ;;  %5633 = vmatprep.subr.bf16.mxu1 %v5632_v27  ;;  %v2187_v37 = vmax.f32 %v2077_v57, 0.0 }
 0x24a   : > { %5284 = vmatprep.mubr.msk.f32.mxu1 %vm2209_vm5, %v8224_v43  ;;  %v2081_v26 = vpop.f32.mrb[66].mxu0  ;;  %5635 = vmatpush3.bf16.msra.mxu1 %v5632_v27 }
 0x24b   : > { %v2082_v7 = vadd.f32 %v2081_v26, %v1777_v8  ;;  %v2083_v32 = vpop.f32.mrb[67].mxu0 }
 0x24d   : > { %5285 = vmatmul.mubr.msk.f32.gmra.mrb[76].mxu1 %vm2209_vm5, %v8234_v42  ;;  %v2188_v16 = vmax.f32 %v2082_v7, 0.0 }
 0x24e   : > { %v2086_v40 = vpop.f32.mrb[68].mxu0  ;;  %5299 = vmatprep.mubr.msk.f32.mxu1 %vm2209_vm5, %v8039_v13 }
 0x24f   : > { %v5636_v49 = vpack.c.bf16 %v2188_v16, %v2187_v37  ;;  %v2087_v10 = vadd.f32 %v2086_v40, %v1782_v25  ;;  %v2088_v56 = vpop.f32.mrb[69].mxu0  ;;  %v1827_v25 = vadd.f32 %v8180_v6, %v8309_v2  ;;  %v1832_v40 = vadd.f32 %v8180_v6, %v8313_v48 }
 0x250   : > { %v1837_v56 = vadd.f32 %v8180_v6, %v8321_v54 }
 0x251   : > { %5637 = vmatprep.subr.bf16.mxu1 %v5636_v49  ;;  %v2189_v52 = vmax.f32 %v2087_v10, 0.0 }
 0x252   : > { %v2091_v33 = vpop.f32.mrb[70].mxu0  ;;  %5639 = vmatpush3.bf16.msra.mxu1 %v5636_v49 }
 0x253   : > { %v2092_v3 = vadd.f32 %v2091_v33, %v1787_v0  ;;  %v2093_v17 = vpop.f32.mrb[71].mxu0 }
 0x255   : > { %v2190_v51 = vmax.f32 %v2092_v3, 0.0 }
 0x256   : > { %v2096_v31 = vpop.f32.mrb[72].mxu0 }
 0x257   : > { %v5640_v46 = vpack.c.bf16 %v2190_v51, %v2189_v52  ;;  %v2097_v11 = vadd.f32 %v2096_v31, %v1792_v53  ;;  %v2098_v39 = vpop.f32.mrb[73].mxu0  ;;  %v1842_v53 = vadd.f32 %v8180_v6, %v8329_v24 }
 0x259   : > { %5641 = vmatprep.subr.bf16.mxu1 %v5640_v46  ;;  %v2191_v34 = vmax.f32 %v2097_v11, 0.0 }
 0x25a   : > { %5643 = vmatpush3.bf16.msra.mxu1 %v5640_v46  ;;  %v2101_v20 = vpop.f32.mrb[74].mxu0 }
 0x25b   : > { %v2102_v23 = vadd.f32 %v2101_v20, %v1797_v55  ;;  %v2103_v22 = vpop.f32.mrb[75].mxu0  ;;  %v1847_v55 = vadd.f32 %v8180_v6, %v8337_v38  ;;  %v3681_v6 = vld [vmem:[%s9134_s3 + $0x8] sm:$0xff] }
 0x25d   : > { %5300 = vmatmul.mubr.msk.f32.vlgmr.msra.gmra.mrb[78].mxu1 %vm2209_vm5, %v8202_v60  ;;  %v2192_v59 = vmax.f32 %v2102_v23, 0.0 }
 0x25e   : > { %5302 = vmatprep.mubr.msk.f32.mxu1 %vm2209_vm5, %v8208_v47  ;;  %v2106_v62 = vpop.f32.mrb[76].mxu0 }
 0x25f   : > { %v5644_v45 = vpack.c.bf16 %v2192_v59, %v2191_v34  ;;  %v2107_v61 = vadd.f32 %v2106_v62, %v1802_v4  ;;  %v2108_v15 = vpop.f32.mrb[77].mxu0 }
 0x261   : > { %5303 = vmatmul.mubr.msk.f32.gmra.mrb[80].mxu1 %vm2209_vm5, %v8219_v36  ;;  %5645 = vmatprep.subr.bf16.mxu1 %v5644_v45  ;;  %v2193_v30 = vmax.f32 %v2107_v61, 0.0  ;;  %v3685_v61 = vld [vmem:[%s9134_s3 + $0x28] sm:$0xff] }
 0x262   : > { %5305 = vmatprep.mubr.msk.f32.mxu1 %vm2209_vm5, %v8224_v43  ;;  %v2111_v50 = vpop.f32.mrb[78].mxu0  ;;  %5647 = vmatpush3.bf16.msra.mxu1 %v5644_v45  ;;  %v3684_v45 = vld [vmem:[%s9134_s3 + $0x20] sm:$0xff] }
 0x263   : > { %v2112_v9 = vadd.f32 %v2111_v50, %v1807_v5  ;;  %v2113_v14 = vpop.f32.mrb[79].mxu0  ;;  %v5676_v15 = vpack.c.bf16 %v3685_v61, %v3684_v45 }
 0x265   : > { %5306 = vmatmul.mubr.msk.f32.gmra.mrb[82].mxu1 %vm2209_vm5, %v8234_v42  ;;  %v2194_v18 = vmax.f32 %v2112_v9, 0.0  ;;  %v3687_v9 = vld [vmem:[%s9134_s3 + $0x38] sm:$0xff] }
 0x266   : > { %v2116_v41 = vpop.f32.mrb[80].mxu0  ;;  %5320 = vmatprep.mubr.msk.f32.mxu1 %vm2209_vm5, %v8039_v13 }
 0x267   : > { %v5648_v35 = vpack.c.bf16 %v2194_v18, %v2193_v30  ;;  %v2117_v58 = vadd.f32 %v2116_v41, %v1812_v28  ;;  %v2118_v21 = vpop.f32.mrb[81].mxu0  ;;  %v3686_v30 = vld [vmem:[%s9134_s3 + $0x30] sm:$0xff]  ;;  %v3688_v18 = vld [vmem:[%s9134_s3 + $0x40] sm:$0xff]  ;;  %v3689_v41 = vld [vmem:[%s9134_s3 + $0x48] sm:$0xff] }
 0x268   : > { %v5680_v14 = vpack.c.bf16 %v3687_v9, %v3686_v30 }
 0x269   : > { %5649 = vmatprep.subr.bf16.mxu1 %v5648_v35  ;;  %v2195_v8 = vmax.f32 %v2117_v58, 0.0  ;;  %v3691_v58 = vld [vmem:[%s9134_s3 + $0x58] sm:$0xff] }
 0x26a   : > { %v2121_v27 = vpop.f32.mrb[82].mxu0  ;;  %5651 = vmatpush3.bf16.msra.mxu1 %v5648_v35  ;;  %v3690_v35 = vld [vmem:[%s9134_s3 + $0x50] sm:$0xff] }
 0x26b   : > { %v2122_v57 = vadd.f32 %v2121_v27, %v1817_v1  ;;  %v2123_v19 = vpop.f32.mrb[83].mxu0  ;;  %v5684_v1 = vpack.c.bf16 %v3689_v41, %v3688_v18  ;;  %v5688_v21 = vpack.c.bf16 %v3691_v58, %v3690_v35  ;;  %v3692_v27 = vld [vmem:[%s9134_s3 + $0x60] sm:$0xff] }
 0x26d   : > { %v2196_v26 = vmax.f32 %v2122_v57, 0.0 }
 0x26e   : > { %v2126_v37 = vpop.f32.mrb[84].mxu0 }
 0x26f   : > { %v5652_v7 = vpack.c.bf16 %v2196_v26, %v2195_v8  ;;  %v2127_v32 = vadd.f32 %v2126_v37, %v1822_v12  ;;  %v2128_v63 = vpop.f32.mrb[85].mxu0  ;;  %v3693_v12 = vld [vmem:[%s9134_s3 + $0x68] sm:$0xff]  ;;  %v3694_v26 = vld [vmem:[%s9134_s3 + $0x70] sm:$0xff]  ;;  %v3695_v37 = vld [vmem:[%s9134_s3 + $0x78] sm:$0xff] }
 0x270   : > { %v5692_v8 = vpack.c.bf16 %v3693_v12, %v3692_v27 }
 0x271   : > { %5653 = vmatprep.subr.bf16.mxu1 %v5652_v7  ;;  %v2197_v49 = vmax.f32 %v2127_v32, 0.0 }
 0x272   : > { %5655 = vmatpush3.bf16.msra.mxu1 %v5652_v7  ;;  %v2131_v16 = vpop.f32.mrb[86].mxu0 }
 0x273   : > { %v2132_v0 = vadd.f32 %v2131_v16, %v1827_v25  ;;  %v2133_v44 = vpop.f32.mrb[87].mxu0  ;;  %v5696_v25 = vpack.c.bf16 %v3695_v37, %v3694_v26  ;;  %v9449_v16 = vmov 0.0|0.0  }
 0x275   : > { %5321 = vmatmul.mubr.msk.f32.vlgmr.msra.gmra.mrb[84].mxu1 %vm2209_vm5, %v8202_v60  ;;  %v2198_v10 = vmax.f32 %v2132_v0, 0.0 }
 0x276   : > { %5323 = vmatprep.mubr.msk.f32.mxu1 %vm2209_vm5, %v8208_v47  ;;  %v2136_v2 = vpop.f32.mrb[88].mxu0 }
 0x277   : > { %v5656_v33 = vpack.c.bf16 %v2198_v10, %v2197_v49  ;;  %v2137_v52 = vadd.f32 %v2136_v2, %v1832_v40  ;;  %v2138_v3 = vpop.f32.mrb[89].mxu0 }
 0x279   : > { %5324 = vmatmul.mubr.msk.f32.gmra.mrb[86].mxu1 %vm2209_vm5, %v8219_v36  ;;  %5657 = vmatprep.subr.bf16.mxu1 %v5656_v33  ;;  %v2199_v17 = vmax.f32 %v2137_v52, 0.0 }
 0x27a   : > { %5326 = vmatprep.mubr.msk.f32.mxu1 %vm2209_vm5, %v8224_v43  ;;  %v2141_v48 = vpop.f32.mrb[90].mxu0  ;;  %5659 = vmatpush3.bf16.msra.mxu1 %v5656_v33 }
 0x27b   : > { %v2142_v51 = vadd.f32 %v2141_v48, %v1837_v56  ;;  %v2143_v31 = vpop.f32.mrb[91].mxu0 }
 0x27d   : > { %5327 = vmatmul.mubr.msk.f32.gmra.mrb[88].mxu1 %vm2209_vm5, %v8234_v42  ;;  %v2200_v54 = vmax.f32 %v2142_v51, 0.0 }
 0x27e   : > { %v2146_v46 = vpop.f32.mrb[92].mxu0  ;;  %5341 = vmatprep.mubr.msk.f32.mxu1 %vm2209_vm5, %v8039_v13  ;;  %v3680_v13 = vld [vmem:[%s9134_s3] sm:$0xff] }
 0x27f   : > { %v5660_v11 = vpack.c.bf16 %v2200_v54, %v2199_v17  ;;  %v2147_v39 = vadd.f32 %v2146_v46, %v1842_v53  ;;  %v2148_v20 = vpop.f32.mrb[93].mxu0 }
 0x281   : > { %5661 = vmatprep.subr.bf16.mxu1 %v5660_v11  ;;  %v2201_v24 = vmax.f32 %v2147_v39, 0.0 }
 0x282   : > { %v2151_v4 = vpop.f32.mrb[94].mxu0  ;;  %5663 = vmatpush3.bf16.msra.mxu1 %v5660_v11 }
 0x283   : > { %v2152_v34 = vadd.f32 %v2151_v4, %v1847_v55  ;;  %v2153_v23 = vpop.f32.mrb[95].mxu0 }
 0x285   : > { %v2202_v22 = vmax.f32 %v2152_v34, 0.0 }
 0x287   : > { %v5664_v59 = vpack.c.bf16 %v2202_v22, %v2201_v24 }
 0x289   : > { %5665 = vmatprep.subr.bf16.mxu1 %v5664_v59 }
 0x28a   : > { %5667 = vmatpush3.bf16.msra.mxu1 %v5664_v59 }
 0x28d   : > { %5342 = vmatmul.mubr.msk.f32.vlgmr.msra.gmra.mrb[90].mxu1 %vm2209_vm5, %v8202_v60  ;;  %v5668_v60 = vpack.c.bf16 %v3681_v6, %v3680_v13 }
 0x28e   : > { %5344 = vmatprep.mubr.msk.f32.mxu1 %vm2209_vm5, %v8208_v47 }
 0x28f   : > { %5669 = vmatprep.subr.bf16.mxu1 %v5668_v60 }
 0x290   : > { %5671 = vmatpush3.bf16.msra.mxu1 %v5668_v60 }
 0x291   : > { %5345 = vmatmul.mubr.msk.f32.gmra.mrb[92].mxu1 %vm2209_vm5, %v8219_v36 }
 0x292   : > { %5347 = vmatprep.mubr.msk.f32.mxu1 %vm2209_vm5, %v8224_v43  ;;  %v3682_v43 = vld [vmem:[%s9134_s3 + $0x10] sm:$0xff] }
 0x295   : > { %5348 = vmatmul.mubr.msk.f32.gmra.mrb[94].mxu1 %vm2209_vm5, %v8234_v42  ;;  %v3683_v42 = vld [vmem:[%s9134_s3 + $0x18] sm:$0xff]  ;;  %vm3516_vm5 = vcmask 522688  }
 0x296   : > { %v5672_v38 = vpack.c.bf16 %v3683_v42, %v3682_v43 }
 0x298   : > { %5673 = vmatprep.subr.bf16.mxu1 %v5672_v38 }
 0x299   : > { %5675 = vmatpush3.bf16.msra.mxu1 %v5672_v38 }
 0x29a   : > { %5677 = vmatprep.subr.bf16.mxu1 %v5676_v15 }
 0x29d   : > { %5679 = vmatpush3.bf16.msra.mxu1 %v5676_v15 }
 0x29e   : > { %5681 = vmatprep.subr.bf16.mxu1 %v5680_v14 }
 0x2a1   : > { %5683 = vmatpush3.bf16.msra.mxu1 %v5680_v14 }
 0x2a2   : > { %5685 = vmatprep.subr.bf16.mxu1 %v5684_v1 }
 0x2a5   : > { %5687 = vmatpush3.bf16.msra.mxu1 %v5684_v1 }
 0x2a6   : > { %5689 = vmatprep.subr.bf16.mxu1 %v5688_v21 }
 0x2a9   : > { %5691 = vmatpush3.bf16.msra.mxu1 %v5688_v21 }
 0x2aa   : > { %5693 = vmatprep.subr.bf16.mxu1 %v5692_v8 }
 0x2ad   : > { %5695 = vmatpush3.bf16.msra.mxu1 %v5692_v8 }
 0x2ae   : > { %5697 = vmatprep.subr.bf16.mxu1 %v5696_v25 }
 0x2b1   : > { %5699 = vmatpush3.bf16.msra.mxu1 %v5696_v25 }
 0x2b2   : > { %5700 = vmatprep.subr.bf16.mxu1 %v9449_v16 }
 0x2b8   : > { %v5196_v47 = vpop.f32.mrb[48].mxu1 }
 0x2b9   : > { %3270 = vrot.lane.b32.xlu0 %v5196_v47, %s6275_s16  ;;  %3038 = vrot.lane.b32.xlu1 %v5196_v47, %s6276_s29  ;;  %v2294_v36 = vpop.f32.mrb[49].mxu1  ;;  %3007 = vst.msk [vmem:[#allocation2 + $0x8] sm:$0x3] %vm3006_vm6, %v5196_v47 }
 0x2ba   : > { %3005 = vst.msk [vmem:[#allocation2] sm:$0xff] %vm3004_vm7, %v2294_v36 }
 0x2bc   : > { %v5199_v62 = vpop.f32.mrb[50].mxu1 }
 0x2bd   : > { %3534 = vrot.lane.b32.xlu0 %v5196_v47, %s6277_s22  ;;  %3334 = vrot.lane.b32.xlu1 %v5196_v47, %s6278_s23  ;;  %v2304_v5 = vpop.f32.mrb[51].mxu1 }
 0x2c0   : > { %v5202_v50 = vpop.f32.mrb[52].mxu1 }
 0x2c1   : > { %3598 = vrot.lane.b32.xlu1 %v5196_v47, %s6279_s9  ;;  %3040 = vrot.lane.b32.xlu0 %v2304_v5, %s6276_s29  ;;  %v2314_v28 = vpop.f32.mrb[53].mxu1 }
 0x2c5   : > { %3268 = vrot.lane.b32.xlu1 %v2294_v36, %s6275_s16  ;;  %3336 = vrot.lane.b32.xlu0 %v2304_v5, %s6278_s23 }
 0x2c9   : > { %3532 = vrot.lane.b32.xlu1 %v2294_v36, %s6277_s22  ;;  %3600 = vrot.lane.b32.xlu0 %v2304_v5, %s6279_s9 }
 0x2cd   : > { %3120 = vrot.lane.b32.xlu1 %v5199_v62, %s6280_s26  ;;  %3196 = vrot.lane.b32.xlu0 %v5202_v50, %s6281_s30 }
 0x2d0   : > { %v5217_v57 = vpop.f32.mrb[54].mxu1 }
 0x2d1   : > { %3400 = vrot.lane.b32.xlu1 %v5199_v62, %s6282_s14  ;;  %3468 = vrot.lane.b32.xlu0 %v5202_v50, %s6273_s18  ;;  %v2389_v19 = vpop.f32.mrb[55].mxu1  ;;  %3009 = vst.msk [vmem:[#allocation2 + $0x18] sm:$0x3] %vm3006_vm6, %v5217_v57 }
 0x2d2   : > { %3008 = vst.msk [vmem:[#allocation2 + $0x10] sm:$0xff] %vm3004_vm7, %v2389_v19 }
 0x2d4   : > { %v5220_v7 = vpop.f32.mrb[56].mxu1 }
 0x2d5   : > { %3194 = vrot.lane.b32.xlu1 %v2314_v28, %s6281_s30  ;;  %3122 = vrot.lane.b32.xlu0 %v2314_v28, %s6280_s26  ;;  %v2399_v32 = vpop.f32.mrb[57].mxu1 }
 0x2d8   : > { %v5223_v63 = vpop.f32.mrb[58].mxu1 }
 0x2d9   : > { %3466 = vrot.lane.b32.xlu1 %v2314_v28, %s6273_s18  ;;  %3402 = vrot.lane.b32.xlu0 %v2314_v28, %s6282_s14  ;;  %v2409_v40 = vpop.f32.mrb[59].mxu1 }
 0x2dd   : > { %3274 = vrot.lane.b32.xlu0 %v5217_v57, %s6275_s16  ;;  %3042 = vrot.lane.b32.xlu1 %v5217_v57, %s6276_s29 }
 0x2e1   : > { %3538 = vrot.lane.b32.xlu0 %v5217_v57, %s6277_s22  ;;  %3338 = vrot.lane.b32.xlu1 %v5217_v57, %s6278_s23 }
 0x2e5   : > { %3602 = vrot.lane.b32.xlu1 %v5217_v57, %s6279_s9  ;;  %3044 = vrot.lane.b32.xlu0 %v2399_v32, %s6276_s29 }
 0x2e8   : > { %v5238_v49 = vpop.f32.mrb[60].mxu1 }
 0x2e9   : > { %3272 = vrot.lane.b32.xlu1 %v2389_v19, %s6275_s16  ;;  %3340 = vrot.lane.b32.xlu0 %v2399_v32, %s6278_s23  ;;  %v2484_v0 = vpop.f32.mrb[61].mxu1  ;;  %3011 = vst.msk [vmem:[#allocation2 + $0x28] sm:$0x3] %vm3006_vm6, %v5238_v49 }
 0x2ea   : > { %3010 = vst.msk [vmem:[#allocation2 + $0x20] sm:$0xff] %vm3004_vm7, %v2484_v0 }
 0x2ec   : > { %v5241_v44 = vpop.f32.mrb[62].mxu1 }
 0x2ed   : > { %3536 = vrot.lane.b32.xlu1 %v2389_v19, %s6277_s22  ;;  %3604 = vrot.lane.b32.xlu0 %v2399_v32, %s6279_s9  ;;  %v2494_v10 = vpop.f32.mrb[63].mxu1 }
 0x2f0   : > { %v5244_v2 = vpop.f32.mrb[64].mxu1 }
 0x2f1   : > { %3124 = vrot.lane.b32.xlu1 %v5220_v7, %s6280_s26  ;;  %3200 = vrot.lane.b32.xlu0 %v5223_v63, %s6281_s30  ;;  %v2504_v56 = vpop.f32.mrb[65].mxu1 }
 0x2f5   : > { %3404 = vrot.lane.b32.xlu1 %v5220_v7, %s6282_s14  ;;  %3472 = vrot.lane.b32.xlu0 %v5223_v63, %s6273_s18 }
 0x2f9   : > { %3198 = vrot.lane.b32.xlu1 %v2409_v40, %s6281_s30  ;;  %3126 = vrot.lane.b32.xlu0 %v2409_v40, %s6280_s26 }
 0x2fd   : > { %3470 = vrot.lane.b32.xlu1 %v2409_v40, %s6273_s18  ;;  %3406 = vrot.lane.b32.xlu0 %v2409_v40, %s6282_s14 }
 0x300   : > { %v5259_v33 = vpop.f32.mrb[66].mxu1 }
 0x301   : > { %3278 = vrot.lane.b32.xlu0 %v5238_v49, %s6275_s16  ;;  %3046 = vrot.lane.b32.xlu1 %v5238_v49, %s6276_s29  ;;  %v2579_v52 = vpop.f32.mrb[67].mxu1  ;;  %3013 = vst.msk [vmem:[#allocation2 + $0x38] sm:$0x3] %vm3006_vm6, %v5259_v33 }
 0x302   : > { %3012 = vst.msk [vmem:[#allocation2 + $0x30] sm:$0xff] %vm3004_vm7, %v2579_v52 }
 0x304   : > { %v5262_v3 = vpop.f32.mrb[68].mxu1 }
 0x305   : > { %3542 = vrot.lane.b32.xlu0 %v5238_v49, %s6277_s22  ;;  %3342 = vrot.lane.b32.xlu1 %v5238_v49, %s6278_s23  ;;  %v2589_v48 = vpop.f32.mrb[69].mxu1 }
 0x308   : > { %v5265_v53 = vpop.f32.mrb[70].mxu1 }
 0x309   : > { %3606 = vrot.lane.b32.xlu1 %v5238_v49, %s6279_s9  ;;  %3048 = vrot.lane.b32.xlu0 %v2494_v10, %s6276_s29  ;;  %v8536_v17 = vpop.f32.mrb[71].mxu1 }
 0x30d   : > { %3276 = vrot.lane.b32.xlu1 %v2484_v0, %s6275_s16  ;;  %3344 = vrot.lane.b32.xlu0 %v2494_v10, %s6278_s23 }
 0x311   : > { %3540 = vrot.lane.b32.xlu1 %v2484_v0, %s6277_s22  ;;  %3608 = vrot.lane.b32.xlu0 %v2494_v10, %s6279_s9 }
 0x315   : > { %3128 = vrot.lane.b32.xlu1 %v5241_v44, %s6280_s26  ;;  %3204 = vrot.lane.b32.xlu0 %v5244_v2, %s6281_s30 }
 0x318   : > { %v8544_v51 = vpop.f32.mrb[72].mxu1 }
 0x319   : > { %3408 = vrot.lane.b32.xlu1 %v5241_v44, %s6282_s14  ;;  %3476 = vrot.lane.b32.xlu0 %v5244_v2, %s6273_s18  ;;  %3015 = vst.msk [vmem:[#allocation2 + $0x48] sm:$0x3] %vm3006_vm6, %v8544_v51  ;;  %v8550_v31 = vpop.f32.mrb[73].mxu1 }
 0x31a   : > { %3014 = vst.msk [vmem:[#allocation2 + $0x40] sm:$0xff] %vm3004_vm7, %v8550_v31 }
 0x31c   : > { %v8554_v54 = vpop.f32.mrb[74].mxu1 }
 0x31d   : > { %3202 = vrot.lane.b32.xlu1 %v2504_v56, %s6281_s30  ;;  %3130 = vrot.lane.b32.xlu0 %v2504_v56, %s6280_s26  ;;  %v8558_v46 = vpop.f32.mrb[75].mxu1 }
 0x320   : > { %v8560_v55 = vpop.f32.mrb[76].mxu1 }
 0x321   : > { %3474 = vrot.lane.b32.xlu1 %v2504_v56, %s6273_s18  ;;  %3410 = vrot.lane.b32.xlu0 %v2504_v56, %s6282_s14  ;;  %v8564_v11 = vpop.f32.mrb[77].mxu1 }
 0x325   : > { %3282 = vrot.lane.b32.xlu0 %v5259_v33, %s6275_s16  ;;  %3050 = vrot.lane.b32.xlu1 %v5259_v33, %s6276_s29 }
 0x329   : > { %3546 = vrot.lane.b32.xlu0 %v5259_v33, %s6277_s22  ;;  %3346 = vrot.lane.b32.xlu1 %v5259_v33, %s6278_s23 }
 0x32b   : > { %v3271_v39 = vpop.permute.xlu0 %3270  ;;  %v3039_v20 = vpop.permute.xlu1 %3038 }
 0x32c   : > { %3087 = vst.msk [vmem:[#allocation2 - $0x4] sm:$0xf0] %vm9258_vm8, %v3039_v20 }
 0x32d   : > { %3610 = vrot.lane.b32.xlu1 %v5259_v33, %s6279_s9  ;;  %3052 = vrot.lane.b32.xlu0 %v2589_v48, %s6276_s29 }
 0x32f   : > { %v8573_v4 = vpop.permute.xlu0 %3534  ;;  %v3335_v24 = vpop.permute.xlu1 %3334 }
 0x330   : > { %v8575_v34 = vpop.f32.mrb[78].mxu1 }
 0x331   : > { %3280 = vrot.lane.b32.xlu1 %v2579_v52, %s6275_s16  ;;  %3348 = vrot.lane.b32.xlu0 %v2589_v48, %s6278_s23  ;;  %3017 = vst.msk [vmem:[#allocation2 + $0x58] sm:$0x3] %vm3006_vm6, %v8575_v34  ;;  %v8581_v23 = vpop.f32.mrb[79].mxu1 }
 0x332   : > { %3016 = vst.msk [vmem:[#allocation2 + $0x50] sm:$0xff] %vm3004_vm7, %v8581_v23 }
 0x333   : > { %v8585_v22 = vpop.permute.xlu1 %3598  ;;  %v3041_v59 = vpop.permute.xlu0 %3040 }
 0x334   : > { %3089 = vst.msk [vmem:[#allocation2 + $0x4] sm:$0x3f] %vm9257_vm9, %v3041_v59  ;;  %v8588_v13 = vpop.f32.mrb[80].mxu1 }
 0x335   : > { %3544 = vrot.lane.b32.xlu1 %v2579_v52, %s6277_s22  ;;  %3612 = vrot.lane.b32.xlu0 %v2589_v48, %s6279_s9  ;;  %v8592_v6 = vpop.f32.mrb[81].mxu1 }
 0x337   : > { %v3269_v60 = vpop.permute.xlu1 %3268  ;;  %v3337_v47 = vpop.permute.xlu0 %3336 }
 0x338   : > { %v8594_v36 = vpop.f32.mrb[82].mxu1 }
 0x339   : > { %3132 = vrot.lane.b32.xlu1 %v5262_v3, %s6280_s26  ;;  %3208 = vrot.lane.b32.xlu0 %v5265_v53, %s6281_s30  ;;  %v8598_v43 = vpop.f32.mrb[83].mxu1 }
 0x33b   : > { %v3533_v42 = vpop.permute.xlu1 %3532  ;;  %v3601_v38 = vpop.permute.xlu0 %3600 }
 0x33d   : > { %3412 = vrot.lane.b32.xlu1 %v5262_v3, %s6282_s14  ;;  %3480 = vrot.lane.b32.xlu0 %v5265_v53, %s6273_s18 }
 0x33f   : > { %v3121_v62 = vpop.permute.xlu1 %3120  ;;  %v3197_v5 = vpop.permute.xlu0 %3196 }
 0x340   : > { %3169 = vst.msk [vmem:[#allocation2] sm:$0xff] %vm9256_vm10, %v3121_v62  ;;  %vm9259_vm10 = vcmask 654912  }
 0x341   : > { %3206 = vrot.lane.b32.xlu1 %v8536_v17, %s6281_s30  ;;  %3134 = vrot.lane.b32.xlu0 %v8536_v17, %s6280_s26 }
 0x343   : > { %v3401_v45 = vpop.permute.xlu1 %3400  ;;  %v3469_v61 = vpop.permute.xlu0 %3468 }
 0x345   : > { %3478 = vrot.lane.b32.xlu1 %v8536_v17, %s6273_s18  ;;  %3414 = vrot.lane.b32.xlu0 %v8536_v17, %s6282_s14 }
 0x347   : > { %v3195_v15 = vpop.permute.xlu1 %3194  ;;  %v3123_v50 = vpop.permute.xlu0 %3122 }
 0x348   : > { %3243 = vst.msk [vmem:[#allocation2 - $0x4] sm:$0xf0] %vm9255_vm11, %v3195_v15  ;;  %v8613_v28 = vpop.f32.mrb[84].mxu1  ;;  %vm3646_vm11 = vcmask 654918  }
 0x349   : > { %3171 = vst.msk [vmem:[#allocation2 + $0x8] sm:$0x3] %vm9254_vm12, %v3123_v50  ;;  %3286 = vrot.lane.b32.xlu0 %v8544_v51, %s6275_s16  ;;  %3054 = vrot.lane.b32.xlu1 %v8544_v51, %s6276_s29  ;;  %v8622_v30 = vpop.f32.mrb[85].mxu1  ;;  %vm3582_vm12 = vcmask 585216  }
 0x34a   : > { %3245 = vst.msk [vmem:[#allocation2 + $0x4] sm:$0x3f] %vm9253_vm13, %v3197_v5  ;;  %vm3580_vm13 = vcmask 589314  }
 0x34b   : > { %3019 = vst.msk [vmem:[#allocation2 + $0x68] sm:$0x3] %vm3006_vm6, %v8613_v28  ;;  %v3467_v9 = vpop.permute.xlu1 %3466  ;;  %v3403_v14 = vpop.permute.xlu0 %3402 }
 0x34c   : > { %3317 = vst.msk [vmem:[#allocation2 - $0x1] sm:$0xfe] %vm3316_vm14, %v3269_v60  ;;  %v8632_v18 = vpop.f32.mrb[86].mxu1 }
 0x34d   : > { %3319 = vst.msk [vmem:[#allocation2 + $0x7] sm:$0x7] %vm3318_vm15, %v3271_v39  ;;  %3550 = vrot.lane.b32.xlu0 %v8544_v51, %s6277_s22  ;;  %3350 = vrot.lane.b32.xlu1 %v8544_v51, %s6278_s23  ;;  %v8640_v41 = vpop.f32.mrb[87].mxu1 }
 0x34e   : > { %3018 = vst.msk [vmem:[#allocation2 + $0x60] sm:$0xff] %vm3004_vm7, %v8622_v30 }
 0x34f   : > { %3383 = vst.msk [vmem:[#allocation2 - $0x5] sm:$0xe0] %vm3382_vm0, %v3335_v24  ;;  %v3275_v1 = vpop.permute.xlu0 %3274  ;;  %v3043_v35 = vpop.permute.xlu1 %3042 }
 0x350   : > { %3385 = vst.msk [vmem:[#allocation2 + $0x3] sm:$0x7f] %vm3384_vm1, %v3337_v47  ;;  %v8649_v58 = vpop.f32.mrb[88].mxu1 }
 0x351   : > { %3449 = vst.msk [vmem:[#allocation2 - $0x1] sm:$0xfe] %vm3448_vm2, %v3401_v45  ;;  %3614 = vrot.lane.b32.xlu1 %v8544_v51, %s6279_s9  ;;  %3056 = vrot.lane.b32.xlu0 %v8558_v46, %s6276_s29  ;;  %v8655_v21 = vpop.f32.mrb[89].mxu1 }
 0x352   : > { %3451 = vst.msk [vmem:[#allocation2 + $0x7] sm:$0x7] %vm3450_vm3, %v3403_v14 }
 0x353   : > { %3515 = vst.msk [vmem:[#allocation2 - $0x5] sm:$0xe0] %vm3514_vm4, %v3467_v9  ;;  %v3539_v27 = vpop.permute.xlu0 %3538  ;;  %v3339_v12 = vpop.permute.xlu1 %3338 }
 0x354   : > { %3517 = vst.msk [vmem:[#allocation2 + $0x3] sm:$0x7f] %vm3516_vm5, %v3469_v61 }
 0x355   : > { %3581 = vst.msk [vmem:[#allocation2 - $0x2] sm:$0xfc] %vm3580_vm13, %v3533_v42  ;;  %3284 = vrot.lane.b32.xlu1 %v8550_v31, %s6275_s16  ;;  %3352 = vrot.lane.b32.xlu0 %v8558_v46, %s6278_s23 }
 0x356   : > { %3583 = vst.msk [vmem:[#allocation2 + $0x6] sm:$0xf] %vm3582_vm12, %v8573_v4 }
 0x357   : > { %3647 = vst.msk [vmem:[#allocation2 - $0x6] sm:$0xc0] %vm3646_vm11, %v8585_v22  ;;  %v3603_v19 = vpop.permute.xlu1 %3602  ;;  %v3045_v26 = vpop.permute.xlu0 %3044 }
 0x358   : > { %3649 = vst.msk [vmem:[#allocation2 + $0x2] sm:$0xff] %vm9259_vm10, %v3601_v38 }
 0x359   : > { %3090 = vst.msk [vmem:[#allocation2 + $0xc] sm:$0xf0] %vm9258_vm8, %v3043_v35  ;;  %3548 = vrot.lane.b32.xlu1 %v8550_v31, %s6277_s22  ;;  %3616 = vrot.lane.b32.xlu0 %v8558_v46, %s6279_s9 }
 0x35a   : > { %3091 = vst.msk [vmem:[#allocation2 + $0x14] sm:$0x3f] %vm9257_vm9, %v3045_v26  ;;  %vm9450_vm9 = vcmask 195712  }
 0x35b   : > { %v3273_v37 = vpop.permute.xlu1 %3272  ;;  %v3341_v25 = vpop.permute.xlu0 %3340 }
 0x35d   : > { %3136 = vrot.lane.b32.xlu1 %v8554_v54, %s6280_s26  ;;  %3212 = vrot.lane.b32.xlu0 %v8560_v55, %s6281_s30 }
 0x35f   : > { %v3664_v8 = vld [vmem:[#allocation2] sm:$0xff]  ;;  %v3665_v57 = vld [vmem:[#allocation2 + $0x8] sm:$0xff]  ;;  %v3537_v7 = vpop.permute.xlu1 %3536  ;;  %v3605_v32 = vpop.permute.xlu0 %3604 }
 0x360   : > { %5382 = vmatprep.mubr.f32.mxu1 %v3664_v8  ;;  %v8670_v63 = vpop.f32.mrb[90].mxu1 }
 0x361   : > { %5383 = vmatmul.mubr.f32.vlgmr.msra.gmra.mrb[96].mxu1 %v3665_v57  ;;  %3416 = vrot.lane.b32.xlu1 %v8554_v54, %s6282_s14  ;;  %3021 = vst.msk [vmem:[#allocation2 + $0x78] sm:$0x3] %vm3006_vm6, %v8670_v63  ;;  %v8678_v40 = vpop.f32.mrb[91].mxu1  ;;  %vm9451_vm6 = vcmask 261316  }
 0x362   : > { %3484 = vrot.lane.b32.xlu0 %v8560_v55, %s6273_s18  ;;  %3020 = vst.msk [vmem:[#allocation2 + $0x70] sm:$0xff] %vm3004_vm7, %v8678_v40  ;;  %vm9452_vm7 = vcmask 189568  }
 0x363   : > { %v3125_v49 = vpop.permute.xlu1 %3124  ;;  %v3201_v0 = vpop.permute.xlu0 %3200 }
 0x364   : > { %3172 = vst.msk [vmem:[#allocation2 + $0x10] sm:$0xff] %vm9450_vm9, %v3125_v49  ;;  %v8683_v44 = vpop.f32.mrb[92].mxu1  ;;  %vm9453_vm9 = vcmask 259264  }
 0x365   : > { %3210 = vrot.lane.b32.xlu1 %v8564_v11, %s6281_s30  ;;  %v8689_v10 = vpop.f32.mrb[93].mxu1 }
 0x366   : > { %3138 = vrot.lane.b32.xlu0 %v8564_v11, %s6280_s26 }
 0x367   : > { %v3405_v2 = vpop.permute.xlu1 %3404  ;;  %v3473_v56 = vpop.permute.xlu0 %3472 }
 0x368   : > { %v8691_v33 = vpop.f32.mrb[94].mxu1 }
 0x369   : > { %3482 = vrot.lane.b32.xlu1 %v8564_v11, %s6273_s18  ;;  %v8697_v52 = vpop.f32.mrb[95].mxu1 }
 0x36a   : > { %3418 = vrot.lane.b32.xlu0 %v8564_v11, %s6282_s14 }
 0x36b   : > { %v3199_v3 = vpop.permute.xlu1 %3198  ;;  %v3127_v48 = vpop.permute.xlu0 %3126 }
 0x36c   : > { %3246 = vst.msk [vmem:[#allocation2 + $0xc] sm:$0xf0] %vm9451_vm6, %v3199_v3  ;;  %vm9454_vm6 = vcmask 128064  }
 0x36d   : > { %3173 = vst.msk [vmem:[#allocation2 + $0x18] sm:$0x3] %vm9452_vm7, %v3127_v48  ;;  %3058 = vrot.lane.b32.xlu1 %v8575_v34, %s6276_s29  ;;  %vm9455_vm7 = vcmask 195712  }
 0x36e   : > { %3247 = vst.msk [vmem:[#allocation2 + $0x14] sm:$0x3f] %vm9453_vm9, %v3201_v0  ;;  %3290 = vrot.lane.b32.xlu0 %v8575_v34, %s6275_s16  ;;  %vm9456_vm9 = vcmask 261316  }
 0x36f   : > { %3320 = vst.msk [vmem:[#allocation2 + $0xf] sm:$0xfe] %vm3316_vm14, %v3273_v37  ;;  %v3471_v53 = vpop.permute.xlu1 %3470  ;;  %v3407_v17 = vpop.permute.xlu0 %3406 }
 0x370   : > { %3321 = vst.msk [vmem:[#allocation2 + $0x17] sm:$0x7] %vm3318_vm15, %v3275_v1 }
 0x371   : > { %3386 = vst.msk [vmem:[#allocation2 + $0xb] sm:$0xe0] %vm3382_vm0, %v3339_v12  ;;  %3354 = vrot.lane.b32.xlu1 %v8575_v34, %s6278_s23 }
 0x372   : > { %3387 = vst.msk [vmem:[#allocation2 + $0x13] sm:$0x7f] %vm3384_vm1, %v3341_v25  ;;  %3554 = vrot.lane.b32.xlu0 %v8575_v34, %s6277_s22 }
 0x373   : > { %3452 = vst.msk [vmem:[#allocation2 + $0xf] sm:$0xfe] %vm3448_vm2, %v3405_v2  ;;  %v3279_v51 = vpop.permute.xlu0 %3278  ;;  %v3047_v31 = vpop.permute.xlu1 %3046 }
 0x374   : > { %3453 = vst.msk [vmem:[#allocation2 + $0x17] sm:$0x7] %vm3450_vm3, %v3407_v17 }
 0x375   : > { %3518 = vst.msk [vmem:[#allocation2 + $0xb] sm:$0xe0] %vm3514_vm4, %v3471_v53  ;;  %3618 = vrot.lane.b32.xlu1 %v8575_v34, %s6279_s9 }
 0x376   : > { %3519 = vst.msk [vmem:[#allocation2 + $0x13] sm:$0x7f] %vm3516_vm5, %v3473_v56  ;;  %3060 = vrot.lane.b32.xlu0 %v8592_v6, %s6276_s29 }
 0x377   : > { %3584 = vst.msk [vmem:[#allocation2 + $0xe] sm:$0xfc] %vm3580_vm13, %v3537_v7  ;;  %v3543_v54 = vpop.permute.xlu0 %3542  ;;  %v3343_v46 = vpop.permute.xlu1 %3342 }
 0x378   : > { %3585 = vst.msk [vmem:[#allocation2 + $0x16] sm:$0xf] %vm3582_vm12, %v3539_v27 }
 0x379   : > { %3650 = vst.msk [vmem:[#allocation2 + $0xa] sm:$0xc0] %vm3646_vm11, %v3603_v19  ;;  %3288 = vrot.lane.b32.xlu1 %v8581_v23, %s6275_s16 }
 0x37a   : > { %3651 = vst.msk [vmem:[#allocation2 + $0x12] sm:$0xff] %vm9259_vm10, %v3605_v32  ;;  %3356 = vrot.lane.b32.xlu0 %v8592_v6, %s6278_s23 }
 0x37b   : > { %3092 = vst.msk [vmem:[#allocation2 + $0x1c] sm:$0xf0] %vm9258_vm8, %v3047_v31  ;;  %v3607_v39 = vpop.permute.xlu1 %3606  ;;  %v3049_v20 = vpop.permute.xlu0 %3048 }
 0x37c   : > { %3093 = vst.msk [vmem:[#allocation2 + $0x24] sm:$0x3f] %vm9454_vm6, %v3049_v20  ;;  %vm9457_vm6 = vcmask 189568  }
 0x37d   : > { %3552 = vrot.lane.b32.xlu1 %v8581_v23, %s6277_s22 }
 0x37e   : > { %3620 = vrot.lane.b32.xlu0 %v8592_v6, %s6279_s9 }
 0x37f   : > { %v3277_v4 = vpop.permute.xlu1 %3276  ;;  %v3345_v24 = vpop.permute.xlu0 %3344 }
 0x381   : > { %v3666_v55 = vld [vmem:[#allocation2 + $0x10] sm:$0xff]  ;;  %v3667_v11 = vld [vmem:[#allocation2 + $0x18] sm:$0xff]  ;;  %3140 = vrot.lane.b32.xlu1 %v8588_v13, %s6280_s26 }
 0x382   : > { %5385 = vmatprep.mubr.f32.mxu1 %v3666_v55  ;;  %3216 = vrot.lane.b32.xlu0 %v8594_v36, %s6281_s30 }
 0x383   : > { %5386 = vmatmul.mubr.f32.gmra.mrb[98].mxu1 %v3667_v11  ;;  %v3541_v34 = vpop.permute.xlu1 %3540  ;;  %v3609_v22 = vpop.permute.xlu0 %3608 }
 0x385   : > { %3420 = vrot.lane.b32.xlu1 %v8588_v13, %s6282_s14 }
 0x386   : > { %3488 = vrot.lane.b32.xlu0 %v8594_v36, %s6273_s18 }
 0x387   : > { %v3129_v23 = vpop.permute.xlu1 %3128  ;;  %v3205_v59 = vpop.permute.xlu0 %3204 }
 0x388   : > { %3174 = vst.msk [vmem:[#allocation2 + $0x20] sm:$0xff] %vm9455_vm7, %v3129_v23  ;;  %vm9458_vm7 = vcmask 259264  }
 0x389   : > { %3214 = vrot.lane.b32.xlu1 %v8598_v43, %s6281_s30 }
 0x38a   : > { %3142 = vrot.lane.b32.xlu0 %v8598_v43, %s6280_s26 }
 0x38b   : > { %v3409_v6 = vpop.permute.xlu1 %3408  ;;  %v3477_v60 = vpop.permute.xlu0 %3476 }
 0x38d   : > { %3486 = vrot.lane.b32.xlu1 %v8598_v43, %s6273_s18 }
 0x38e   : > { %3422 = vrot.lane.b32.xlu0 %v8598_v43, %s6282_s14 }
 0x38f   : > { %v3203_v13 = vpop.permute.xlu1 %3202  ;;  %v3131_v47 = vpop.permute.xlu0 %3130 }
 0x390   : > { %3248 = vst.msk [vmem:[#allocation2 + $0x1c] sm:$0xf0] %vm9456_vm9, %v3203_v13  ;;  %vm9459_vm9 = vcmask 128064  }
 0x391   : > { %3175 = vst.msk [vmem:[#allocation2 + $0x28] sm:$0x3] %vm9457_vm6, %v3131_v47  ;;  %3062 = vrot.lane.b32.xlu1 %v8613_v28, %s6276_s29  ;;  %vm9460_vm6 = vcmask 195712  }
 0x392   : > { %3249 = vst.msk [vmem:[#allocation2 + $0x24] sm:$0x3f] %vm9458_vm7, %v3205_v59  ;;  %3294 = vrot.lane.b32.xlu0 %v8613_v28, %s6275_s16  ;;  %vm9461_vm7 = vcmask 261316  }
 0x393   : > { %3322 = vst.msk [vmem:[#allocation2 + $0x1f] sm:$0xfe] %vm3316_vm14, %v3277_v4  ;;  %v3475_v36 = vpop.permute.xlu1 %3474  ;;  %v3411_v43 = vpop.permute.xlu0 %3410 }
 0x394   : > { %3323 = vst.msk [vmem:[#allocation2 + $0x27] sm:$0x7] %vm3318_vm15, %v3279_v51 }
 0x395   : > { %3388 = vst.msk [vmem:[#allocation2 + $0x1b] sm:$0xe0] %vm3382_vm0, %v3343_v46  ;;  %3358 = vrot.lane.b32.xlu1 %v8613_v28, %s6278_s23 }
 0x396   : > { %3389 = vst.msk [vmem:[#allocation2 + $0x23] sm:$0x7f] %vm3384_vm1, %v3345_v24  ;;  %3558 = vrot.lane.b32.xlu0 %v8613_v28, %s6277_s22 }
 0x397   : > { %3454 = vst.msk [vmem:[#allocation2 + $0x1f] sm:$0xfe] %vm3448_vm2, %v3409_v6  ;;  %v3283_v42 = vpop.permute.xlu0 %3282  ;;  %v3051_v38 = vpop.permute.xlu1 %3050 }
 0x398   : > { %3455 = vst.msk [vmem:[#allocation2 + $0x27] sm:$0x7] %vm3450_vm3, %v3411_v43 }
 0x399   : > { %3520 = vst.msk [vmem:[#allocation2 + $0x1b] sm:$0xe0] %vm3514_vm4, %v3475_v36  ;;  %3622 = vrot.lane.b32.xlu1 %v8613_v28, %s6279_s9 }
 0x39a   : > { %3521 = vst.msk [vmem:[#allocation2 + $0x23] sm:$0x7f] %vm3516_vm5, %v3477_v60  ;;  %3064 = vrot.lane.b32.xlu0 %v8640_v41, %s6276_s29 }
 0x39b   : > { %3586 = vst.msk [vmem:[#allocation2 + $0x1e] sm:$0xfc] %vm3580_vm13, %v3541_v34  ;;  %v3547_v62 = vpop.permute.xlu0 %3546  ;;  %v3347_v5 = vpop.permute.xlu1 %3346 }
 0x39c   : > { %3587 = vst.msk [vmem:[#allocation2 + $0x26] sm:$0xf] %vm3582_vm12, %v3543_v54 }
 0x39d   : > { %3652 = vst.msk [vmem:[#allocation2 + $0x1a] sm:$0xc0] %vm3646_vm11, %v3607_v39  ;;  %3292 = vrot.lane.b32.xlu1 %v8622_v30, %s6275_s16 }
 0x39e   : > { %3653 = vst.msk [vmem:[#allocation2 + $0x22] sm:$0xff] %vm9259_vm10, %v3609_v22  ;;  %3360 = vrot.lane.b32.xlu0 %v8640_v41, %s6278_s23 }
 0x39f   : > { %3094 = vst.msk [vmem:[#allocation2 + $0x2c] sm:$0xf0] %vm9258_vm8, %v3051_v38  ;;  %v3611_v15 = vpop.permute.xlu1 %3610  ;;  %v3053_v50 = vpop.permute.xlu0 %3052 }
 0x3a0   : > { %3095 = vst.msk [vmem:[#allocation2 + $0x34] sm:$0x3f] %vm9459_vm9, %v3053_v50  ;;  %vm9462_vm9 = vcmask 189568  }
 0x3a1   : > { %3556 = vrot.lane.b32.xlu1 %v8622_v30, %s6277_s22 }
 0x3a2   : > { %3624 = vrot.lane.b32.xlu0 %v8640_v41, %s6279_s9 }
 0x3a3   : > { %v3281_v28 = vpop.permute.xlu1 %3280  ;;  %v3349_v9 = vpop.permute.xlu0 %3348 }
 0x3a5   : > { %v3668_v45 = vld [vmem:[#allocation2 + $0x20] sm:$0xff]  ;;  %v3669_v61 = vld [vmem:[#allocation2 + $0x28] sm:$0xff]  ;;  %3144 = vrot.lane.b32.xlu1 %v8632_v18, %s6280_s26 }
 0x3a6   : > { %5388 = vmatprep.mubr.f32.mxu1 %v3668_v45  ;;  %3220 = vrot.lane.b32.xlu0 %v8649_v58, %s6281_s30 }
 0x3a7   : > { %5389 = vmatmul.mubr.f32.gmra.mrb[100].mxu1 %v3669_v61  ;;  %v3545_v14 = vpop.permute.xlu1 %3544  ;;  %v3613_v1 = vpop.permute.xlu0 %3612 }
 0x3a9   : > { %3424 = vrot.lane.b32.xlu1 %v8632_v18, %s6282_s14 }
 0x3aa   : > { %3492 = vrot.lane.b32.xlu0 %v8649_v58, %s6273_s18 }
 0x3ab   : > { %v3133_v30 = vpop.permute.xlu1 %3132  ;;  %v3209_v35 = vpop.permute.xlu0 %3208 }
 0x3ac   : > { %3176 = vst.msk [vmem:[#allocation2 + $0x30] sm:$0xff] %vm9460_vm6, %v3133_v30  ;;  %vm9463_vm6 = vcmask 259264  }
 0x3ad   : > { %3218 = vrot.lane.b32.xlu1 %v8655_v21, %s6281_s30 }
 0x3ae   : > { %3146 = vrot.lane.b32.xlu0 %v8655_v21, %s6280_s26 }
 0x3af   : > { %v3413_v41 = vpop.permute.xlu1 %3412  ;;  %v3481_v27 = vpop.permute.xlu0 %3480 }
 0x3b1   : > { %3490 = vrot.lane.b32.xlu1 %v8655_v21, %s6273_s18 }
 0x3b2   : > { %3426 = vrot.lane.b32.xlu0 %v8655_v21, %s6282_s14 }
 0x3b3   : > { %v3207_v18 = vpop.permute.xlu1 %3206  ;;  %v3135_v58 = vpop.permute.xlu0 %3134 }
 0x3b4   : > { %3250 = vst.msk [vmem:[#allocation2 + $0x2c] sm:$0xf0] %vm9461_vm7, %v3207_v18  ;;  %vm9464_vm7 = vcmask 128064  }
 0x3b5   : > { %3177 = vst.msk [vmem:[#allocation2 + $0x38] sm:$0x3] %vm9462_vm9, %v3135_v58  ;;  %3066 = vrot.lane.b32.xlu1 %v8670_v63, %s6276_s29  ;;  %vm9465_vm9 = vcmask 195712  }
 0x3b6   : > { %3251 = vst.msk [vmem:[#allocation2 + $0x34] sm:$0x3f] %vm9463_vm6, %v3209_v35  ;;  %3298 = vrot.lane.b32.xlu0 %v8670_v63, %s6275_s16  ;;  %vm9466_vm6 = vcmask 261316  }
 0x3b7   : > { %3324 = vst.msk [vmem:[#allocation2 + $0x2f] sm:$0xfe] %vm3316_vm14, %v3281_v28  ;;  %v3479_v21 = vpop.permute.xlu1 %3478  ;;  %v3415_v12 = vpop.permute.xlu0 %3414 }
 0x3b8   : > { %3325 = vst.msk [vmem:[#allocation2 + $0x37] sm:$0x7] %vm3318_vm15, %v3283_v42 }
 0x3b9   : > { %3390 = vst.msk [vmem:[#allocation2 + $0x2b] sm:$0xe0] %vm3382_vm0, %v3347_v5  ;;  %3362 = vrot.lane.b32.xlu1 %v8670_v63, %s6278_s23 }
 0x3ba   : > { %3391 = vst.msk [vmem:[#allocation2 + $0x33] sm:$0x7f] %vm3384_vm1, %v3349_v9  ;;  %3562 = vrot.lane.b32.xlu0 %v8670_v63, %s6277_s22 }
 0x3bb   : > { %3456 = vst.msk [vmem:[#allocation2 + $0x2f] sm:$0xfe] %vm3448_vm2, %v3413_v41  ;;  %v3287_v8 = vpop.permute.xlu0 %3286  ;;  %v3055_v57 = vpop.permute.xlu1 %3054 }
 0x3bc   : > { %3457 = vst.msk [vmem:[#allocation2 + $0x37] sm:$0x7] %vm3450_vm3, %v3415_v12 }
 0x3bd   : > { %3522 = vst.msk [vmem:[#allocation2 + $0x2b] sm:$0xe0] %vm3514_vm4, %v3479_v21  ;;  %3296 = vrot.lane.b32.xlu1 %v8678_v40, %s6275_s16 }
 0x3be   : > { %3523 = vst.msk [vmem:[#allocation2 + $0x33] sm:$0x7f] %vm3516_vm5, %v3481_v27  ;;  %3068 = vrot.lane.b32.xlu0 %v8689_v10, %s6276_s29 }
 0x3bf   : > { %3588 = vst.msk [vmem:[#allocation2 + $0x2e] sm:$0xfc] %vm3580_vm13, %v3545_v14  ;;  %v3551_v19 = vpop.permute.xlu0 %3550  ;;  %v3351_v26 = vpop.permute.xlu1 %3350 }
 0x3c0   : > { %3589 = vst.msk [vmem:[#allocation2 + $0x36] sm:$0xf] %vm3582_vm12, %v3547_v62 }
 0x3c1   : > { %3654 = vst.msk [vmem:[#allocation2 + $0x2a] sm:$0xc0] %vm3646_vm11, %v3611_v15  ;;  %3560 = vrot.lane.b32.xlu1 %v8678_v40, %s6277_s22 }
 0x3c2   : > { %3655 = vst.msk [vmem:[#allocation2 + $0x32] sm:$0xff] %vm9259_vm10, %v3613_v1  ;;  %3364 = vrot.lane.b32.xlu0 %v8689_v10, %s6278_s23  ;;  %s4870_s23 = sshll.u32 %s9489_s28, 3 }
 0x3c3   : > { %3096 = vst.msk [vmem:[#allocation2 + $0x3c] sm:$0xf0] %vm9258_vm8, %v3055_v57  ;;  %v3615_v7 = vpop.permute.xlu1 %3614  ;;  %v3057_v32 = vpop.permute.xlu0 %3056  ;;  %s308_s24 = scalar_lea.vmem %s9139_s8, %s4870_s23 }
 0x3c4   : > { %3097 = vst.msk [vmem:[#allocation2 + $0x44] sm:$0x3f] %vm9464_vm7, %v3057_v32  ;;  %vm9467_vm7 = vcmask 189568  }
 0x3c5   : > { %3148 = vrot.lane.b32.xlu1 %v8683_v44, %s6280_s26 }
 0x3c6   : > { %3224 = vrot.lane.b32.xlu0 %v8691_v33, %s6281_s30 }
 0x3c7   : > { %v3285_v49 = vpop.permute.xlu1 %3284  ;;  %v3353_v0 = vpop.permute.xlu0 %3352 }
 0x3c9   : > { %v3670_v37 = vld [vmem:[#allocation2 + $0x30] sm:$0xff]  ;;  %v3671_v25 = vld [vmem:[#allocation2 + $0x38] sm:$0xff]  ;;  %3428 = vrot.lane.b32.xlu1 %v8683_v44, %s6282_s14 }
 0x3ca   : > { %5391 = vmatprep.mubr.f32.mxu1 %v3670_v37  ;;  %3496 = vrot.lane.b32.xlu0 %v8691_v33, %s6273_s18 }
 0x3cb   : > { %5392 = vmatmul.mubr.f32.gmra.mrb[102].mxu1 %v3671_v25  ;;  %v3549_v40 = vpop.permute.xlu1 %3548  ;;  %v3617_v2 = vpop.permute.xlu0 %3616 }
 0x3cd   : > { %3222 = vrot.lane.b32.xlu1 %v8697_v52, %s6281_s30 }
 0x3ce   : > { %3150 = vrot.lane.b32.xlu0 %v8697_v52, %s6280_s26 }
 0x3cf   : > { %v3137_v56 = vpop.permute.xlu1 %3136  ;;  %v3213_v3 = vpop.permute.xlu0 %3212 }
 0x3d0   : > { %3178 = vst.msk [vmem:[#allocation2 + $0x40] sm:$0xff] %vm9465_vm9, %v3137_v56  ;;  %vm9468_vm9 = vcmask 259264  }
 0x3d1   : > { %3494 = vrot.lane.b32.xlu1 %v8697_v52, %s6273_s18 }
 0x3d2   : > { %3430 = vrot.lane.b32.xlu0 %v8697_v52, %s6282_s14 }
 0x3d3   : > { %v3417_v44 = vpop.permute.xlu1 %3416 }
 0x3d4   : > { %v3485_v33 = vpop.permute.xlu0 %3484 }
 0x3d5   : > { %3626 = vrot.lane.b32.xlu1 %v8670_v63, %s6279_s9 }
 0x3d6   : > { %3628 = vrot.lane.b32.xlu0 %v8689_v10, %s6279_s9 }
 0x3d7   : > { %v3211_v48 = vpop.permute.xlu1 %3210 }
 0x3d8   : > { %v3139_v53 = vpop.permute.xlu0 %3138  ;;  %3252 = vst.msk [vmem:[#allocation2 + $0x3c] sm:$0xf0] %vm9466_vm6, %v3211_v48  ;;  %vm9469_vm6 = vcmask 128064  }
 0x3d9   : > { %3179 = vst.msk [vmem:[#allocation2 + $0x48] sm:$0x3] %vm9467_vm7, %v3139_v53  ;;  %vm9470_vm7 = vcmask 195712  }
 0x3da   : > { %3253 = vst.msk [vmem:[#allocation2 + $0x44] sm:$0x3f] %vm9468_vm9, %v3213_v3  ;;  %vm9471_vm9 = vcmask 261316  }
 0x3db   : > { %3326 = vst.msk [vmem:[#allocation2 + $0x3f] sm:$0xfe] %vm3316_vm14, %v3285_v49  ;;  %v3483_v63 = vpop.permute.xlu1 %3482 }
 0x3dc   : > { %3327 = vst.msk [vmem:[#allocation2 + $0x47] sm:$0x7] %vm3318_vm15, %v3287_v8  ;;  %v3419_v52 = vpop.permute.xlu0 %3418 }
 0x3dd   : > { %3392 = vst.msk [vmem:[#allocation2 + $0x3b] sm:$0xe0] %vm3382_vm0, %v3351_v26 }
 0x3de   : > { %3393 = vst.msk [vmem:[#allocation2 + $0x43] sm:$0x7f] %vm3384_vm1, %v3353_v0 }
 0x3df   : > { %3458 = vst.msk [vmem:[#allocation2 + $0x3f] sm:$0xfe] %vm3448_vm2, %v3417_v44  ;;  %v3059_v17 = vpop.permute.xlu1 %3058 }
 0x3e0   : > { %3459 = vst.msk [vmem:[#allocation2 + $0x47] sm:$0x7] %vm3450_vm3, %v3419_v52  ;;  %v3291_v10 = vpop.permute.xlu0 %3290 }
 0x3e1   : > { %3524 = vst.msk [vmem:[#allocation2 + $0x3b] sm:$0xe0] %vm3514_vm4, %v3483_v63 }
 0x3e2   : > { %3525 = vst.msk [vmem:[#allocation2 + $0x43] sm:$0x7f] %vm3516_vm5, %v3485_v33 }
 0x3e3   : > { %3590 = vst.msk [vmem:[#allocation2 + $0x3e] sm:$0xfc] %vm3580_vm13, %v3549_v40  ;;  %v3355_v31 = vpop.permute.xlu1 %3354 }
 0x3e4   : > { %3591 = vst.msk [vmem:[#allocation2 + $0x46] sm:$0xf] %vm3582_vm12, %v3551_v19  ;;  %v3555_v51 = vpop.permute.xlu0 %3554 }
 0x3e5   : > { %3656 = vst.msk [vmem:[#allocation2 + $0x3a] sm:$0xc0] %vm3646_vm11, %v3615_v7 }
 0x3e6   : > { %3657 = vst.msk [vmem:[#allocation2 + $0x42] sm:$0xff] %vm9259_vm10, %v3617_v2  ;;  %vm9473_vm10 = vcmask 259264  }
 0x3e7   : > { %3098 = vst.msk [vmem:[#allocation2 + $0x4c] sm:$0xf0] %vm9258_vm8, %v3059_v17  ;;  %v3619_v55 = vpop.permute.xlu1 %3618  ;;  %vm9472_vm8 = vcmask 189568  }
 0x3e8   : > { %v3061_v11 = vpop.permute.xlu0 %3060 }
 0x3e9   : > { %3099 = vst.msk [vmem:[#allocation2 + $0x54] sm:$0x3f] %vm9469_vm6, %v3061_v11 }
 0x3eb   : > { %v3289_v39 = vpop.permute.xlu1 %3288 }
 0x3ec   : > { %v3357_v20 = vpop.permute.xlu0 %3356 }
 0x3ed   : > { %v3672_v54 = vld [vmem:[#allocation2 + $0x40] sm:$0xff]  ;;  %v3673_v46 = vld [vmem:[#allocation2 + $0x48] sm:$0xff] }
 0x3ee   : > { %5394 = vmatprep.mubr.f32.mxu1 %v3672_v54 }
 0x3ef   : > { %5395 = vmatmul.mubr.f32.gmra.mrb[104].mxu1 %v3673_v46  ;;  %v3553_v4 = vpop.permute.xlu1 %3552 }
 0x3f0   : > { %v3621_v24 = vpop.permute.xlu0 %3620 }
 0x3f3   : > { %v3141_v34 = vpop.permute.xlu1 %3140 }
 0x3f4   : > { %v3217_v22 = vpop.permute.xlu0 %3216  ;;  %3180 = vst.msk [vmem:[#allocation2 + $0x50] sm:$0xff] %vm9470_vm7, %v3141_v34 }
 0x3f7   : > { %v3421_v23 = vpop.permute.xlu1 %3420 }
 0x3f8   : > { %v3489_v59 = vpop.permute.xlu0 %3488 }
 0x3fb   : > { %v3215_v6 = vpop.permute.xlu1 %3214 }
 0x3fc   : > { %v3143_v60 = vpop.permute.xlu0 %3142  ;;  %3254 = vst.msk [vmem:[#allocation2 + $0x4c] sm:$0xf0] %vm9471_vm9, %v3215_v6 }
 0x3fd   : > { %3181 = vst.msk [vmem:[#allocation2 + $0x58] sm:$0x3] %vm9472_vm8, %v3143_v60  ;;  %vm9474_vm8 = vcmask 654912  }
 0x3fe   : > { %3255 = vst.msk [vmem:[#allocation2 + $0x54] sm:$0x3f] %vm9473_vm10, %v3217_v22  ;;  %vm9475_vm10 = vcmask 130116  }
 0x3ff   : > { %3328 = vst.msk [vmem:[#allocation2 + $0x4f] sm:$0xfe] %vm3316_vm14, %v3289_v39  ;;  %v3487_v13 = vpop.permute.xlu1 %3486 }
 0x400   : > { %3329 = vst.msk [vmem:[#allocation2 + $0x57] sm:$0x7] %vm3318_vm15, %v3291_v10  ;;  %v3423_v47 = vpop.permute.xlu0 %3422  ;;  %v8931_v10 = vld [vmem:[%s9135_s4] ss:$0 sm:$0xff] }
 0x401   : > { %3394 = vst.msk [vmem:[#allocation2 + $0x4b] sm:$0xe0] %vm3382_vm0, %v3355_v31 }
 0x402   : > { %3395 = vst.msk [vmem:[#allocation2 + $0x53] sm:$0x7f] %vm3384_vm1, %v3357_v20 }
 0x403   : > { %3460 = vst.msk [vmem:[#allocation2 + $0x4f] sm:$0xfe] %vm3448_vm2, %v3421_v23  ;;  %v3063_v43 = vpop.permute.xlu1 %3062 }
 0x404   : > { %3461 = vst.msk [vmem:[#allocation2 + $0x57] sm:$0x7] %vm3450_vm3, %v3423_v47  ;;  %v3295_v36 = vpop.permute.xlu0 %3294 }
 0x405   : > { %3526 = vst.msk [vmem:[#allocation2 + $0x4b] sm:$0xe0] %vm3514_vm4, %v3487_v13 }
 0x406   : > { %3527 = vst.msk [vmem:[#allocation2 + $0x53] sm:$0x7f] %vm3516_vm5, %v3489_v59 }
 0x407   : > { %3592 = vst.msk [vmem:[#allocation2 + $0x4e] sm:$0xfc] %vm3580_vm13, %v3553_v4  ;;  %v3359_v38 = vpop.permute.xlu1 %3358 }
 0x408   : > { %3593 = vst.msk [vmem:[#allocation2 + $0x56] sm:$0xf] %vm3582_vm12, %v3555_v51  ;;  %v3559_v42 = vpop.permute.xlu0 %3558 }
 0x409   : > { %3658 = vst.msk [vmem:[#allocation2 + $0x4a] sm:$0xc0] %vm3646_vm11, %v3619_v55 }
 0x40a   : > { %3659 = vst.msk [vmem:[#allocation2 + $0x52] sm:$0xff] %vm9474_vm8, %v3621_v24  ;;  %vm9476_vm8 = vcmask 189568  }
 0x40b   : > { %3100 = vst.msk [vmem:[#allocation2 + $0x5c] sm:$0xf0] %vm9475_vm10, %v3063_v43  ;;  %v3623_v45 = vpop.permute.xlu1 %3622  ;;  %vm9477_vm10 = vcmask 259264  }
 0x40c   : > { %v3065_v61 = vpop.permute.xlu0 %3064 }
 0x40d   : > { %3101 = vst.msk [vmem:[#allocation2 + $0x64] sm:$0x3f] %vm9469_vm6, %v3065_v61  ;;  %vm9478_vm6 = vcmask 654912  }
 0x40f   : > { %v3293_v15 = vpop.permute.xlu1 %3292 }
 0x410   : > { %v3361_v50 = vpop.permute.xlu0 %3360 }
 0x411   : > { %v3674_v62 = vld [vmem:[#allocation2 + $0x50] sm:$0xff]  ;;  %v3675_v5 = vld [vmem:[#allocation2 + $0x58] sm:$0xff] }
 0x412   : > { %5397 = vmatprep.mubr.f32.mxu1 %v3674_v62 }
 0x413   : > { %5398 = vmatmul.mubr.f32.gmra.mrb[106].mxu1 %v3675_v5  ;;  %v3557_v28 = vpop.permute.xlu1 %3556 }
 0x414   : > { %v3625_v9 = vpop.permute.xlu0 %3624 }
 0x417   : > { %v3145_v14 = vpop.permute.xlu1 %3144 }
 0x418   : > { %v3221_v1 = vpop.permute.xlu0 %3220  ;;  %3182 = vst.msk [vmem:[#allocation2 + $0x60] sm:$0xff] %vm9470_vm7, %v3145_v14  ;;  %vm9479_vm7 = vcmask 130116  }
 0x41b   : > { %v3425_v30 = vpop.permute.xlu1 %3424 }
 0x41c   : > { %v3493_v35 = vpop.permute.xlu0 %3492 }
 0x41f   : > { %v3219_v41 = vpop.permute.xlu1 %3218 }
 0x420   : > { %v3147_v27 = vpop.permute.xlu0 %3146  ;;  %3256 = vst.msk [vmem:[#allocation2 + $0x5c] sm:$0xf0] %vm9471_vm9, %v3219_v41  ;;  %vm9480_vm9 = vcmask 128064  }
 0x421   : > { %3183 = vst.msk [vmem:[#allocation2 + $0x68] sm:$0x3] %vm9476_vm8, %v3147_v27  ;;  %vm9481_vm8 = vcmask 195712  }
 0x422   : > { %3257 = vst.msk [vmem:[#allocation2 + $0x64] sm:$0x3f] %vm9477_vm10, %v3221_v1  ;;  %vm9482_vm10 = vcmask 261316  }
 0x423   : > { %3330 = vst.msk [vmem:[#allocation2 + $0x5f] sm:$0xfe] %vm3316_vm14, %v3293_v15  ;;  %v3491_v18 = vpop.permute.xlu1 %3490 }
 0x424   : > { %3331 = vst.msk [vmem:[#allocation2 + $0x67] sm:$0x7] %vm3318_vm15, %v3295_v36  ;;  %v3427_v58 = vpop.permute.xlu0 %3426 }
 0x425   : > { %3396 = vst.msk [vmem:[#allocation2 + $0x5b] sm:$0xe0] %vm3382_vm0, %v3359_v38 }
 0x426   : > { %3397 = vst.msk [vmem:[#allocation2 + $0x63] sm:$0x7f] %vm3384_vm1, %v3361_v50 }
 0x427   : > { %3462 = vst.msk [vmem:[#allocation2 + $0x5f] sm:$0xfe] %vm3448_vm2, %v3425_v30  ;;  %v3067_v12 = vpop.permute.xlu1 %3066 }
 0x428   : > { %3463 = vst.msk [vmem:[#allocation2 + $0x67] sm:$0x7] %vm3450_vm3, %v3427_v58  ;;  %v3299_v21 = vpop.permute.xlu0 %3298 }
 0x429   : > { %3528 = vst.msk [vmem:[#allocation2 + $0x5b] sm:$0xe0] %vm3514_vm4, %v3491_v18 }
 0x42a   : > { %3529 = vst.msk [vmem:[#allocation2 + $0x63] sm:$0x7f] %vm3516_vm5, %v3493_v35 }
 0x42b   : > { %3594 = vst.msk [vmem:[#allocation2 + $0x5e] sm:$0xfc] %vm3580_vm13, %v3557_v28  ;;  %v3363_v57 = vpop.permute.xlu1 %3362 }
 0x42c   : > { %3595 = vst.msk [vmem:[#allocation2 + $0x66] sm:$0xf] %vm3582_vm12, %v3559_v42  ;;  %v3563_v8 = vpop.permute.xlu0 %3562 }
 0x42d   : > { %3660 = vst.msk [vmem:[#allocation2 + $0x5a] sm:$0xc0] %vm3646_vm11, %v3623_v45 }
 0x42e   : > { %3661 = vst.msk [vmem:[#allocation2 + $0x62] sm:$0xff] %vm9478_vm6, %v3625_v9  ;;  %vm9483_vm6 = vcmask 189568  }
 0x42f   : > { %3102 = vst.msk [vmem:[#allocation2 + $0x6c] sm:$0xf0] %vm9479_vm7, %v3067_v12  ;;  %v3297_v7 = vpop.permute.xlu1 %3296  ;;  %vm9484_vm7 = vcmask 259264  }
 0x430   : > { %v3069_v32 = vpop.permute.xlu0 %3068 }
 0x431   : > { %3103 = vst.msk [vmem:[#allocation2 + $0x74] sm:$0x3f] %vm9480_vm9, %v3069_v32 }
 0x433   : > { %v3561_v49 = vpop.permute.xlu1 %3560 }
 0x434   : > { %v5384_v19 = vpop.f32.mrb[96].mxu1  ;;  %v3365_v0 = vpop.permute.xlu0 %3364 }
 0x435   : > { %v3769_v26 = vpop.f32.mrb[97].mxu1  ;;  %v3676_v37 = vld [vmem:[#allocation2 + $0x60] sm:$0xff]  ;;  %v3677_v25 = vld [vmem:[#allocation2 + $0x68] sm:$0xff]  ;;  %v3775_v17 = vadd.f32 %v5384_v19, %v8931_v10 }
 0x436   : > { %5400 = vmatprep.mubr.f32.mxu1 %v3676_v37  ;;  %v3770_v51 = vadd.f32 %v8931_v10, %v3769_v26 }
 0x437   : > { %5401 = vmatmul.mubr.f32.gmra.mrb[108].mxu1 %v3677_v25  ;;  %v3149_v40 = vpop.permute.xlu1 %3148  ;;  %v3849_v31 = vmax.f32 %v3775_v17, 0.0 }
 0x438   : > { %v3225_v2 = vpop.permute.xlu0 %3224  ;;  %3184 = vst.msk [vmem:[#allocation2 + $0x70] sm:$0xff] %vm9481_vm8, %v3149_v40  ;;  %v3848_v54 = vmax.f32 %v3770_v51, 0.0 }
 0x439   : > { %v4698_v24 = vrot.slane %v3849_v31, 1 }
 0x43a   : > { %v3877_v22 = vrot.slane %v3848_v54, 1  ;;  %v4060_v23 = vrot.slane %v3848_v54, 2  ;;  %v4150_v6 = vrot.slane %v3848_v54, 3  ;;  %v4240_v60 = vrot.slane %v3848_v54, 4 }
 0x43b   : > { %v3429_v56 = vpop.permute.xlu1 %3428  ;;  %v4330_v13 = vrot.slane %v3848_v54, 5  ;;  %v4420_v43 = vrot.slane %v3848_v54, 6  ;;  %v4510_v42 = vrot.slane %v3848_v54, 7 }
 0x43c   : > { %v3497_v3 = vpop.permute.xlu0 %3496 }
 0x43f   : > { %v3223_v44 = vpop.permute.xlu1 %3222 }
 0x440   : > { %v3151_v33 = vpop.permute.xlu0 %3150  ;;  %3258 = vst.msk [vmem:[#allocation2 + $0x6c] sm:$0xf0] %vm9482_vm10, %v3223_v44 }
 0x441   : > { %3185 = vst.msk [vmem:[#allocation2 + $0x78] sm:$0x3] %vm9483_vm6, %v3151_v33 }
 0x442   : > { %3259 = vst.msk [vmem:[#allocation2 + $0x74] sm:$0x3f] %vm9484_vm7, %v3225_v2 }
 0x443   : > { %3332 = vst.msk [vmem:[#allocation2 + $0x6f] sm:$0xfe] %vm3316_vm14, %v3297_v7  ;;  %v3495_v48 = vpop.permute.xlu1 %3494  ;;  %vm9485_vm14 = vcmask 654912  }
 0x444   : > { %3333 = vst.msk [vmem:[#allocation2 + $0x77] sm:$0x7] %vm3318_vm15, %v3299_v21  ;;  %v3431_v53 = vpop.permute.xlu0 %3430  ;;  %vm6283_vm15 = vmmov 0  }
 0x445   : > { %3398 = vst.msk [vmem:[#allocation2 + $0x6b] sm:$0xe0] %vm3382_vm0, %v3363_v57  ;;  %vm3887_vm0 = vcmask 1044484  }
 0x446   : > { %3399 = vst.msk [vmem:[#allocation2 + $0x73] sm:$0x7f] %vm3384_vm1, %v3365_v0  ;;  %vm3890_vm1 = vcmask 1045509  }
 0x447   : > { %3464 = vst.msk [vmem:[#allocation2 + $0x6f] sm:$0xfe] %vm3448_vm2, %v3429_v56  ;;  %v3627_v63 = vpop.permute.xlu1 %3626  ;;  %vm3893_vm2 = vcmask 1046534  }
 0x448   : > { %3465 = vst.msk [vmem:[#allocation2 + $0x77] sm:$0x7] %vm3450_vm3, %v3431_v53  ;;  %v3629_v52 = vpop.permute.xlu0 %3628  ;;  %vm3896_vm3 = vcmask 1047559  }
 0x449   : > { %3530 = vst.msk [vmem:[#allocation2 + $0x6b] sm:$0xe0] %vm3514_vm4, %v3495_v48  ;;  %vm3898_vm4 = vcmask 130048  }
 0x44a   : > { %3531 = vst.msk [vmem:[#allocation2 + $0x73] sm:$0x7f] %vm3516_vm5, %v3497_v3 }
 0x44b   : > { %3596 = vst.msk [vmem:[#allocation2 + $0x6e] sm:$0xfc] %vm3580_vm13, %v3561_v49  ;;  %vm3884_vm13 = vcmask 1043459  }
 0x44c   : > { %3597 = vst.msk [vmem:[#allocation2 + $0x76] sm:$0xf] %vm3582_vm12, %v3563_v8  ;;  %vm3878_vm12 = vcmask 1041409  }
 0x44d   : > { %3662 = vst.msk [vmem:[#allocation2 + $0x6a] sm:$0xc0] %vm3646_vm11, %v3627_v63  ;;  %vm3881_vm11 = vcmask 1042434  }
 0x44e   : > { %3663 = vst.msk [vmem:[#allocation2 + $0x72] sm:$0xff] %vm9485_vm14, %v3629_v52 }
 0x455   : > { %v3678_v46 = vld [vmem:[#allocation2 + $0x70] sm:$0xff]  ;;  %v3679_v55 = vld [vmem:[#allocation2 + $0x78] sm:$0xff] }
 0x456   : > { %v5387_v11 = vpop.f32.mrb[98].mxu1  ;;  %5403 = vmatprep.mubr.f32.mxu1 %v3678_v46 }
 0x457   : > { %v3785_v39 = vadd.f32 %v5387_v11, %v8931_v10  ;;  %v3779_v20 = vpop.f32.mrb[99].mxu1  ;;  %5404 = vmatmul.mubr.f32.gmra.mrb[110].mxu1 %v3679_v55 }
 0x458   : > { %v3780_v4 = vadd.f32 %v8931_v10, %v3779_v20  ;;  %5410 = vmatprep.mubr.msk.f32.mxu1 %vm6283_vm15, %v6274_v29 }
 0x459   : > { %v3851_v34 = vmax.f32 %v3785_v39, 0.0 }
 0x45a   : > { %v3850_v59 = vmax.f32 %v3780_v4, 0.0 }
 0x45b   : > { %v4608_v47 = vrot.slane %v3851_v34, 7  ;;  %v4699_v36 = vsel %vm3878_vm12, %v3851_v34, %v4698_v24 }
 0x45c   : > { %v3879_v38 = vsel %vm3878_vm12, %v3850_v59, %v3877_v22  ;;  %v3971_v62 = vrot.slane %v3850_v59, 7  ;;  %v4061_v5 = vrot.slane %v3850_v59, 1  ;;  %v4151_v45 = vrot.slane %v3850_v59, 2 }
 0x45d   : > { %v4609_v61 = vsel %vm3878_vm12, %v4608_v47, %v3849_v31  ;;  %v4241_v15 = vrot.slane %v3850_v59, 3  ;;  %v4331_v50 = vrot.slane %v3850_v59, 4  ;;  %v4421_v28 = vrot.slane %v3850_v59, 5 }
 0x45e   : > { %v3972_v9 = vsel %vm3878_vm12, %v3971_v62, %v3848_v54  ;;  %v4062_v14 = vsel %vm3878_vm12, %v4061_v5, %v4060_v23  ;;  %v4152_v1 = vsel %vm3878_vm12, %v4151_v45, %v4150_v6  ;;  %v4511_v30 = vrot.slane %v3850_v59, 6 }
 0x45f   : > { %v4242_v35 = vsel %vm3878_vm12, %v4241_v15, %v4240_v60  ;;  %v4332_v41 = vsel %vm3878_vm12, %v4331_v50, %v4330_v13  ;;  %v4422_v27 = vsel %vm3878_vm12, %v4421_v28, %v4420_v43  ;;  %v4993_v15 = vld [vmem:[%s9136_s5 + $0x10] sm:$0xff]  ;;  %v4994_v50 = vld [vmem:[%s9136_s5 + $0x18] sm:$0xff] }
 0x460   : > { %v4512_v18 = vsel %vm3878_vm12, %v4511_v30, %v4510_v42  ;;  %v5701_v28 = vpack.c.bf16 %v4994_v50, %v4993_v15 }
 0x462   : > { %5702 = vmatpush3.bf16.msra.mxu1 %v5701_v28 }
 0x463   : > { %5703 = vmatprep.subr.bf16.mxu1 %v9449_v16 }
 0x47a   : > { %v5390_v58 = vpop.f32.mrb[100].mxu1 }
 0x47b   : > { %v3795_v21 = vadd.f32 %v5390_v58, %v8931_v10  ;;  %v3789_v12 = vpop.f32.mrb[101].mxu1 }
 0x47c   : > { %v3790_v8 = vadd.f32 %v8931_v10, %v3789_v12 }
 0x47d   : > { %v3853_v57 = vmax.f32 %v3795_v21, 0.0 }
 0x47e   : > { %v3852_v19 = vmax.f32 %v3790_v8, 0.0 }
 0x47f   : > { %v4610_v26 = vrot.slane %v3853_v57, 6  ;;  %v4700_v37 = vrot.slane %v3853_v57, 7 }
 0x480   : > { %v3880_v25 = vrot.slane %v3852_v19, 7  ;;  %v3973_v7 = vrot.slane %v3852_v19, 6  ;;  %v4063_v32 = vsel %vm3881_vm11, %v3852_v19, %v4062_v14  ;;  %v4153_v49 = vrot.slane %v3852_v19, 1 }
 0x481   : > { %v4611_v0 = vsel %vm3881_vm11, %v4610_v26, %v4609_v61  ;;  %v4701_v40 = vsel %vm3881_vm11, %v4700_v37, %v4699_v36  ;;  %v4243_v2 = vrot.slane %v3852_v19, 2  ;;  %v4333_v56 = vrot.slane %v3852_v19, 3 }
 0x482   : > { %v3882_v3 = vsel %vm3881_vm11, %v3880_v25, %v3879_v38  ;;  %v3974_v44 = vsel %vm3881_vm11, %v3973_v7, %v3972_v9  ;;  %v4154_v33 = vsel %vm3881_vm11, %v4153_v49, %v4152_v1  ;;  %v4423_v48 = vrot.slane %v3852_v19, 4 }
 0x483   : > { %v4244_v53 = vsel %vm3881_vm11, %v4243_v2, %v4242_v35  ;;  %v4334_v63 = vsel %vm3881_vm11, %v4333_v56, %v4332_v41  ;;  %v4513_v52 = vrot.slane %v3852_v19, 5 }
 0x484   : > { %v4424_v17 = vsel %vm3881_vm11, %v4423_v48, %v4422_v27 }
 0x485   : > { %v4514_v51 = vsel %vm3881_vm11, %v4513_v52, %v4512_v18 }
 0x49e   : > { %v5393_v31 = vpop.f32.mrb[102].mxu1 }
 0x49f   : > { %v3805_v54 = vadd.f32 %v5393_v31, %v8931_v10  ;;  %v3799_v46 = vpop.f32.mrb[103].mxu1 }
 0x4a0   : > { %v3800_v55 = vadd.f32 %v8931_v10, %v3799_v46 }
 0x4a1   : > { %v3855_v11 = vmax.f32 %v3805_v54, 0.0 }
 0x4a2   : > { %v3854_v39 = vmax.f32 %v3800_v55, 0.0 }
 0x4a3   : > { %v4612_v20 = vrot.slane %v3855_v11, 5  ;;  %v4702_v4 = vrot.slane %v3855_v11, 6 }
 0x4a4   : > { %v3883_v24 = vrot.slane %v3854_v39, 6  ;;  %v3975_v34 = vrot.slane %v3854_v39, 5  ;;  %v4064_v22 = vrot.slane %v3854_v39, 7  ;;  %v4155_v23 = vsel %vm3884_vm13, %v3854_v39, %v4154_v33 }
 0x4a5   : > { %v4613_v59 = vsel %vm3884_vm13, %v4612_v20, %v4611_v0  ;;  %v4703_v6 = vsel %vm3884_vm13, %v4702_v4, %v4701_v40  ;;  %v4245_v60 = vrot.slane %v3854_v39, 1  ;;  %v4335_v13 = vrot.slane %v3854_v39, 2 }
 0x4a6   : > { %v3885_v47 = vsel %vm3884_vm13, %v3883_v24, %v3882_v3  ;;  %v3976_v36 = vsel %vm3884_vm13, %v3975_v34, %v3974_v44  ;;  %v4065_v43 = vsel %vm3884_vm13, %v4064_v22, %v4063_v32  ;;  %v4425_v42 = vrot.slane %v3854_v39, 3 }
 0x4a7   : > { %v4246_v38 = vsel %vm3884_vm13, %v4245_v60, %v4244_v53  ;;  %v4336_v62 = vsel %vm3884_vm13, %v4335_v13, %v4334_v63  ;;  %v4515_v5 = vrot.slane %v3854_v39, 4 }
 0x4a8   : > { %v4426_v45 = vsel %vm3884_vm13, %v4425_v42, %v4424_v17 }
 0x4a9   : > { %v4516_v61 = vsel %vm3884_vm13, %v4515_v5, %v4514_v51 }
 0x4c2   : > { %v5396_v9 = vpop.f32.mrb[104].mxu1 }
 0x4c3   : > { %v3815_v14 = vadd.f32 %v5396_v9, %v8931_v10  ;;  %v3809_v1 = vpop.f32.mrb[105].mxu1 }
 0x4c4   : > { %v3810_v30 = vadd.f32 %v8931_v10, %v3809_v1 }
 0x4c5   : > { %v3857_v35 = vmax.f32 %v3815_v14, 0.0 }
 0x4c6   : > { %v3856_v41 = vmax.f32 %v3810_v30, 0.0 }
 0x4c7   : > { %v4614_v27 = vrot.slane %v3857_v35, 4  ;;  %v4704_v18 = vrot.slane %v3857_v35, 5 }
 0x4c8   : > { %v3886_v58 = vrot.slane %v3856_v41, 5  ;;  %v3977_v21 = vrot.slane %v3856_v41, 4  ;;  %v4066_v12 = vrot.slane %v3856_v41, 6  ;;  %v4156_v8 = vrot.slane %v3856_v41, 7 }
 0x4c9   : > { %v4615_v57 = vsel %vm3887_vm0, %v4614_v27, %v4613_v59  ;;  %v4705_v19 = vsel %vm3887_vm0, %v4704_v18, %v4703_v6  ;;  %v4247_v26 = vsel %vm3887_vm0, %v3856_v41, %v4246_v38  ;;  %v4337_v37 = vrot.slane %v3856_v41, 1 }
 0x4ca   : > { %v3888_v25 = vsel %vm3887_vm0, %v3886_v58, %v3885_v47  ;;  %v3978_v7 = vsel %vm3887_vm0, %v3977_v21, %v3976_v36  ;;  %v4067_v32 = vsel %vm3887_vm0, %v4066_v12, %v4065_v43  ;;  %v4157_v49 = vsel %vm3887_vm0, %v4156_v8, %v4155_v23 }
 0x4cb   : > { %v4338_v0 = vsel %vm3887_vm0, %v4337_v37, %v4336_v62  ;;  %v4427_v40 = vrot.slane %v3856_v41, 2  ;;  %v4517_v2 = vrot.slane %v3856_v41, 3 }
 0x4cd   : > { %v4428_v56 = vsel %vm3887_vm0, %v4427_v40, %v4426_v45  ;;  %v4518_v3 = vsel %vm3887_vm0, %v4517_v2, %v4516_v61 }
 0x4e6   : > { %v5399_v44 = vpop.f32.mrb[106].mxu1 }
 0x4e7   : > { %v3825_v33 = vadd.f32 %v5399_v44, %v8931_v10  ;;  %v3819_v48 = vpop.f32.mrb[107].mxu1 }
 0x4e8   : > { %v3820_v53 = vadd.f32 %v8931_v10, %v3819_v48 }
 0x4e9   : > { %v3859_v63 = vmax.f32 %v3825_v33, 0.0 }
 0x4ea   : > { %v3858_v52 = vmax.f32 %v3820_v53, 0.0 }
 0x4eb   : > { %v4616_v17 = vrot.slane %v3859_v63, 3  ;;  %v4706_v51 = vrot.slane %v3859_v63, 4  ;;  %v4998_v63 = vld [vmem:[%s9136_s5 + $0x28] sm:$0xff] }
 0x4ec   : > { %v3889_v31 = vrot.slane %v3858_v52, 4  ;;  %v3979_v54 = vrot.slane %v3858_v52, 3  ;;  %v4068_v46 = vrot.slane %v3858_v52, 5  ;;  %v4158_v55 = vrot.slane %v3858_v52, 6 }
 0x4ed   : > { %v4617_v11 = vsel %vm3890_vm1, %v4616_v17, %v4615_v57  ;;  %v4707_v39 = vsel %vm3890_vm1, %v4706_v51, %v4705_v19  ;;  %v4248_v20 = vrot.slane %v3858_v52, 7  ;;  %v4339_v4 = vsel %vm3890_vm1, %v3858_v52, %v4338_v0 }
 0x4ee   : > { %v3891_v24 = vsel %vm3890_vm1, %v3889_v31, %v3888_v25  ;;  %v3980_v34 = vsel %vm3890_vm1, %v3979_v54, %v3978_v7  ;;  %v4069_v22 = vsel %vm3890_vm1, %v4068_v46, %v4067_v32  ;;  %v4159_v23 = vsel %vm3890_vm1, %v4158_v55, %v4157_v49  ;;  %v3864_v32 = vld [vmem:[%s9136_s5] sm:$0xff]  ;;  %v3865_v49 = vld [vmem:[%s9136_s5 + $0x8] sm:$0xff] }
 0x4ef   : > { %v4249_v59 = vsel %vm3890_vm1, %v4248_v20, %v4247_v26  ;;  %v4429_v6 = vrot.slane %v3858_v52, 1  ;;  %v4519_v60 = vrot.slane %v3858_v52, 2 }
 0x4f1   : > { %v4430_v13 = vsel %vm3890_vm1, %v4429_v6, %v4428_v56  ;;  %v4520_v47 = vsel %vm3890_vm1, %v4519_v60, %v4518_v3  ;;  %v5704_v3 = vpack.c.bf16 %v3865_v49, %v3864_v32  ;;  %v5003_v60 = vld [vmem:[%s9136_s5 + $0x40] sm:$0xff] }
 0x50a   : > { %v5402_v36 = vpop.f32.mrb[108].mxu1 }
 0x50b   : > { %v3835_v43 = vadd.f32 %v5402_v36, %v8931_v10  ;;  %v3829_v42 = vpop.f32.mrb[109].mxu1  ;;  %v5006_v36 = vld [vmem:[%s9136_s5 + $0x50] sm:$0xff] }
 0x50c   : > { %v3830_v38 = vadd.f32 %v8931_v10, %v3829_v42 }
 0x50d   : > { %v3861_v62 = vmax.f32 %v3835_v43, 0.0  ;;  %v5007_v43 = vld [vmem:[%s9136_s5 + $0x58] sm:$0xff] }
 0x50e   : > { %v3860_v5 = vmax.f32 %v3830_v38, 0.0  ;;  %v5716_v42 = vpack.c.bf16 %v5007_v43, %v5006_v36  ;;  %v5009_v38 = vld [vmem:[%s9136_s5 + $0x60] sm:$0xff] }
 0x50f   : > { %v4618_v45 = vrot.slane %v3861_v62, 2  ;;  %v4708_v61 = vrot.slane %v3861_v62, 3  ;;  %v5010_v62 = vld [vmem:[%s9136_s5 + $0x68] sm:$0xff] }
 0x510   : > { %v3892_v15 = vrot.slane %v3860_v5, 3  ;;  %v3981_v50 = vrot.slane %v3860_v5, 2  ;;  %v4070_v28 = vrot.slane %v3860_v5, 4  ;;  %v4160_v9 = vrot.slane %v3860_v5, 5 }
 0x511   : > { %v4619_v14 = vsel %vm3893_vm2, %v4618_v45, %v4617_v11  ;;  %v4709_v1 = vsel %vm3893_vm2, %v4708_v61, %v4707_v39  ;;  %v4250_v30 = vrot.slane %v3860_v5, 6  ;;  %v4340_v35 = vrot.slane %v3860_v5, 7  ;;  %v5012_v45 = vld [vmem:[%s9136_s5 + $0x70] sm:$0xff]  ;;  %v5013_v61 = vld [vmem:[%s9136_s5 + $0x78] sm:$0xff] }
 0x512   : > { %v3894_v41 = vsel %vm3893_vm2, %v3892_v15, %v3891_v24  ;;  %v3982_v27 = vsel %vm3893_vm2, %v3981_v50, %v3980_v34  ;;  %v4071_v18 = vsel %vm3893_vm2, %v4070_v28, %v4069_v22  ;;  %v4161_v58 = vsel %vm3893_vm2, %v4160_v9, %v4159_v23  ;;  %v5000_v23 = vld [vmem:[%s9136_s5 + $0x30] sm:$0xff]  ;;  %v5015_v50 = vld [vmem:[%s9136_s5 + $0x80] sm:$0xff]  ;;  %v5016_v28 = vld [vmem:[%s9136_s5 + $0x88] sm:$0xff] }
 0x513   : > { %v4251_v21 = vsel %vm3893_vm2, %v4250_v30, %v4249_v59  ;;  %v4341_v12 = vsel %vm3893_vm2, %v4340_v35, %v4339_v4  ;;  %v4431_v8 = vsel %vm3893_vm2, %v3860_v5, %v4430_v13  ;;  %v4521_v57 = vrot.slane %v3860_v5, 1  ;;  %v5001_v59 = vld [vmem:[%s9136_s5 + $0x38] sm:$0xff]  ;;  %v5004_v13 = vld [vmem:[%s9136_s5 + $0x48] sm:$0xff] }
 0x514   : > { %v5710_v6 = vpack.c.bf16 %v5001_v59, %v5000_v23  ;;  %v5719_v5 = vpack.c.bf16 %v5010_v62, %v5009_v38  ;;  %v5722_v15 = vpack.c.bf16 %v5013_v61, %v5012_v45  ;;  %v5725_v9 = vpack.c.bf16 %v5016_v28, %v5015_v50 }
 0x515   : > { %v4522_v19 = vsel %vm3893_vm2, %v4521_v57, %v4520_v47  ;;  %v5713_v47 = vpack.c.bf16 %v5004_v13, %v5003_v60 }
 0x52a   : > { %v5405_v26 = vpop.f32.mrb[110].mxu1 }
 0x52b   : > { %v3845_v37 = vadd.f32 %v5405_v26, %v8931_v10  ;;  %v3839_v25 = vpop.f32.mrb[111].mxu1 }
 0x52c   : > { %v3840_v7 = vadd.f32 %v8931_v10, %v3839_v25  ;;  %v4997_v10 = vld [vmem:[%s9136_s5 + $0x20] sm:$0xff] }
 0x52d   : > { %v3863_v0 = vmax.f32 %v3845_v37, 0.0  ;;  %v5707_v34 = vpack.c.bf16 %v4998_v63, %v4997_v10 }
 0x52e   : > { %v3862_v40 = vmax.f32 %v3840_v7, 0.0 }
 0x52f   : > { %v4620_v2 = vrot.slane %v3863_v0, 1  ;;  %v4710_v56 = vrot.slane %v3863_v0, 2 }
 0x530   : > { %v3895_v44 = vrot.slane %v3862_v40, 2  ;;  %v3983_v33 = vrot.slane %v3862_v40, 1  ;;  %v4072_v48 = vrot.slane %v3862_v40, 3  ;;  %v4162_v53 = vrot.slane %v3862_v40, 4 }
 0x531   : > { %v4252_v52 = vrot.slane %v3862_v40, 5  ;;  %v4342_v17 = vrot.slane %v3862_v40, 6  ;;  %v4432_v51 = vrot.slane %v3862_v40, 7  ;;  %v4523_v31 = vsel %vm3896_vm3, %v3862_v40, %v4522_v19 }
 0x532   : > { %v3897_v54 = vsel %vm3896_vm3, %v3895_v44, %v3894_v41  ;;  %v3984_v46 = vsel %vm3896_vm3, %v3983_v33, %v3982_v27  ;;  %v4073_v55 = vsel %vm3896_vm3, %v4072_v48, %v4071_v18  ;;  %v4163_v11 = vsel %vm3896_vm3, %v4162_v53, %v4161_v58 }
 0x533   : > { %5411 = vmatmul.mubr.msk.f32.vlgmr.msra.gmra.mrb[112].mxu1 %vm3898_vm4, %v3897_v54  ;;  %v4253_v39 = vsel %vm3896_vm3, %v4252_v52, %v4251_v21  ;;  %v4343_v20 = vsel %vm3896_vm3, %v4342_v17, %v4341_v12  ;;  %v4433_v4 = vsel %vm3896_vm3, %v4432_v51, %v4431_v8  ;;  %v4621_v24 = vsel %vm3896_vm3, %v4620_v2, %v4619_v14  ;;  %v5018_v14 = vld [vmem:[%s9136_s5 + $0x90] sm:$0xff]  ;;  %v5021_v52 = vld [vmem:[%s9137_s6] ss:$0 sm:$0xff] }
 0x534   : > { %5705 = vmatpush3.bf16.msra.mxu1 %v5704_v3  ;;  %5417 = vmatprep.mubr.msk.f32.mxu1 %vm6283_vm15, %v6274_v29  ;;  %v4711_v22 = vsel %vm3896_vm3, %v4710_v56, %v4709_v1  ;;  %v5019_v1 = vld [vmem:[%s9136_s5 + $0x98] sm:$0xff]  ;;  %v4793_v44 = vlaneseq }
 0x535   : > { %5706 = vmatprep.subr.bf16.mxu1 %v9449_v16  ;;  %v5728_v30 = vpack.c.bf16 %v5019_v1, %v5018_v14 }
 0x536   : > { %v4794_v10 = vand.u32 127, %v4793_v44 }
 0x537   : > { %5418 = vmatmul.mubr.msk.f32.vlgmr.msra.gmra.mrb[114].mxu1 %vm3898_vm4, %v3984_v46 }
 0x538   : > { %5708 = vmatpush3.bf16.msra.mxu1 %v5707_v34  ;;  %5424 = vmatprep.mubr.msk.f32.mxu1 %vm6283_vm15, %v6274_v29  ;;  %vm4795_vm5 = vcmp.lt.s32.totalorder %v4794_v10, 3 }
 0x539   : > { %5709 = vmatprep.subr.bf16.mxu1 %v9449_v16 }
 0x53b   : > { %5425 = vmatmul.mubr.msk.f32.vlgmr.msra.gmra.mrb[116].mxu1 %vm3898_vm4, %v4073_v55 }
 0x53c   : > { %5711 = vmatpush3.bf16.msra.mxu1 %v5710_v6  ;;  %5431 = vmatprep.mubr.msk.f32.mxu1 %vm6283_vm15, %v6274_v29 }
 0x53d   : > { %5712 = vmatprep.subr.bf16.mxu1 %v9449_v16 }
 0x53f   : > { %5432 = vmatmul.mubr.msk.f32.vlgmr.msra.gmra.mrb[118].mxu1 %vm3898_vm4, %v4163_v11 }
 0x540   : > { %5714 = vmatpush3.bf16.msra.mxu1 %v5713_v47  ;;  %5438 = vmatprep.mubr.msk.f32.mxu1 %vm6283_vm15, %v6274_v29 }
 0x541   : > { %5715 = vmatprep.subr.bf16.mxu1 %v9449_v16 }
 0x543   : > { %5439 = vmatmul.mubr.msk.f32.vlgmr.msra.gmra.mrb[120].mxu1 %vm3898_vm4, %v4253_v39 }
 0x544   : > { %5717 = vmatpush3.bf16.msra.mxu1 %v5716_v42  ;;  %5445 = vmatprep.mubr.msk.f32.mxu1 %vm6283_vm15, %v6274_v29 }
 0x545   : > { %5718 = vmatprep.subr.bf16.mxu1 %v9449_v16 }
 0x547   : > { %5446 = vmatmul.mubr.msk.f32.vlgmr.msra.gmra.mrb[122].mxu1 %vm3898_vm4, %v4343_v20 }
 0x548   : > { %5720 = vmatpush3.bf16.msra.mxu1 %v5719_v5  ;;  %5452 = vmatprep.mubr.msk.f32.mxu1 %vm6283_vm15, %v6274_v29 }
 0x549   : > { %5721 = vmatprep.subr.bf16.mxu1 %v9449_v16 }
 0x54b   : > { %5453 = vmatmul.mubr.msk.f32.vlgmr.msra.gmra.mrb[124].mxu1 %vm3898_vm4, %v4433_v4 }
 0x54c   : > { %5723 = vmatpush3.bf16.msra.mxu1 %v5722_v15  ;;  %5459 = vmatprep.mubr.msk.f32.mxu1 %vm6283_vm15, %v6274_v29 }
 0x54d   : > { %5724 = vmatprep.subr.bf16.mxu1 %v9449_v16 }
 0x54f   : > { %5460 = vmatmul.mubr.msk.f32.vlgmr.msra.gmra.mrb[126].mxu1 %vm3898_vm4, %v4523_v31 }
 0x550   : > { %5726 = vmatpush3.bf16.msra.mxu1 %v5725_v9  ;;  %5466 = vmatprep.mubr.msk.f32.mxu1 %vm6283_vm15, %v6274_v29 }
 0x551   : > { %5727 = vmatprep.subr.bf16.mxu1 %v9449_v16 }
 0x553   : > { %5467 = vmatmul.mubr.msk.f32.vlgmr.msra.gmra.mrb[128].mxu1 %vm3898_vm4, %v4621_v24 }
 0x554   : > { %5729 = vmatpush3.bf16.msra.mxu1 %v5728_v30  ;;  %5473 = vmatprep.mubr.msk.f32.mxu1 %vm6283_vm15, %v6274_v29 }
 0x557   : > { %5474 = vmatmul.mubr.msk.f32.vlgmr.msra.gmra.mrb[130].mxu1 %vm3898_vm4, %v4711_v22 }
 0x606   : > { %v3967_v35 = vpop.f32.mrb[112].mxu1 }
 0x607   : > { %v5412_v41 = vpop.f32.mrb[113].mxu1 }
 0x60a   : > { %v4053_v27 = vpop.f32.mrb[114].mxu1 }
 0x60b   : > { %v4054_v18 = vadd.f32 %v4053_v27, %v3967_v35  ;;  %v5419_v58 = vpop.f32.mrb[115].mxu1 }
 0x60e   : > { %v4142_v21 = vpop.f32.mrb[116].mxu1 }
 0x60f   : > { %v4146_v12 = vadd.f32 %v4142_v21, %v4054_v18  ;;  %v5426_v8 = vpop.f32.mrb[117].mxu1 }
 0x612   : > { %v4232_v57 = vpop.f32.mrb[118].mxu1 }
 0x613   : > { %v4236_v19 = vadd.f32 %v4232_v57, %v4146_v12  ;;  %v5433_v26 = vpop.f32.mrb[119].mxu1 }
 0x616   : > { %v4322_v16 = vpop.f32.mrb[120].mxu1 }
 0x617   : > { %v4326_v37 = vadd.f32 %v4322_v16, %v4236_v19  ;;  %v5440_v25 = vpop.f32.mrb[121].mxu1 }
 0x61a   : > { %v4412_v7 = vpop.f32.mrb[122].mxu1 }
 0x61b   : > { %v4416_v32 = vadd.f32 %v4412_v7, %v4326_v37  ;;  %v5447_v49 = vpop.f32.mrb[123].mxu1 }
 0x61e   : > { %v4502_v29 = vpop.f32.mrb[124].mxu1 }
 0x61f   : > { %v4506_v0 = vadd.f32 %v4502_v29, %v4416_v32  ;;  %v5454_v40 = vpop.f32.mrb[125].mxu1 }
 0x622   : > { %v4592_v2 = vpop.f32.mrb[126].mxu1 }
 0x623   : > { %v4596_v56 = vadd.f32 %v4592_v2, %v4506_v0  ;;  %v5461_v3 = vpop.f32.mrb[127].mxu1 }
 0x626   : > { %v4690_v33 = vpop.f32.mrb[128].mxu1 }
 0x627   : > { %v4694_v48 = vadd.f32 %v4690_v33, %v4596_v56  ;;  %v5468_v53 = vpop.f32.mrb[129].mxu1 }
 0x62a   : > { %v4780_v63 = vpop.f32.mrb[130].mxu1 }
 0x62b   : > { %v4784_v17 = vadd.f32 %v4780_v63, %v4694_v48  ;;  %v5475_v51 = vpop.f32.mrb[131].mxu1 }
 0x62d   : > { %v4792_v31 = vadd.f32 %v5021_v52, %v4784_v17 }
 0x62f   : > { %v4796_v54 = vsel %vm4795_vm5, %v4792_v31, -1e+30 }
 0x630   : > { %4797 = vmax.xlane.f32.xlu1 %v4796_v54 }
 0x6bd   : > { %v4798_v46 = vpop.xlane.xlu1 %4797 }
 0x6be   : > { %v4799_v55 = vsub.f32 %v4796_v54, %v4798_v46 }
 0x6c0   : > { %v4800_v11 = vmul.f32 1.442695, %v4799_v55 }
 0x6c2   : > { %6259 = vpow2.f32 %v4800_v11 }
 0x6cc   : > { %v6260_v39 = vpop.eup %6259 }
 0x6cd   : > { %4802 = vadd.xlane.f32.xlu0 %v6260_v39 }
 0x75a   : > { %v4803_v20 = vpop.xlane.xlu0 %4802 }
 0x75b   : > { %6261 = vrcp.f32 %v4803_v20 }
 0x765   : > { %v6262_v4 = vpop.eup %6261 }
 0x766   : > { %v4805_v24 = vmul.f32 %v6262_v4, %v4803_v20 }
 0x768   : > { %v4806_v34 = vsub.f32 2.0, %v4805_v24 }
 0x76a   : > { %v4807_v22 = vmul.f32 %v6262_v4, %v4806_v34 }
 0x76c   : > { %v4808_v23 = vmul.f32 %v6260_v39, %v4807_v22 }
 0x76e   : > { %4809 = vst [vmem:[%s308_s24] sm:$0xff] %v4808_v23 }
 0x76f PF: > { %s18_s27 = sadd.s32 1, %s6269_s27  }
 0x770   : > { %p15_p5 = scmp.ge.s32.totalorder %s18_s27, 4  }
 0x772   :  { %17 = sbr.rel (!%p15_p5) target bundleno = 1 (0x1), region = 91 }

</bundles_post_ra>
